<compile_context>
chip_gen: v6e
topology: v6e:2x2x1
jax: 0.10.0
libtpu: 0.0.40
codegen_flags: <defaults>
</compile_context>

<pallas_src>
import functools

import jax
import jax.numpy as jnp
from jax import lax
from jax.experimental import pallas as pl
from jax.experimental.pallas import tpu as pltpu

NUM_TEXTS = 312                 # fixed by nn.Linear(312, 312) in the module __init__
N_PAD = 384                     # 312 padded up to 3 * 128 lanes
D_PAD = 128                     # d_vision/d_text/d_embed padded to 128 lanes
CP_PAD = 256                    # 3*patch*patch = 192 padded to 2 lane-vregs
B_PAD = 8                       # batch rows padded to one full sublane tile
LOGIT_SCALE = float(1.0 / 0.07) # CLIP's exp(logit_scale) initial value (stand-in)
BN_EPS = 1e-5
NORM_EPS = 1e-12


# ----------------------------------------------------------------------------- kernel
def _fused_forward_kernel(
    pooled_ref,                        # (B_PAD, CP_PAD) f32  per-image mean-pooled patches
    wvis_ref, bvis_ref,                # (CP_PAD, D_PAD) bf16 / (1, D_PAD) f32  (patch_w@vis_proj fused)
    ptxt_ref, tpw_ref, tpb_ref,        # (N_PAD, D_PAD) f32 / (D_PAD, D_PAD) bf16 / (1, D_PAD) f32
    wcat_ref, bcat_ref,                # (N_PAD, 2*N_PAD) bf16 / (1, 2*N_PAD) f32   [w1 | wc1]
    gamma_ref, beta_ref,               # (1, N_PAD) f32
    wc2_ref, bc2_ref,                  # (N_PAD, N_PAD) bf16 / (1, N_PAD) f32
    logits_ref, bin_ref, cls_ref,      # (B_PAD, N_PAD) f32 outputs
    *, batch, n_texts,
):
    f32 = jnp.float32
    n_pad = bin_ref.shape[1]

    # --- vision: (mean-pool o patch-embed o vis-proj) pre-folded to a single matmul ---
    img = jnp.dot(pooled_ref[...], wvis_ref[...].astype(f32),
                  preferred_element_type=f32) + bvis_ref[...]            # (B_PAD, D_PAD)

    # --- text: projection of pooled token embeddings ---
    txt = jnp.dot(ptxt_ref[...], tpw_ref[...].astype(f32),
                  preferred_element_type=f32) + tpb_ref[...]             # (N_PAD, D_PAD)

    # --- CLIP contrastive head: L2 normalize + scaled similarity ---
    img_n = img * lax.rsqrt(jnp.sum(img * img, axis=-1, keepdims=True) + NORM_EPS)
    txt_n = txt * lax.rsqrt(jnp.sum(txt * txt, axis=-1, keepdims=True) + NORM_EPS)
    txt_row = lax.broadcasted_iota(jnp.int32, txt_n.shape, 0)
    txt_n = jnp.where(txt_row < n_texts, txt_n, 0.0)     # zero padded text rows (bias made them nonzero)
    # transposed-RHS MXU dot (no explicit XLU transpose of the (384,128) text tile)
    logits = LOGIT_SCALE * pl.dot(img_n, txt_n, trans_b=True)
    logits_ref[...] = logits                                             # (B_PAD, N_PAD)

    # --- module heads: linear1 || classifier1.Linear(0) fused into one MXU push ---
    y = jnp.dot(logits, wcat_ref[...].astype(f32),
                preferred_element_type=f32) + bcat_ref[...]
    bin_ref[...] = y[:, :n_pad]                                          # linear1

    # classifier1: ReLU -> BatchNorm1d (training-mode batch stats over the VALID rows) -> Linear
    h = jnp.maximum(y[:, n_pad:], 0.0)
    valid = lax.broadcasted_iota(jnp.int32, h.shape, 0) < batch
    inv_b = 1.0 / float(batch)
    h_v = jnp.where(valid, h, 0.0)
    mean = jnp.sum(h_v, axis=0, keepdims=True) * inv_b
    centered = h - mean
    var = jnp.sum(jnp.where(valid, centered * centered, 0.0),
                  axis=0, keepdims=True) * inv_b                         # biased variance
    h_bn = centered * lax.rsqrt(var + BN_EPS) * gamma_ref[...] + beta_ref[...]
    cls_ref[...] = jnp.dot(h_bn, wc2_ref[...].astype(f32),
                           preferred_element_type=f32) + bc2_ref[...]


# ----------------------------------------------------------------------------- packing
def _pad2(x, rows, cols, dtype=None):
    x = jnp.asarray(x)
    out = jnp.pad(x, ((0, rows - x.shape[0]), (0, cols - x.shape[1])))
    return out.astype(dtype) if dtype is not None else out


def _padrow(v, cols, dtype=None):
    return _pad2(jnp.asarray(v).reshape(1, -1), 1, cols, dtype)


def init_params(key, *, patch=8, d_vision=64, d_text=48, d_embed=32, vocab=100):
    ks = jax.random.split(key, 12)
    n = NUM_TEXTS
    s = 0.02
    return {
        # synthetic CLIP encoders (stand-ins for ViT-B/32 + text transformer)
        "patch_w": s * jax.random.normal(ks[0], (3 * patch * patch, d_vision)),
        "patch_b": jnp.zeros((d_vision,), jnp.float32),
        "vis_proj_w": s * jax.random.normal(ks[1], (d_vision, d_embed)),
        "vis_proj_b": jnp.zeros((d_embed,), jnp.float32),
        "tok_emb": s * jax.random.normal(ks[2], (vocab, d_text)),
        "txt_proj_w": s * jax.random.normal(ks[3], (d_text, d_embed)),
        "txt_proj_b": jnp.zeros((d_embed,), jnp.float32),
        # module heads (exact)
        "w1": s * jax.random.normal(ks[4], (n, n)),
        "b1": s * jax.random.normal(ks[5], (n,)),
        "wc1": s * jax.random.normal(ks[6], (n, n)),
        "bc1": s * jax.random.normal(ks[7], (n,)),
        "bn_gamma": jnp.ones((n,), jnp.float32),
        "bn_beta": jnp.zeros((n,), jnp.float32),
        "wc2": s * jax.random.normal(ks[8], (n, n)),
        "bc2": s * jax.random.normal(ks[9], (n,)),
    }


def prepare_params(params):
    """One-time packing: fold linear chains, pad to lane-dense shapes, cast big weights to bf16.

    Call once outside the per-forward jit; the padded zeros are provably inert
    (padded text rows are re-zeroed in-kernel, padded weight rows/cols are zero).
    """
    # fold the vision projection into the patch embedding (both linear)
    w_vis = params["patch_w"] @ params["vis_proj_w"]                      # (Cp, d_embed)
    b_vis = params["patch_b"] @ params["vis_proj_w"] + params["vis_proj_b"]
    wcat = jnp.concatenate([_pad2(params["w1"], N_PAD, N_PAD),
                            _pad2(params["wc1"], N_PAD, N_PAD)], axis=1)  # (N_PAD, 2*N_PAD)
    bcat = jnp.concatenate([_padrow(params["b1"], N_PAD),
                            _padrow(params["bc1"], N_PAD)], axis=1)
    return {
        "w_vis": _pad2(w_vis, CP_PAD, D_PAD, jnp.bfloat16),
        "b_vis": _padrow(b_vis, D_PAD),
        "tpw": _pad2(params["txt_proj_w"], D_PAD, D_PAD, jnp.bfloat16),
        "tpb": _padrow(params["txt_proj_b"], D_PAD),
        "wcat": wcat.astype(jnp.bfloat16),
        "bcat": bcat,
        "gamma": _padrow(params["bn_gamma"], N_PAD),
        "beta": _padrow(params["bn_beta"], N_PAD),
        "wc2": _pad2(params["wc2"], N_PAD, N_PAD, jnp.bfloat16),
        "bc2": _padrow(params["bc2"], N_PAD),
        "tok_emb": jnp.asarray(params["tok_emb"], jnp.float32),  # used by XLA-side gather
    }


# ----------------------------------------------------------------------------- forward
def clip_text_image_forward(token_ids, images, prepped, *, patch=8):
    """images: NCHW float32 (B,3,H,W); token_ids: int32 (NUM_TEXTS, L); prepped: prepare_params()."""
    B, C, H, W = images.shape
    gh, gw = H // patch, W // patch
    P = gh * gw
    cp = C * patch * patch
    assert B <= B_PAD and cp <= CP_PAD

    # glue (pure layout, stays in XLA): patchify + per-image mean pool (mean commutes
    # with the linear patch embed, so pooling happens BEFORE the in-kernel matmul)
    x = images.reshape(B, C, gh, patch, gw, patch)
    patches = jnp.transpose(x, (0, 2, 4, 1, 3, 5)).reshape(B, P, cp)
    pooled = jnp.mean(patches, axis=1)                                    # (B, cp)
    pooled = jnp.pad(pooled, ((0, B_PAD - B), (0, CP_PAD - cp)))          # (B_PAD, CP_PAD)

    # glue: token embedding gather + mean pool over sequence (gather has no clean BlockSpec form)
    tok = jnp.take(prepped["tok_emb"], token_ids, axis=0)                 # (T, L, Dt)
    ptxt = jnp.mean(tok, axis=1)                                          # (T, Dt)
    ptxt = jnp.pad(ptxt, ((0, N_PAD - ptxt.shape[0]), (0, D_PAD - ptxt.shape[1])))

    def full2(r, c):
        return pl.BlockSpec((r, c), lambda i: (0, 0))

    kernel = functools.partial(_fused_forward_kernel, batch=B, n_texts=NUM_TEXTS)

    logits_pad, bin_pad, cls_pad = pl.pallas_call(
        kernel,
        out_shape=(
            jax.ShapeDtypeStruct((B_PAD, N_PAD), jnp.float32),
            jax.ShapeDtypeStruct((B_PAD, N_PAD), jnp.float32),
            jax.ShapeDtypeStruct((B_PAD, N_PAD), jnp.float32),
        ),
        grid=(1,),
        in_specs=[
            full2(B_PAD, CP_PAD),                          # pooled patches
            full2(CP_PAD, D_PAD), full2(1, D_PAD),         # fused vision weight / bias
            full2(N_PAD, D_PAD),                           # pooled text
            full2(D_PAD, D_PAD), full2(1, D_PAD),          # text projection
            full2(N_PAD, 2 * N_PAD), full2(1, 2 * N_PAD),  # [w1 | wc1], [b1 | bc1]
            full2(1, N_PAD), full2(1, N_PAD),              # BN gamma, beta
            full2(N_PAD, N_PAD), full2(1, N_PAD),          # classifier1.Linear(3)
        ],
        out_specs=(full2(B_PAD, N_PAD), full2(B_PAD, N_PAD), full2(B_PAD, N_PAD)),
        compiler_params=pltpu.CompilerParams(dimension_semantics=("arbitrary",)),
    )(pooled, prepped["w_vis"], prepped["b_vis"], ptxt, prepped["tpw"], prepped["tpb"],
      prepped["wcat"], prepped["bcat"], prepped["gamma"], prepped["beta"],
      prepped["wc2"], prepped["bc2"])

    logits_per_image = logits_pad[:B, :NUM_TEXTS]
    binary_pred1 = bin_pad[:B, :NUM_TEXTS]
    classifier_pred1 = cls_pad[:B, :NUM_TEXTS]
    return (binary_pred1, classifier_pred1), logits_per_image


# ------------------------------------------------------------------------------- main
if __name__ == "__main__":
    key = jax.random.PRNGKey(0)
    k_img, k_tok, k_par = jax.random.split(key, 3)

    B, H, W, L = 2, 32, 32, 8
    images = jax.random.normal(k_img, (B, 3, H, W), dtype=jnp.float32)   # NCHW
    token_ids = jax.random.randint(k_tok, (NUM_TEXTS, L), 0, 100)        # "prompts"
    params = init_params(k_par)
    prepped = prepare_params(params)   # one-time pad / fold / bf16 cast (outside the jitted forward)

    fwd = jax.jit(functools.partial(clip_text_image_forward, patch=8))
    (binary_pred1, classifier_pred1), logits_per_image = fwd(token_ids, images, prepped)

    jax.block_until_ready((binary_pred1, classifier_pred1, logits_per_image))
    assert binary_pred1.shape == (B, NUM_TEXTS)
    assert classifier_pred1.shape == (B, NUM_TEXTS)
    assert logits_per_image.shape == (B, NUM_TEXTS)
    assert bool(jnp.all(jnp.isfinite(binary_pred1)))
    assert bool(jnp.all(jnp.isfinite(classifier_pred1)))
    assert bool(jnp.all(jnp.isfinite(logits_per_image)))
    print("KERNEL_OK")
</pallas_src>

<mosaic_0001>
module attributes {stable_mosaic.version = 11 : i64} {
  func.func @_fused_forward_kernel(%arg0: i32, %arg1: memref<8x256xf32, #tpu.memory_space<vmem>>, %arg2: memref<256x128xbf16, #tpu.memory_space<vmem>>, %arg3: memref<1x128xf32, #tpu.memory_space<vmem>>, %arg4: memref<384x128xf32, #tpu.memory_space<vmem>>, %arg5: memref<128x128xbf16, #tpu.memory_space<vmem>>, %arg6: memref<1x128xf32, #tpu.memory_space<vmem>>, %arg7: memref<384x768xbf16, #tpu.memory_space<vmem>>, %arg8: memref<1x768xf32, #tpu.memory_space<vmem>>, %arg9: memref<1x384xf32, #tpu.memory_space<vmem>>, %arg10: memref<1x384xf32, #tpu.memory_space<vmem>>, %arg11: memref<384x384xbf16, #tpu.memory_space<vmem>>, %arg12: memref<1x384xf32, #tpu.memory_space<vmem>>, %arg13: memref<8x384xf32, #tpu.memory_space<vmem>>, %arg14: memref<8x384xf32, #tpu.memory_space<vmem>>, %arg15: memref<8x384xf32, #tpu.memory_space<vmem>>) attributes {dimension_semantics = [#tpu.dimension_semantics<arbitrary>], iteration_bounds = array<i64: 1>, scalar_prefetch = 0 : i64, scratch_operands = 0 : i64, tpu.core_type = #tpu.core_type<tc>, window_params = [{pipeline_mode = #tpu.pipeline_mode<synchronous>, transform_indices = @transform_0, window_bounds = array<i64: 8, 256>}, {pipeline_mode = #tpu.pipeline_mode<synchronous>, transform_indices = @transform_1, window_bounds = array<i64: 256, 128>}, {pipeline_mode = #tpu.pipeline_mode<synchronous>, transform_indices = @transform_2, window_bounds = array<i64: 1, 128>}, {pipeline_mode = #tpu.pipeline_mode<synchronous>, transform_indices = @transform_3, window_bounds = array<i64: 384, 128>}, {pipeline_mode = #tpu.pipeline_mode<synchronous>, transform_indices = @transform_4, window_bounds = array<i64: 128, 128>}, {pipeline_mode = #tpu.pipeline_mode<synchronous>, transform_indices = @transform_5, window_bounds = array<i64: 1, 128>}, {pipeline_mode = #tpu.pipeline_mode<synchronous>, transform_indices = @transform_6, window_bounds = array<i64: 384, 768>}, {pipeline_mode = #tpu.pipeline_mode<synchronous>, transform_indices = @transform_7, window_bounds = array<i64: 1, 768>}, {pipeline_mode = #tpu.pipeline_mode<synchronous>, transform_indices = @transform_8, window_bounds = array<i64: 1, 384>}, {pipeline_mode = #tpu.pipeline_mode<synchronous>, transform_indices = @transform_9, window_bounds = array<i64: 1, 384>}, {pipeline_mode = #tpu.pipeline_mode<synchronous>, transform_indices = @transform_10, window_bounds = array<i64: 384, 384>}, {pipeline_mode = #tpu.pipeline_mode<synchronous>, transform_indices = @transform_11, window_bounds = array<i64: 1, 384>}, {pipeline_mode = #tpu.pipeline_mode<synchronous>, transform_indices = @transform_12, window_bounds = array<i64: 8, 384>}, {pipeline_mode = #tpu.pipeline_mode<synchronous>, transform_indices = @transform_13, window_bounds = array<i64: 8, 384>}, {pipeline_mode = #tpu.pipeline_mode<synchronous>, transform_indices = @transform_14, window_bounds = array<i64: 8, 384>}]} {
    %c0 = arith.constant 0 : index
    %c0_0 = arith.constant 0 : index
    %0 = vector.load %arg1[%c0, %c0_0] : memref<8x256xf32, #tpu.memory_space<vmem>>, vector<8x256xf32>
    %c0_1 = arith.constant 0 : index
    %c0_2 = arith.constant 0 : index
    %1 = vector.load %arg2[%c0_1, %c0_2] : memref<256x128xbf16, #tpu.memory_space<vmem>>, vector<256x128xbf16>
    %2 = arith.extf %1 : vector<256x128xbf16> to vector<256x128xf32>
    %cst = arith.constant dense<0.000000e+00> : vector<8x128xf32>
    %3 = tpu.matmul %0, %2, %cst {dimension_numbers = #tpu.dot_dimension_numbers<[1], [0], [0], [1], [0, 0, 1, 1], [], []>} : vector<8x256xf32>, vector<256x128xf32>, vector<8x128xf32> -> vector<8x128xf32>
    %c0_3 = arith.constant 0 : index
    %c0_4 = arith.constant 0 : index
    %4 = vector.load %arg3[%c0_3, %c0_4] : memref<1x128xf32, #tpu.memory_space<vmem>>, vector<1x128xf32>
    %5 = vector.broadcast %4 : vector<1x128xf32> to vector<8x128xf32>
    %6 = arith.addf %3, %5 : vector<8x128xf32>
    %c0_5 = arith.constant 0 : index
    %c0_6 = arith.constant 0 : index
    %7 = vector.load %arg4[%c0_5, %c0_6] : memref<384x128xf32, #tpu.memory_space<vmem>>, vector<384x128xf32>
    %c0_7 = arith.constant 0 : index
    %c0_8 = arith.constant 0 : index
    %8 = vector.load %arg5[%c0_7, %c0_8] : memref<128x128xbf16, #tpu.memory_space<vmem>>, vector<128x128xbf16>
    %9 = arith.extf %8 : vector<128x128xbf16> to vector<128x128xf32>
    %cst_9 = arith.constant dense<0.000000e+00> : vector<384x128xf32>
    %10 = tpu.matmul %7, %9, %cst_9 {dimension_numbers = #tpu.dot_dimension_numbers<[1], [0], [0], [1], [0, 0, 1, 1], [], []>} : vector<384x128xf32>, vector<128x128xf32>, vector<384x128xf32> -> vector<384x128xf32>
    %c0_10 = arith.constant 0 : index
    %c0_11 = arith.constant 0 : index
    %11 = vector.load %arg6[%c0_10, %c0_11] : memref<1x128xf32, #tpu.memory_space<vmem>>, vector<1x128xf32>
    %12 = vector.broadcast %11 : vector<1x128xf32> to vector<384x128xf32>
    %13 = arith.addf %10, %12 : vector<384x128xf32>
    %14 = arith.mulf %6, %6 : vector<8x128xf32>
    %cst_12 = arith.constant dense<0.000000e+00> : vector<8xf32>
    %15 = vector.multi_reduction <add>, %14, %cst_12 [1] : vector<8x128xf32> to vector<8xf32>
    %16 = vector.shape_cast %15 : vector<8xf32> to vector<8x1xf32>
    %cst_13 = arith.constant 9.99999996E-13 : f32
    %17 = vector.broadcast %cst_13 : f32 to vector<8x1xf32>
    %18 = arith.addf %16, %17 : vector<8x1xf32>
    %19 = math.rsqrt %18 : vector<8x1xf32>
    %20 = vector.broadcast %19 : vector<8x1xf32> to vector<8x128xf32>
    %21 = arith.mulf %6, %20 : vector<8x128xf32>
    %22 = arith.mulf %13, %13 : vector<384x128xf32>
    %cst_14 = arith.constant dense<0.000000e+00> : vector<384xf32>
    %23 = vector.multi_reduction <add>, %22, %cst_14 [1] : vector<384x128xf32> to vector<384xf32>
    %24 = vector.shape_cast %23 : vector<384xf32> to vector<384x1xf32>
    %cst_15 = arith.constant 9.99999996E-13 : f32
    %25 = vector.broadcast %cst_15 : f32 to vector<384x1xf32>
    %26 = arith.addf %24, %25 : vector<384x1xf32>
    %27 = math.rsqrt %26 : vector<384x1xf32>
    %28 = vector.broadcast %27 : vector<384x1xf32> to vector<384x128xf32>
    %29 = arith.mulf %13, %28 : vector<384x128xf32>
    %30 = tpu.iota {dimensions = array<i32: 0>} : vector<384x128xi32>
    %c312_i32 = arith.constant 312 : i32
    %31 = vector.broadcast %c312_i32 : i32 to vector<384x128xi32>
    %32 = arith.cmpi slt, %30, %31 : vector<384x128xi32>
    %cst_16 = arith.constant 0.000000e+00 : f32
    %33 = vector.broadcast %cst_16 : f32 to vector<384x128xf32>
    %34 = arith.select %32, %29, %33 : vector<384x128xi1>, vector<384x128xf32>
    %cst_17 = arith.constant dense<0.000000e+00> : vector<8x384xf32>
    %35 = tpu.matmul %21, %34, %cst_17 {dimension_numbers = #tpu.dot_dimension_numbers<[1], [1], [0], [0], [0, 0, 1, 0], [], []>} : vector<8x128xf32>, vector<384x128xf32>, vector<8x384xf32> -> vector<8x384xf32>
    %cst_18 = arith.constant 14.2857141 : f32
    %36 = vector.broadcast %cst_18 : f32 to vector<8x384xf32>
    %37 = arith.mulf %36, %35 : vector<8x384xf32>
    %c0_19 = arith.constant 0 : index
    %c0_20 = arith.constant 0 : index
    %38 = vector.load %arg13[%c0_19, %c0_20] : memref<8x384xf32, #tpu.memory_space<vmem>>, vector<8x384xf32>
    tpu.vector_store %arg13[%c0_19, %c0_20], %37 {strides = array<i32>} : memref<8x384xf32, #tpu.memory_space<vmem>>, vector<8x384xf32>,
    %c0_21 = arith.constant 0 : index
    %c0_22 = arith.constant 0 : index
    %39 = vector.load %arg7[%c0_21, %c0_22] : memref<384x768xbf16, #tpu.memory_space<vmem>>, vector<384x768xbf16>
    %40 = arith.extf %39 : vector<384x768xbf16> to vector<384x768xf32>
    %cst_23 = arith.constant dense<0.000000e+00> : vector<8x768xf32>
    %41 = tpu.matmul %37, %40, %cst_23 {dimension_numbers = #tpu.dot_dimension_numbers<[1], [0], [0], [1], [0, 0, 1, 1], [], []>} : vector<8x384xf32>, vector<384x768xf32>, vector<8x768xf32> -> vector<8x768xf32>
    %c0_24 = arith.constant 0 : index
    %c0_25 = arith.constant 0 : index
    %42 = vector.load %arg8[%c0_24, %c0_25] : memref<1x768xf32, #tpu.memory_space<vmem>>, vector<1x768xf32>
    %43 = vector.broadcast %42 : vector<1x768xf32> to vector<8x768xf32>
    %44 = arith.addf %41, %43 : vector<8x768xf32>
    %45 = vector.extract_strided_slice %44 {offsets = [0, 0], sizes = [8, 384], strides = [1, 1]} : vector<8x768xf32> to vector<8x384xf32>
    %c0_26 = arith.constant 0 : index
    %c0_27 = arith.constant 0 : index
    %46 = vector.load %arg14[%c0_26, %c0_27] : memref<8x384xf32, #tpu.memory_space<vmem>>, vector<8x384xf32>
    tpu.vector_store %arg14[%c0_26, %c0_27], %45 {strides = array<i32>} : memref<8x384xf32, #tpu.memory_space<vmem>>, vector<8x384xf32>,
    %47 = vector.extract_strided_slice %44 {offsets = [0, 384], sizes = [8, 384], strides = [1, 1]} : vector<8x768xf32> to vector<8x384xf32>
    %cst_28 = arith.constant 0.000000e+00 : f32
    %48 = vector.broadcast %cst_28 : f32 to vector<8x384xf32>
    %49 = arith.maximumf %47, %48 : vector<8x384xf32>
    %50 = tpu.iota {dimensions = array<i32: 0>} : vector<8x384xi32>
    %c2_i32 = arith.constant 2 : i32
    %51 = vector.broadcast %c2_i32 : i32 to vector<8x384xi32>
    %52 = arith.cmpi slt, %50, %51 : vector<8x384xi32>
    %cst_29 = arith.constant 0.000000e+00 : f32
    %53 = vector.broadcast %cst_29 : f32 to vector<8x384xf32>
    %54 = arith.select %52, %49, %53 : vector<8x384xi1>, vector<8x384xf32>
    %cst_30 = arith.constant dense<0.000000e+00> : vector<384xf32>
    %55 = vector.multi_reduction <add>, %54, %cst_30 [0] : vector<8x384xf32> to vector<384xf32>
    %56 = vector.shape_cast %55 : vector<384xf32> to vector<1x384xf32>
    %cst_31 = arith.constant 5.000000e-01 : f32
    %57 = vector.broadcast %cst_31 : f32 to vector<1x384xf32>
    %58 = arith.mulf %56, %57 : vector<1x384xf32>
    %59 = vector.broadcast %58 : vector<1x384xf32> to vector<8x384xf32>
    %60 = arith.subf %49, %59 : vector<8x384xf32>
    %61 = arith.mulf %60, %60 : vector<8x384xf32>
    %cst_32 = arith.constant 0.000000e+00 : f32
    %62 = vector.broadcast %cst_32 : f32 to vector<8x384xf32>
    %63 = arith.select %52, %61, %62 : vector<8x384xi1>, vector<8x384xf32>
    %cst_33 = arith.constant dense<0.000000e+00> : vector<384xf32>
    %64 = vector.multi_reduction <add>, %63, %cst_33 [0] : vector<8x384xf32> to vector<384xf32>
    %65 = vector.shape_cast %64 : vector<384xf32> to vector<1x384xf32>
    %cst_34 = arith.constant 5.000000e-01 : f32
    %66 = vector.broadcast %cst_34 : f32 to vector<1x384xf32>
    %67 = arith.mulf %65, %66 : vector<1x384xf32>
    %cst_35 = arith.constant 9.99999974E-6 : f32
    %68 = vector.broadcast %cst_35 : f32 to vector<1x384xf32>
    %69 = arith.addf %67, %68 : vector<1x384xf32>
    %70 = math.rsqrt %69 : vector<1x384xf32>
    %71 = vector.broadcast %70 : vector<1x384xf32> to vector<8x384xf32>
    %72 = arith.mulf %60, %71 : vector<8x384xf32>
    %c0_36 = arith.constant 0 : index
    %c0_37 = arith.constant 0 : index
    %73 = vector.load %arg9[%c0_36, %c0_37] : memref<1x384xf32, #tpu.memory_space<vmem>>, vector<1x384xf32>
    %74 = vector.broadcast %73 : vector<1x384xf32> to vector<8x384xf32>
    %75 = arith.mulf %72, %74 : vector<8x384xf32>
    %c0_38 = arith.constant 0 : index
    %c0_39 = arith.constant 0 : index
    %76 = vector.load %arg10[%c0_38, %c0_39] : memref<1x384xf32, #tpu.memory_space<vmem>>, vector<1x384xf32>
    %77 = vector.broadcast %76 : vector<1x384xf32> to vector<8x384xf32>
    %78 = arith.addf %75, %77 : vector<8x384xf32>
    %c0_40 = arith.constant 0 : index
    %c0_41 = arith.constant 0 : index
    %79 = vector.load %arg11[%c0_40, %c0_41] : memref<384x384xbf16, #tpu.memory_space<vmem>>, vector<384x384xbf16>
    %80 = arith.extf %79 : vector<384x384xbf16> to vector<384x384xf32>
    %cst_42 = arith.constant dense<0.000000e+00> : vector<8x384xf32>
    %81 = tpu.matmul %78, %80, %cst_42 {dimension_numbers = #tpu.dot_dimension_numbers<[1], [0], [0], [1], [0, 0, 1, 1], [], []>} : vector<8x384xf32>, vector<384x384xf32>, vector<8x384xf32> -> vector<8x384xf32>
    %c0_43 = arith.constant 0 : index
    %c0_44 = arith.constant 0 : index
    %82 = vector.load %arg12[%c0_43, %c0_44] : memref<1x384xf32, #tpu.memory_space<vmem>>, vector<1x384xf32>
    %83 = vector.broadcast %82 : vector<1x384xf32> to vector<8x384xf32>
    %84 = arith.addf %81, %83 : vector<8x384xf32>
    %c0_45 = arith.constant 0 : index
    %c0_46 = arith.constant 0 : index
    %85 = vector.load %arg15[%c0_45, %c0_46] : memref<8x384xf32, #tpu.memory_space<vmem>>, vector<8x384xf32>
    tpu.vector_store %arg15[%c0_45, %c0_46], %84 {strides = array<i32>} : memref<8x384xf32, #tpu.memory_space<vmem>>, vector<8x384xf32>,
    return
  }
  func.func @transform_0(%arg0: i32) -> (i32, i32) {
    %c0_i32 = arith.constant 0 : i32
    %c0_i32_0 = arith.constant 0 : i32
    %c0_i32_1 = arith.constant 0 : i32
    return %c0_i32, %c0_i32_0 : i32, i32
  }
  func.func @transform_1(%arg0: i32) -> (i32, i32) {
    %c0_i32 = arith.constant 0 : i32
    %c0_i32_0 = arith.constant 0 : i32
    %c0_i32_1 = arith.constant 0 : i32
    return %c0_i32, %c0_i32_0 : i32, i32
  }
  func.func @transform_2(%arg0: i32) -> (i32, i32) {
    %c0_i32 = arith.constant 0 : i32
    %c0_i32_0 = arith.constant 0 : i32
    %c0_i32_1 = arith.constant 0 : i32
    return %c0_i32, %c0_i32_0 : i32, i32
  }
  func.func @transform_3(%arg0: i32) -> (i32, i32) {
    %c0_i32 = arith.constant 0 : i32
    %c0_i32_0 = arith.constant 0 : i32
    %c0_i32_1 = arith.constant 0 : i32
    return %c0_i32, %c0_i32_0 : i32, i32
  }
  func.func @transform_4(%arg0: i32) -> (i32, i32) {
    %c0_i32 = arith.constant 0 : i32
    %c0_i32_0 = arith.constant 0 : i32
    %c0_i32_1 = arith.constant 0 : i32
    return %c0_i32, %c0_i32_0 : i32, i32
  }
  func.func @transform_5(%arg0: i32) -> (i32, i32) {
    %c0_i32 = arith.constant 0 : i32
    %c0_i32_0 = arith.constant 0 : i32
    %c0_i32_1 = arith.constant 0 : i32
    return %c0_i32, %c0_i32_0 : i32, i32
  }
  func.func @transform_6(%arg0: i32) -> (i32, i32) {
    %c0_i32 = arith.constant 0 : i32
    %c0_i32_0 = arith.constant 0 : i32
    %c0_i32_1 = arith.constant 0 : i32
    return %c0_i32, %c0_i32_0 : i32, i32
  }
  func.func @transform_7(%arg0: i32) -> (i32, i32) {
    %c0_i32 = arith.constant 0 : i32
    %c0_i32_0 = arith.constant 0 : i32
    %c0_i32_1 = arith.constant 0 : i32
    return %c0_i32, %c0_i32_0 : i32, i32
  }
  func.func @transform_8(%arg0: i32) -> (i32, i32) {
    %c0_i32 = arith.constant 0 : i32
    %c0_i32_0 = arith.constant 0 : i32
    %c0_i32_1 = arith.constant 0 : i32
    return %c0_i32, %c0_i32_0 : i32, i32
  }
  func.func @transform_9(%arg0: i32) -> (i32, i32) {
    %c0_i32 = arith.constant 0 : i32
    %c0_i32_0 = arith.constant 0 : i32
    %c0_i32_1 = arith.constant 0 : i32
    return %c0_i32, %c0_i32_0 : i32, i32
  }
  func.func @transform_10(%arg0: i32) -> (i32, i32) {
    %c0_i32 = arith.constant 0 : i32
    %c0_i32_0 = arith.constant 0 : i32
    %c0_i32_1 = arith.constant 0 : i32
    return %c0_i32, %c0_i32_0 : i32, i32
  }
  func.func @transform_11(%arg0: i32) -> (i32, i32) {
    %c0_i32 = arith.constant 0 : i32
    %c0_i32_0 = arith.constant 0 : i32
    %c0_i32_1 = arith.constant 0 : i32
    return %c0_i32, %c0_i32_0 : i32, i32
  }
  func.func @transform_12(%arg0: i32) -> (i32, i32) {
    %c0_i32 = arith.constant 0 : i32
    %c0_i32_0 = arith.constant 0 : i32
    %c0_i32_1 = arith.constant 0 : i32
    return %c0_i32, %c0_i32_0 : i32, i32
  }
  func.func @transform_13(%arg0: i32) -> (i32, i32) {
    %c0_i32 = arith.constant 0 : i32
    %c0_i32_0 = arith.constant 0 : i32
    %c0_i32_1 = arith.constant 0 : i32
    return %c0_i32, %c0_i32_0 : i32, i32
  }
  func.func @transform_14(%arg0: i32) -> (i32, i32) {
    %c0_i32 = arith.constant 0 : i32
    %c0_i32_0 = arith.constant 0 : i32
    %c0_i32_1 = arith.constant 0 : i32
    return %c0_i32, %c0_i32_0 : i32, i32
  }
}

</mosaic_0001>

<bundles_post_ra>
// kernel: clip_text_image_forward.1
= control target key start
LH: loop header
LB: loop body
LE: loop exit
PB: predicated region body
PF: predicated region fallthrough
CT: control target
= control target key end

     0   :  { %vm3277_vm0 = vmmov 0   ;;  %s4699_s4 = inlined_call_operand.vmem [shape: bf16[128,128], index: 4, kind: input, shape index: {}]   ;;  %s4700_s3 = inlined_call_operand.vmem [shape: f32[384,128], index: 3, kind: input, shape index: {}]   ;;  %s4701_s1 = inlined_call_operand.vmem [shape: bf16[256,128], index: 1, kind: input, shape index: {}]   ;;  %s4702_s0 = inlined_call_operand.vmem [shape: f32[8,256], index: 0, kind: input, shape index: {}]   ;;  %s4703_s5 = inlined_call_operand.vmem [shape: f32[1,128], index: 5, kind: input, shape index: {}]   ;;  %s4704_s2 = inlined_call_operand.vmem [shape: f32[1,128], index: 2, kind: input, shape index: {}]   ;;  %s4705_s6 = inlined_call_operand.vmem [shape: bf16[384,768], index: 6, kind: input, shape index: {}]   ;;  %s4706_s12 = inlined_call_operand.vmem [shape: f32[8,384], index: 12, kind: output, shape index: {0}]   ;;  %s4707_s10 = inlined_call_operand.vmem [shape: bf16[384,384], index: 10, kind: input, shape index: {}]   ;;  %s4708_s7 = inlined_call_operand.vmem [shape: f32[1,768], index: 7, kind: input, shape index: {}]   ;;  %s4709_s13 = inlined_call_operand.vmem [shape: f32[8,384], index: 13, kind: output, shape index: {1}]   ;;  %s4710_s8 = inlined_call_operand.vmem [shape: f32[1,384], index: 8, kind: input, shape index: {}]   ;;  %s4711_s9 = inlined_call_operand.vmem [shape: f32[1,384], index: 9, kind: input, shape index: {}]   ;;  %s4712_s11 = inlined_call_operand.vmem [shape: f32[1,384], index: 11, kind: input, shape index: {}]   ;;  %s4713_s14 = inlined_call_operand.vmem [shape: f32[8,384], index: 14, kind: output, shape index: {2}]  }
   0x1   :  { %v2838_v0 = vld [vmem:[%s4699_s4 + $0x38] sm:$0xff]   ;;  %v2837_v1 = vld [vmem:[%s4699_s4 + $0x30] sm:$0xff]   ;;  %v187_v4 = vld [vmem:[%s4700_s3] sm:$0xff] }
   0x2   :  { %v2815_v2 = vunpack.c.l.bf16 %v2838_v0  ;;  %v2816_v3 = vunpack.c.h.bf16 %v2838_v0  ;;  %v2812_v5 = vunpack.c.h.bf16 %v2837_v1  ;;  %3064 = vmatprep.mubr.f32.mxu1 %v187_v4  ;;  %v2836_v6 = vld [vmem:[%s4699_s4 + $0x28] sm:$0xff]   ;;  %v2811_v7 = vunpack.c.l.bf16 %v2837_v1  ;;  %v2835_v9 = vld [vmem:[%s4699_s4 + $0x20] sm:$0xff]   ;;  %v2834_v12 = vld [vmem:[%s4699_s4 + $0x18] sm:$0xff]  }
   0x3   :  { %v2808_v8 = vunpack.c.h.bf16 %v2836_v6  ;;  %v2807_v10 = vunpack.c.l.bf16 %v2836_v6  ;;  %v2804_v11 = vunpack.c.h.bf16 %v2835_v9  ;;  %v2803_v13 = vunpack.c.l.bf16 %v2835_v9  ;;  %v2831_v14 = vld [vmem:[%s4701_s1 + $0x78] sm:$0xff]   ;;  %v2830_v19 = vld [vmem:[%s4701_s1 + $0x70] sm:$0xff]   ;;  %v2829_v27 = vld [vmem:[%s4701_s1 + $0x68] sm:$0xff]  }
   0x4   :  { %3032 = vmatprep.subr.mxu1 %v2816_v3  ;;  %v2823_v15 = vld [vmem:[%s4701_s1 + $0x38] sm:$0xff]   ;;  %v2783_v16 = vunpack.c.l.bf16 %v2831_v14  ;;  %v2784_v17 = vunpack.c.h.bf16 %v2831_v14  ;;  %v2822_v20 = vld [vmem:[%s4701_s1 + $0x30] sm:$0xff]   ;;  %v2800_v21 = vunpack.c.h.bf16 %v2834_v12  ;;  %v2780_v24 = vunpack.c.h.bf16 %v2830_v19  ;;  %v2821_v29 = vld [vmem:[%s4701_s1 + $0x28] sm:$0xff]  }
   0x5   :  { %3033 = vmatpush3.msra.mxu1 %v2816_v3  ;;  %v2752_v18 = vunpack.c.h.bf16 %v2823_v15  ;;  %v2751_v22 = vunpack.c.l.bf16 %v2823_v15  ;;  %v2833_v23 = vld [vmem:[%s4699_s4 + $0x10] sm:$0xff]   ;;  %v2799_v25 = vunpack.c.l.bf16 %v2834_v12  ;;  %v2748_v26 = vunpack.c.h.bf16 %v2822_v20  ;;  %v2832_v32 = vld [vmem:[%s4699_s4 + $0x8] sm:$0xff]   ;;  %v2828_v36 = vld [vmem:[%s4701_s1 + $0x60] sm:$0xff]  }
   0x6   :  { %3034 = vmatprep.subr.mxu1 %v2815_v2  ;;  %2839 = vmatprep.subr.mxu0 %v2784_v17  ;;  %v2779_v28 = vunpack.c.l.bf16 %v2830_v19  ;;  %v2796_v30 = vunpack.c.h.bf16 %v2833_v23  ;;  %v2747_v31 = vunpack.c.l.bf16 %v2822_v20  ;;  %v2776_v33 = vunpack.c.h.bf16 %v2829_v27  ;;  %v2820_v38 = vld [vmem:[%s4701_s1 + $0x20] sm:$0xff]   ;;  %v2827_v45 = vld [vmem:[%s4701_s1 + $0x58] sm:$0xff]   ;;  %v2826_v53 = vld [vmem:[%s4701_s1 + $0x50] sm:$0xff]  }
   0x7   :  { %3035 = vmatpush3.msra.mxu1 %v2815_v2  ;;  %2840 = vmatpush3.msra.mxu0 %v2752_v18  ;;  %v2795_v34 = vunpack.c.l.bf16 %v2833_v23  ;;  %v2744_v35 = vunpack.c.h.bf16 %v2821_v29  ;;  %v2775_v37 = vunpack.c.l.bf16 %v2829_v27  ;;  %v2792_v39 = vunpack.c.h.bf16 %v2832_v32  ;;  %v2786_v41 = vld [vmem:[%s4699_s4] sm:$0xff]   ;;  %v2819_v47 = vld [vmem:[%s4701_s1 + $0x18] sm:$0xff]   ;;  %v2818_v55 = vld [vmem:[%s4701_s1 + $0x10] sm:$0xff]  }
   0x8   :  { %3036 = vmatprep.subr.mxu1 %v2812_v5  ;;  %2841 = vmatprep.subr.mxu0 %v2783_v16  ;;  %v2743_v40 = vunpack.c.l.bf16 %v2821_v29  ;;  %v2772_v42 = vunpack.c.h.bf16 %v2828_v36  ;;  %v2791_v43 = vunpack.c.l.bf16 %v2832_v32  ;;  %v2740_v44 = vunpack.c.h.bf16 %v2820_v38  ;;  %v188_v57 = vld [vmem:[%s4700_s3 + $0x8] sm:$0xff]  ;;  %v189_v59 = vld [vmem:[%s4700_s3 + $0x10] sm:$0xff]  ;;  %v190_v2 = vld [vmem:[%s4700_s3 + $0x18] sm:$0xff] }
   0x9   :  { %3037 = vmatpush3.msra.mxu1 %v2812_v5  ;;  %2842 = vmatpush3.msra.mxu0 %v2751_v22  ;;  %v2771_v46 = vunpack.c.l.bf16 %v2828_v36  ;;  %v2788_v48 = vunpack.c.h.bf16 %v2786_v41  ;;  %v2739_v49 = vunpack.c.l.bf16 %v2820_v38  ;;  %v2768_v50 = vunpack.c.h.bf16 %v2827_v45  ;;  %v2825_v61 = vld [vmem:[%s4701_s1 + $0x48] sm:$0xff]   ;;  %v191_v4 = vld [vmem:[%s4700_s3 + $0x20] sm:$0xff]  ;;  %v193_v12 = vld [vmem:[%s4700_s3 + $0x30] sm:$0xff] }
   0xa   :  { %3038 = vmatprep.subr.mxu1 %v2811_v7  ;;  %2843 = vmatprep.subr.mxu0 %v2780_v24  ;;  %v2787_v51 = vunpack.c.l.bf16 %v2786_v41  ;;  %v2736_v52 = vunpack.c.h.bf16 %v2819_v47  ;;  %v2767_v54 = vunpack.c.l.bf16 %v2827_v45  ;;  %v2735_v56 = vunpack.c.l.bf16 %v2819_v47  ;;  %v2817_v63 = vld [vmem:[%s4701_s1 + $0x8] sm:$0xff]   ;;  %v2824_v6 = vld [vmem:[%s4701_s1 + $0x40] sm:$0xff]   ;;  %v194_v16 = vld [vmem:[%s4700_s3 + $0x38] sm:$0xff] }
   0xb   :  { %3039 = vmatpush3.msra.mxu1 %v2811_v7  ;;  %2844 = vmatpush3.msra.mxu0 %v2748_v26  ;;  %v2764_v58 = vunpack.c.h.bf16 %v2826_v53  ;;  %v2732_v60 = vunpack.c.h.bf16 %v2818_v55  ;;  %v2763_v62 = vunpack.c.l.bf16 %v2826_v53  ;;  %v45_v0 = vld [vmem:[%s4702_s0 + $0x8] sm:$0xff]  ;;  %v2731_v1 = vunpack.c.l.bf16 %v2818_v55  ;;  %v195_v17 = vld [vmem:[%s4700_s3 + $0x40] sm:$0xff]  ;;  %v197_v20 = vld [vmem:[%s4700_s3 + $0x50] sm:$0xff] }
   0xc   :  { %3040 = vmatprep.subr.mxu1 %v2808_v8  ;;  %2845 = vmatprep.subr.mxu0 %v2779_v28  ;;  %v2760_v3 = vunpack.c.h.bf16 %v2825_v61  ;;  %v2728_v5 = vunpack.c.h.bf16 %v2817_v63  ;;  %v2759_v7 = vunpack.c.l.bf16 %v2825_v61  ;;  %v2727_v9 = vunpack.c.l.bf16 %v2817_v63  ;;  %v44_v18 = vld [vmem:[%s4702_s0] sm:$0xff]  ;;  %v196_v19 = vld [vmem:[%s4700_s3 + $0x48] sm:$0xff]  ;;  %v201_v24 = vld [vmem:[%s4700_s3 + $0x70] sm:$0xff] }
   0xd   :  { %3041 = vmatpush3.msra.mxu1 %v2808_v8  ;;  %2846 = vmatpush3.msra.mxu0 %v2747_v31  ;;  %v2722_v8 = vld [vmem:[%s4701_s1] sm:$0xff]   ;;  %v2755_v14 = vunpack.c.l.bf16 %v2824_v6  ;;  %v200_v23 = vld [vmem:[%s4700_s3 + $0x68] sm:$0xff]  ;;  %v205_v28 = vld [vmem:[%s4700_s3 + $0x90] sm:$0xff] }
   0xe   :  { %3042 = vmatprep.subr.mxu1 %v2807_v10  ;;  %2847 = vmatprep.subr.mxu0 %v2776_v33  ;;  %v2723_v15 = vunpack.c.l.bf16 %v2722_v8  ;;  %v199_v22 = vld [vmem:[%s4700_s3 + $0x60] sm:$0xff]  ;;  %v204_v27 = vld [vmem:[%s4700_s3 + $0x88] sm:$0xff]  ;;  %v206_v29 = vld [vmem:[%s4700_s3 + $0x98] sm:$0xff] }
   0xf   :  { %3043 = vmatpush3.msra.mxu1 %v2807_v10  ;;  %2848 = vmatpush3.msra.mxu0 %v2744_v35  ;;  %v192_v10 = vld [vmem:[%s4700_s3 + $0x28] sm:$0xff]  ;;  %v203_v26 = vld [vmem:[%s4700_s3 + $0x80] sm:$0xff]  ;;  %v209_v32 = vld [vmem:[%s4700_s3 + $0xb0] sm:$0xff] }
  0x10   :  { %3044 = vmatprep.subr.mxu1 %v2804_v11  ;;  %2849 = vmatprep.subr.mxu0 %v2775_v37  ;;  %v208_v31 = vld [vmem:[%s4700_s3 + $0xa8] sm:$0xff]  ;;  %v210_v33 = vld [vmem:[%s4700_s3 + $0xb8] sm:$0xff]  ;;  %v213_v36 = vld [vmem:[%s4700_s3 + $0xd0] sm:$0xff] }
  0x11   :  { %3045 = vmatpush3.msra.mxu1 %v2804_v11  ;;  %2850 = vmatpush3.msra.mxu0 %v2743_v40  ;;  %v2756_v11 = vunpack.c.h.bf16 %v2824_v6  ;;  %v212_v35 = vld [vmem:[%s4700_s3 + $0xc8] sm:$0xff]  ;;  %v214_v37 = vld [vmem:[%s4700_s3 + $0xd8] sm:$0xff]  ;;  %v215_v38 = vld [vmem:[%s4700_s3 + $0xe0] sm:$0xff] }
  0x12   :  { %3046 = vmatprep.subr.mxu1 %v2803_v13  ;;  %2851 = vmatprep.subr.mxu0 %v2772_v42  ;;  %v217_v40 = vld [vmem:[%s4700_s3 + $0xf0] sm:$0xff]  ;;  %v218_v41 = vld [vmem:[%s4700_s3 + $0xf8] sm:$0xff]  ;;  %v219_v42 = vld [vmem:[%s4700_s3 + $0x100] sm:$0xff] }
  0x13   :  { %3047 = vmatpush3.msra.mxu1 %v2803_v13  ;;  %2852 = vmatpush3.msra.mxu0 %v2740_v44  ;;  %v2724_v13 = vunpack.c.h.bf16 %v2722_v8  ;;  %v221_v44 = vld [vmem:[%s4700_s3 + $0x110] sm:$0xff]  ;;  %v222_v45 = vld [vmem:[%s4700_s3 + $0x118] sm:$0xff]  ;;  %v224_v47 = vld [vmem:[%s4700_s3 + $0x128] sm:$0xff] }
  0x14   :  { %3048 = vmatprep.subr.mxu1 %v2800_v21  ;;  %2853 = vmatprep.subr.mxu0 %v2771_v46  ;;  %v223_v46 = vld [vmem:[%s4700_s3 + $0x120] sm:$0xff] }
  0x15   :  { %3049 = vmatpush3.msra.mxu1 %v2800_v21  ;;  %2854 = vmatpush3.msra.mxu0 %v2739_v49  ;;  %v198_v21 = vld [vmem:[%s4700_s3 + $0x58] sm:$0xff] }
  0x16   :  { %3050 = vmatprep.subr.mxu1 %v2799_v25  ;;  %2855 = vmatprep.subr.mxu0 %v2768_v50  ;;  %v226_v49 = vld [vmem:[%s4700_s3 + $0x138] sm:$0xff] }
  0x17   :  { %3051 = vmatpush3.msra.mxu1 %v2799_v25  ;;  %2856 = vmatpush3.msra.mxu0 %v2736_v52  ;;  %v202_v25 = vld [vmem:[%s4700_s3 + $0x78] sm:$0xff] }
  0x18   :  { %3052 = vmatprep.subr.mxu1 %v2796_v30  ;;  %2857 = vmatprep.subr.mxu0 %v2767_v54 }
  0x19   :  { %3053 = vmatpush3.msra.mxu1 %v2796_v30  ;;  %2858 = vmatpush3.msra.mxu0 %v2735_v56  ;;  %v207_v30 = vld [vmem:[%s4700_s3 + $0xa0] sm:$0xff] }
  0x1a   :  { %3054 = vmatprep.subr.mxu1 %v2795_v34  ;;  %2859 = vmatprep.subr.mxu0 %v2764_v58 }
  0x1b   :  { %3055 = vmatpush3.msra.mxu1 %v2795_v34  ;;  %2860 = vmatpush3.msra.mxu0 %v2732_v60  ;;  %v211_v34 = vld [vmem:[%s4700_s3 + $0xc0] sm:$0xff] }
  0x1c   :  { %3056 = vmatprep.subr.mxu1 %v2792_v39  ;;  %181 = vmatprep.mubr.f32.mxu0 %v45_v0 }
  0x1d   :  { %3057 = vmatpush3.msra.mxu1 %v2792_v39  ;;  %2861 = vmatprep.subr.mxu0 %v2763_v62  ;;  %v216_v39 = vld [vmem:[%s4700_s3 + $0xe8] sm:$0xff] }
  0x1e   :  { %3058 = vmatprep.subr.mxu1 %v2791_v43  ;;  %2862 = vmatpush3.msra.mxu0 %v2731_v1 }
  0x1f   :  { %3059 = vmatpush3.msra.mxu1 %v2791_v43  ;;  %2863 = vmatprep.subr.mxu0 %v2760_v3  ;;  %v220_v43 = vld [vmem:[%s4700_s3 + $0x108] sm:$0xff] }
  0x20   :  { %3060 = vmatprep.subr.mxu1 %v2788_v48  ;;  %2864 = vmatpush3.msra.mxu0 %v2728_v5 }
  0x21   :  { %3061 = vmatpush3.msra.mxu1 %v2788_v48  ;;  %2865 = vmatprep.subr.mxu0 %v2759_v7  ;;  %v225_v48 = vld [vmem:[%s4700_s3 + $0x130] sm:$0xff] }
  0x22   :  { %3062 = vmatprep.subr.mxu1 %v2787_v51  ;;  %2866 = vmatpush3.msra.mxu0 %v2727_v9 }
  0x23   :  { %3063 = vmatpush3.msra.mxu1 %v2787_v51  ;;  %2867 = vmatprep.subr.mxu0 %v2756_v11 }
  0x24   :  { %3065 = vmatmul.mubr.f32.vlgmr.msra.gmra.mxu1 %v188_v57  ;;  %2868 = vmatpush3.msra.mxu0 %v2724_v13 }
  0x25   :  { %3067 = vmatprep.mubr.f32.mxu1 %v189_v59  ;;  %2869 = vmatprep.subr.mxu0 %v2755_v14 }
  0x26   :  { %2870 = vmatpush3.msra.mxu0 %v2723_v15 }
  0x27   :  { %182 = vmatmul.mubr.f32.vlgmr.msra.gmra.mxu0 %v44_v18 }
  0x28   :  { %3068 = vmatmul.mubr.f32.gmra.mxu1 %v190_v2 }
  0x29   :  { %3070 = vmatprep.mubr.f32.mxu1 %v191_v4 }
  0x2c   :  { %3071 = vmatmul.mubr.f32.gmra.mxu1 %v192_v10 }
  0x2d   :  { %3073 = vmatprep.mubr.f32.mxu1 %v193_v12 }
  0x30   :  { %3074 = vmatmul.mubr.f32.gmra.mxu1 %v194_v16  ;;  %v3588_v16 = vld [vmem:[%s4703_s5] ss:$0 sm:$0xff] }
  0x31   :  { %3076 = vmatprep.mubr.f32.mxu1 %v195_v17 }
  0x34   :  { %3077 = vmatmul.mubr.f32.gmra.mxu1 %v196_v19 }
  0x35   :  { %3079 = vmatprep.mubr.f32.mxu1 %v197_v20 }
  0x38   :  { %3080 = vmatmul.mubr.f32.gmra.mxu1 %v198_v21 }
  0x39   :  { %3082 = vmatprep.mubr.f32.mxu1 %v199_v22 }
  0x3c   :  { %3083 = vmatmul.mubr.f32.gmra.mxu1 %v200_v23 }
  0x3d   :  { %3085 = vmatprep.mubr.f32.mxu1 %v201_v24 }
  0x40   :  { %3086 = vmatmul.mubr.f32.gmra.mxu1 %v202_v25 }
  0x41   :  { %3088 = vmatprep.mubr.f32.mxu1 %v203_v26 }
  0x44   :  { %3089 = vmatmul.mubr.f32.gmra.mxu1 %v204_v27 }
  0x45   :  { %3091 = vmatprep.mubr.f32.mxu1 %v205_v28 }
  0x48   :  { %3092 = vmatmul.mubr.f32.gmra.mxu1 %v206_v29 }
  0x49   :  { %3094 = vmatprep.mubr.f32.mxu1 %v207_v30 }
  0x4c   :  { %3095 = vmatmul.mubr.f32.gmra.mxu1 %v208_v31 }
  0x4d   :  { %3097 = vmatprep.mubr.f32.mxu1 %v209_v32 }
  0x50   :  { %3098 = vmatmul.mubr.f32.gmra.mxu1 %v210_v33 }
  0x51   :  { %3100 = vmatprep.mubr.f32.mxu1 %v211_v34 }
  0x54   :  { %3101 = vmatmul.mubr.f32.gmra.mxu1 %v212_v35 }
  0x55   :  { %3103 = vmatprep.mubr.f32.mxu1 %v213_v36 }
  0x58   :  { %3104 = vmatmul.mubr.f32.gmra.mxu1 %v214_v37 }
  0x59   :  { %3106 = vmatprep.mubr.f32.mxu1 %v215_v38 }
  0x5c   :  { %3107 = vmatmul.mubr.f32.gmra.mxu1 %v216_v39 }
  0x5d   :  { %3109 = vmatprep.mubr.f32.mxu1 %v217_v40 }
  0x60   :  { %3110 = vmatmul.mubr.f32.gmra.mxu1 %v218_v41 }
  0x61   :  { %3112 = vmatprep.mubr.f32.mxu1 %v219_v42 }
  0x64   :  { %3113 = vmatmul.mubr.f32.gmra.mxu1 %v220_v43 }
  0x65   :  { %3115 = vmatprep.mubr.f32.mxu1 %v221_v44 }
  0x68   :  { %3116 = vmatmul.mubr.f32.gmra.mxu1 %v222_v45 }
  0x69   :  { %3118 = vmatprep.mubr.f32.mxu1 %v223_v46 }
  0x6c   :  { %3119 = vmatmul.mubr.f32.gmra.mxu1 %v224_v47 }
  0x6d   :  { %3121 = vmatprep.mubr.f32.mxu1 %v225_v48 }
  0x70   :  { %3122 = vmatmul.mubr.f32.gmra.mxu1 %v226_v49 }
  0xe4   :  { %v3551_v50 = vpop.f32.mrf.mxu1 }
  0xe6   :  { %v3553_v51 = vpop.f32.mrf.mxu1 }
  0xe8   :  { %v3555_v52 = vpop.f32.mrf.mxu1 }
  0xea   :  { %v3557_v53 = vpop.f32.mrf.mxu1 }
  0xec   :  { %v3559_v54 = vpop.f32.mrf.mxu1 }
  0xee   :  { %v3561_v55 = vpop.f32.mrf.mxu1 }
  0xf0   :  { %v3563_v56 = vpop.f32.mrf.mxu1 }
  0xf2   :  { %v3565_v57 = vpop.f32.mrf.mxu1 }
  0xf4   :  { %v3567_v58 = vpop.f32.mrf.mxu1 }
  0xf6   :  { %v3569_v59 = vpop.f32.mrf.mxu1 }
  0xf8   :  { %v3081_v60 = vpop.f32.mrf.mxu1 }
  0xf9   :  { %v3644_v42 = vadd.f32 %v3081_v60, %v3588_v16  ;;  %v3665_v60 = vadd.f32 %v3567_v58, %v3588_v16 }
  0xfa   :  { %v390_v61 = vpop.f32.mrf.mxu1 }
  0xfb   :  { %v3654_v46 = vadd.f32 %v3588_v16, %v390_v61  ;;  %v596_v47 = vmul.f32 %v3644_v42, %v3644_v42  ;;  %v594_v58 = vmul.f32 %v3665_v60, %v3665_v60 }
  0xfc   :  { %v3084_v62 = vpop.f32.mrf.mxu1 }
  0xfd   :  { %v3618_v30 = vadd.f32 %v3084_v62, %v3588_v16  ;;  %v595_v61 = vmul.f32 %v3654_v46, %v3654_v46 }
  0xfe   :  { %v400_v63 = vpop.f32.mrf.mxu1 }
  0xff   :  { %v3632_v36 = vadd.f32 %v3588_v16, %v400_v63  ;;  %v598_v37 = vmul.f32 %v3618_v30, %v3618_v30 }
 0x100   :  { %v3087_v0 = vpop.f32.mrf.mxu1 }
 0x101   :  { %v3594_v20 = vadd.f32 %v3087_v0, %v3588_v16  ;;  %v597_v43 = vmul.f32 %v3632_v36, %v3632_v36  ;;  %v3676_v0 = vadd.f32 %v3588_v16, %v3569_v59 }
 0x102   :  { %v410_v1 = vpop.f32.mrf.mxu1 }
 0x103   :  { %v3604_v24 = vadd.f32 %v3588_v16, %v410_v1  ;;  %v600_v28 = vmul.f32 %v3594_v20, %v3594_v20  ;;  %v593_v59 = vmul.f32 %v3676_v0, %v3676_v0 }
 0x104   :  { %v3571_v2 = vpop.f32.mrf.mxu1 }
 0x105   :  { %v599_v31 = vmul.f32 %v3604_v24, %v3604_v24 }
 0x106   :  { %v3573_v3 = vpop.f32.mrf.mxu1 }
 0x108   :  { %v3575_v4 = vpop.f32.mrf.mxu1 }
 0x10a   :  { %v3577_v5 = vpop.f32.mrf.mxu1 }
 0x10c   :  { %v3579_v6 = vpop.f32.mrf.mxu1 }
 0x10e   :  { %v3581_v7 = vpop.f32.mrf.mxu1 }
 0x110   :  { %v3099_v8 = vpop.f32.mrf.mxu1 }
 0x111   :  { %v3681_v1 = vadd.f32 %v3099_v8, %v3588_v16 }
 0x112   :  { %v3583_v9 = vpop.f32.mrf.mxu1 }
 0x113   :  { %v608_v8 = vmul.f32 %v3681_v1, %v3681_v1 }
 0x114   :  { %v3102_v10 = vpop.f32.mrf.mxu1 }
 0x115   :  { %v3659_v48 = vadd.f32 %v3102_v10, %v3588_v16 }
 0x116   :  { %v460_v11 = vpop.f32.mrf.mxu1 }
 0x117   :  { %v3670_v62 = vadd.f32 %v3588_v16, %v460_v11  ;;  %v610_v63 = vmul.f32 %v3659_v48, %v3659_v48  ;;  %v3687_v11 = vadd.f32 %v3563_v56, %v3588_v16 }
 0x118   :  { %v3105_v12 = vpop.f32.mrf.mxu1 }
 0x119   :  { %v3639_v39 = vadd.f32 %v3105_v12, %v3588_v16  ;;  %v609_v10 = vmul.f32 %v3670_v62, %v3670_v62  ;;  %v3693_v12 = vadd.f32 %v3588_v16, %v3583_v9  ;;  %v592_v56 = vmul.f32 %v3687_v11, %v3687_v11 }
 0x11a   :  { %v470_v13 = vpop.f32.mrf.mxu1 }
 0x11b   :  { %v3649_v44 = vadd.f32 %v3588_v16, %v470_v13  ;;  %v612_v45 = vmul.f32 %v3639_v39, %v3639_v39  ;;  %v3699_v13 = vadd.f32 %v3588_v16, %v3565_v57  ;;  %v607_v9 = vmul.f32 %v3693_v12, %v3693_v12 }
 0x11c   :  { %v3108_v14 = vpop.f32.mrf.mxu1 }
 0x11d   :  { %v3611_v27 = vadd.f32 %v3108_v14, %v3588_v16  ;;  %v611_v49 = vmul.f32 %v3649_v44, %v3649_v44  ;;  %v3705_v14 = vadd.f32 %v3579_v6, %v3588_v16  ;;  %v591_v57 = vmul.f32 %v3699_v13, %v3699_v13 }
 0x11e   :  { %v480_v15 = vpop.f32.mrf.mxu1 }
 0x11f   :  { %v3625_v33 = vadd.f32 %v3588_v16, %v480_v15  ;;  %v614_v34 = vmul.f32 %v3611_v27, %v3611_v27  ;;  %v3711_v15 = vadd.f32 %v3559_v54, %v3588_v16  ;;  %v606_v6 = vmul.f32 %v3705_v14, %v3705_v14 }
 0x120   :  { %v3111_v17 = vpop.f32.mrf.mxu1 }
 0x121   :  { %v3591_v18 = vadd.f32 %v3111_v17, %v3588_v16  ;;  %v613_v40 = vmul.f32 %v3625_v33, %v3625_v33  ;;  %v3717_v17 = vadd.f32 %v3588_v16, %v3581_v7  ;;  %v590_v54 = vmul.f32 %v3711_v15, %v3711_v15 }
 0x122   :  { %v490_v19 = vpop.f32.mrf.mxu1 }
 0x123   :  { %v3597_v21 = vadd.f32 %v3588_v16, %v490_v19  ;;  %v616_v22 = vmul.f32 %v3591_v18, %v3591_v18  ;;  %v3723_v19 = vadd.f32 %v3588_v16, %v3561_v55  ;;  %v605_v7 = vmul.f32 %v3717_v17, %v3717_v17 }
 0x124   :  { %v3601_v23 = vpop.f32.mrf.mxu1 }
 0x125   :  { %695 = vadd.xlane.f32.xlu0 %v616_v22  ;;  %v615_v25 = vmul.f32 %v3597_v21, %v3597_v21  ;;  %v3729_v22 = vadd.f32 %v3575_v4, %v3588_v16  ;;  %v589_v55 = vmul.f32 %v3723_v19, %v3723_v19 }
 0x126   :  { %v3608_v26 = vpop.f32.mrf.mxu1 }
 0x127   :  { %693 = vadd.xlane.f32.xlu1 %v615_v25  ;;  %v3735_v25 = vadd.f32 %v3555_v52, %v3588_v16  ;;  %v604_v4 = vmul.f32 %v3729_v22, %v3729_v22 }
 0x128   :  { %v3615_v29 = vpop.f32.mrf.mxu1 }
 0x129   :  { %663 = vadd.xlane.f32.xlu0 %v600_v28  ;;  %v2871_v28 = vpop.f32.mrf.mxu0  ;;  %v588_v52 = vmul.f32 %v3735_v25, %v3735_v25 }
 0x12a   :  { %v3622_v32 = vpop.f32.mrf.mxu1 }
 0x12b   :  { %661 = vadd.xlane.f32.xlu1 %v599_v31  ;;  %v3741_v31 = vadd.f32 %v3588_v16, %v3577_v5 }
 0x12c   :  { %v3629_v35 = vpop.f32.mrf.mxu1 }
 0x12d   :  { %691 = vadd.xlane.f32.xlu0 %v614_v34  ;;  %v3747_v34 = vadd.f32 %v3588_v16, %v3557_v53  ;;  %v603_v5 = vmul.f32 %v3741_v31, %v3741_v31 }
 0x12e   :  { %v3636_v38 = vpop.f32.mrf.mxu1 }
 0x12f   :  { %659 = vadd.xlane.f32.xlu1 %v598_v37  ;;  %v2872_v37 = vpop.f32.mrf.mxu0  ;;  %v587_v53 = vmul.f32 %v3747_v34, %v3747_v34 }
 0x130   :  { %v3123_v41 = vpop.f32.mrf.mxu1 }
 0x131   :  { %689 = vadd.xlane.f32.xlu0 %v613_v40  ;;  %v3753_v40 = vadd.f32 %v3571_v2, %v3588_v16  ;;  %v3759_v41 = vadd.f32 %v3551_v50, %v3588_v16  ;;  %v3768_v2 = vadd.f32 %v3588_v16, %v3573_v3  ;;  %v3774_v50 = vadd.f32 %v3588_v16, %v3553_v51 }
 0x133   :  { %657 = vadd.xlane.f32.xlu1 %v597_v43  ;;  %v2873_v43 = vadd.f32 %v2872_v37, %v2871_v28  ;;  %v601_v3 = vmul.f32 %v3768_v2, %v3768_v2  ;;  %v1210_v28 = vld [vmem:[%s4705_s6 + $0x168] sm:$0xff] }
 0x134   :  { %v1399_v37 = vunpack.c.l.bf16 %v1210_v28 }
 0x135   :  { %687 = vadd.xlane.f32.xlu0 %v612_v45  ;;  %v2719_v45 = vld [vmem:[%s4704_s2] ss:$0 sm:$0xff] }
 0x137   :  { %655 = vadd.xlane.f32.xlu1 %v596_v47  ;;  %v602_v47 = vmul.f32 %v3753_v40, %v3753_v40 }
 0x139   :  { %685 = vadd.xlane.f32.xlu0 %v611_v49  ;;  %v530_v49 = vpop.f32.mrf.mxu1 }
 0x13b   :  { %653 = vadd.xlane.f32.xlu1 %v595_v61  ;;  %v3776_v61 = vadd.f32 %v2873_v43, %v2719_v45  ;;  %v1201_v45 = vld [vmem:[%s4705_s6 + $0x120] sm:$0xff] }
 0x13d   :  { %683 = vadd.xlane.f32.xlu0 %v610_v63  ;;  %v586_v63 = vmul.f32 %v3759_v41, %v3759_v41  ;;  %v579_v51 = vmul.f32 %v3776_v61, %v3776_v61 }
 0x13f   :  { %651 = vadd.xlane.f32.xlu1 %v594_v58  ;;  %v3783_v58 = vadd.f32 %v3588_v16, %v530_v49 }
 0x141   :  { %681 = vadd.xlane.f32.xlu0 %v609_v10  ;;  %v585_v10 = vmul.f32 %v3774_v50, %v3774_v50 }
 0x143   :  { %649 = vadd.xlane.f32.xlu1 %v593_v59  ;;  %v3791_v59 = vadd.f32 %v3629_v35, %v3588_v16  ;;  %v3807_v35 = vadd.f32 %v3588_v16, %v3622_v32 }
 0x145   :  { %679 = vadd.xlane.f32.xlu0 %v608_v8  ;;  %v623_v8 = vmul.f32 %v3783_v58, %v3783_v58  ;;  %v619_v32 = vmul.f32 %v3807_v35, %v3807_v35 }
 0x147   :  { %647 = vadd.xlane.f32.xlu1 %v592_v56  ;;  %v3797_v56 = vadd.f32 %v3588_v16, %v3636_v38  ;;  %v3813_v38 = vadd.f32 %v3601_v23, %v3588_v16 }
 0x149   :  { %677 = vadd.xlane.f32.xlu0 %v607_v9  ;;  %v3801_v9 = vadd.f32 %v3615_v29, %v3588_v16 }
 0x14b   :  { %645 = vadd.xlane.f32.xlu1 %v591_v57  ;;  %v622_v57 = vmul.f32 %v3791_v59, %v3791_v59  ;;  %v620_v29 = vmul.f32 %v3801_v9, %v3801_v9 }
 0x14d   :  { %675 = vadd.xlane.f32.xlu0 %v606_v6  ;;  %v621_v6 = vmul.f32 %v3797_v56, %v3797_v56 }
 0x14f   :  { %643 = vadd.xlane.f32.xlu1 %v590_v54  ;;  %v3819_v54 = vadd.f32 %v3588_v16, %v3608_v26  ;;  %v228_v16 = vld [vmem:[%s4700_s3 + $0x148] sm:$0xff]  ;;  %v229_v26 = vld [vmem:[%s4700_s3 + $0x150] sm:$0xff] }
 0x151   :  { %673 = vadd.xlane.f32.xlu0 %v605_v7  ;;  %v618_v7 = vmul.f32 %v3813_v38, %v3813_v38  ;;  %v617_v23 = vmul.f32 %v3819_v54, %v3819_v54 }
 0x153   :  { %641 = vadd.xlane.f32.xlu1 %v589_v55  ;;  %v227_v55 = vld [vmem:[%s4700_s3 + $0x140] sm:$0xff] }
 0x154   :  { %3124 = vmatprep.mubr.f32.mxu1 %v227_v55  ;;  %v1189_v55 = vld [vmem:[%s4705_s6 + $0xc0] sm:$0xff] }
 0x155   :  { %671 = vadd.xlane.f32.xlu0 %v604_v4  ;;  %v1207_v4 = vld [vmem:[%s4705_s6 + $0x150] sm:$0xff]  ;;  %3125 = vmatmul.mubr.f32.gmra.mxu1 %v228_v16 }
 0x156   :  { %v1393_v43 = vunpack.c.l.bf16 %v1207_v4  ;;  %3127 = vmatprep.mubr.f32.mxu1 %v229_v26 }
 0x157   :  { %639 = vadd.xlane.f32.xlu1 %v588_v52  ;;  %v1204_v52 = vld [vmem:[%s4705_s6 + $0x138] sm:$0xff] }
 0x158   :  { %v1387_v49 = vunpack.c.l.bf16 %v1204_v52 }
 0x159   :  { %669 = vadd.xlane.f32.xlu0 %v603_v5  ;;  %v1400_v5 = vunpack.c.h.bf16 %v1210_v28  ;;  %v1186_v28 = vld [vmem:[%s4705_s6 + $0xa8] sm:$0xff] }
 0x15b   :  { %637 = vadd.xlane.f32.xlu1 %v587_v53  ;;  %v1394_v53 = vunpack.c.h.bf16 %v1207_v4  ;;  %1629 = vmatprep.subr.mxu1 %v1400_v5  ;;  %v232_v4 = vld [vmem:[%s4700_s3 + $0x168] sm:$0xff] }
 0x15c   :  { %1630 = vmatpush1.msra.mxu1 %v1399_v37  ;;  %v1358_v37 = vunpack.c.h.bf16 %v1189_v55 }
 0x15d   :  { %667 = vadd.xlane.f32.xlu0 %v602_v47  ;;  %v1388_v47 = vunpack.c.h.bf16 %v1204_v52  ;;  %1631 = vmatprep.subr.mxu1 %v1394_v53  ;;  %v1357_v53 = vunpack.c.l.bf16 %v1189_v55  ;;  %v1174_v55 = vld [vmem:[%s4705_s6 + $0x48] sm:$0xff] }
 0x15e   :  { %1632 = vmatpush1.msra.mxu1 %v1393_v43  ;;  %v1183_v43 = vld [vmem:[%s4705_s6 + $0x90] sm:$0xff] }
 0x15f   :  { %635 = vadd.xlane.f32.xlu1 %v586_v63  ;;  %v1198_v63 = vld [vmem:[%s4705_s6 + $0x108] sm:$0xff]  ;;  %1633 = vmatprep.subr.mxu1 %v1388_v47  ;;  %v1352_v47 = vunpack.c.h.bf16 %v1186_v28 }
 0x160   :  { %1634 = vmatpush1.msra.mxu1 %v1387_v49 }
 0x161   :  { %665 = vadd.xlane.f32.xlu0 %v601_v3  ;;  %v1382_v3 = vunpack.c.h.bf16 %v1201_v45 }
 0x163   :  { %633 = vadd.xlane.f32.xlu1 %v585_v10  ;;  %v1381_v10 = vunpack.c.l.bf16 %v1201_v45  ;;  %1635 = vmatprep.subr.mxu1 %v1382_v3  ;;  %v1180_v3 = vld [vmem:[%s4705_s6 + $0x78] sm:$0xff] }
 0x165   :  { %580 = vadd.xlane.f32.xlu0 %v579_v51  ;;  %v1195_v51 = vld [vmem:[%s4705_s6 + $0xf0] sm:$0xff]  ;;  %1636 = vmatpush1.msra.mxu1 %v1381_v10 }
 0x167   :  { %709 = vadd.xlane.f32.xlu1 %v623_v8  ;;  %v1376_v8 = vunpack.c.h.bf16 %v1198_v63 }
 0x169   :  { %707 = vadd.xlane.f32.xlu0 %v622_v57  ;;  %v1375_v57 = vunpack.c.l.bf16 %v1198_v63  ;;  %1637 = vmatprep.subr.mxu1 %v1376_v8  ;;  %v1351_v63 = vunpack.c.l.bf16 %v1186_v28 }
 0x16b   :  { %705 = vadd.xlane.f32.xlu1 %v621_v6  ;;  %v1192_v6 = vld [vmem:[%s4705_s6 + $0xd8] sm:$0xff]  ;;  %1638 = vmatpush1.msra.mxu1 %v1375_v57  ;;  %v1345_v57 = vunpack.c.l.bf16 %v1183_v43 }
 0x16c   :  { %v1364_v16 = vunpack.c.h.bf16 %v1192_v6  ;;  %v1363_v26 = vunpack.c.l.bf16 %v1192_v6  ;;  %v1177_v6 = vld [vmem:[%s4705_s6 + $0x60] sm:$0xff] }
 0x16d   :  { %703 = vadd.xlane.f32.xlu0 %v620_v29  ;;  %v1370_v29 = vunpack.c.h.bf16 %v1195_v51 }
 0x16f   :  { %701 = vadd.xlane.f32.xlu1 %v619_v32  ;;  %v230_v32 = vld [vmem:[%s4700_s3 + $0x158] sm:$0xff]  ;;  %1639 = vmatprep.subr.mxu1 %v1370_v29 }
 0x170   :  { %3128 = vmatmul.mubr.f32.gmra.mxu1 %v230_v32  ;;  %v1340_v32 = vunpack.c.h.bf16 %v1180_v3 }
 0x171   :  { %699 = vadd.xlane.f32.xlu0 %v618_v7  ;;  %v231_v7 = vld [vmem:[%s4700_s3 + $0x160] sm:$0xff] }
 0x172   :  { %3130 = vmatprep.mubr.f32.mxu1 %v231_v7 }
 0x173   :  { %697 = vadd.xlane.f32.xlu1 %v617_v23  ;;  %v1369_v23 = vunpack.c.l.bf16 %v1195_v51  ;;  %v1346_v51 = vunpack.c.h.bf16 %v1183_v43  ;;  %v1327_v43 = vunpack.c.l.bf16 %v1174_v55 }
 0x174   :  { %3131 = vmatmul.mubr.f32.gmra.mxu1 %v232_v4  ;;  %v1333_v4 = vunpack.c.l.bf16 %v1177_v6 }
 0x175   :  { %1640 = vmatpush1.msra.mxu1 %v1369_v23  ;;  %v1339_v23 = vunpack.c.l.bf16 %v1180_v3 }
 0x176   :  { %1641 = vmatprep.subr.mxu1 %v1364_v16 }
 0x177   :  { %1642 = vmatpush1.msra.mxu1 %v1363_v26  ;;  %v1334_v26 = vunpack.c.h.bf16 %v1177_v6 }
 0x178   :  { %1643 = vmatprep.subr.mxu1 %v1358_v37 }
 0x179   :  { %1644 = vmatpush1.msra.mxu1 %v1357_v53 }
 0x17a   :  { %1645 = vmatprep.subr.mxu1 %v1352_v47 }
 0x17b   :  { %1646 = vmatpush1.msra.mxu1 %v1351_v63 }
 0x17c   :  { %1647 = vmatprep.subr.mxu1 %v1346_v51 }
 0x17d   :  { %1648 = vmatpush1.msra.mxu1 %v1345_v57 }
 0x17e   :  { %1649 = vmatprep.subr.mxu1 %v1340_v32 }
 0x17f   :  { %1650 = vmatpush1.msra.mxu1 %v1339_v23 }
 0x180   :  { %1651 = vmatprep.subr.mxu1 %v1334_v26 }
 0x181   :  { %1652 = vmatpush1.msra.mxu1 %v1333_v4 }
 0x1ae   :  { %v696_v52 = vpop.xlane.xlu0 %695 }
 0x1af   :  { %v760_v5 = vadd.f32 1e-12, %v696_v52  ;;  %v1171_v52 = vld [vmem:[%s4705_s6 + $0x30] sm:$0xff] }
 0x1b0   :  { %v694_v45 = vpop.xlane.xlu1 %693  ;;  %v1321_v3 = vunpack.c.l.bf16 %v1171_v52 }
 0x1b1   :  { %3190 = vrsqrt.f32 %v760_v5  ;;  %v759_v49 = vadd.f32 1e-12, %v694_v45  ;;  %v1328_v5 = vunpack.c.h.bf16 %v1174_v55  ;;  %v1168_v45 = vld [vmem:[%s4705_s6 + $0x18] sm:$0xff] }
 0x1b2   :  { %v664_v10 = vpop.xlane.xlu0 %663  ;;  %v1315_v6 = vunpack.c.l.bf16 %v1168_v45 }
 0x1b3   :  { %v744_v8 = vadd.f32 1e-12, %v664_v10  ;;  %3192 = vrsqrt.f32 %v759_v49  ;;  %v1322_v49 = vunpack.c.h.bf16 %v1171_v52  ;;  %v1165_v10 = vld [vmem:[%s4705_s6] sm:$0xff]  ;;  %1653 = vmatprep.subr.mxu1 %v1328_v5 }
 0x1b4   :  { %v662_v29 = vpop.xlane.xlu1 %661  ;;  %1654 = vmatpush1.msra.mxu1 %v1327_v43  ;;  %v1310_v23 = vunpack.c.h.bf16 %v1165_v10  ;;  %v1309_v26 = vunpack.c.l.bf16 %v1165_v10  ;;  %v1252_v43 = vld [vmem:[%s4705_s6 + $0x2b8] sm:$0xff]  ;;  %v1249_v10 = vld [vmem:[%s4705_s6 + $0x2a0] sm:$0xff] }
 0x1b5   :  { %3194 = vrsqrt.f32 %v744_v8  ;;  %v743_v7 = vadd.f32 1e-12, %v662_v29  ;;  %v1316_v8 = vunpack.c.h.bf16 %v1168_v45  ;;  %v1258_v29 = vld [vmem:[%s4705_s6 + $0x2e8] sm:$0xff]  ;;  %1655 = vmatprep.subr.mxu1 %v1322_v49 }
 0x1b6   :  { %v692_v16 = vpop.xlane.xlu0 %691  ;;  %1656 = vmatpush1.msra.mxu1 %v1321_v3  ;;  %v1496_v52 = vunpack.c.h.bf16 %v1258_v29 }
 0x1b7   :  { %3196 = vrsqrt.f32 %v743_v7  ;;  %v758_v28 = vadd.f32 1e-12, %v692_v16  ;;  %1657 = vmatprep.subr.mxu1 %v1316_v8 }
 0x1b8   :  { %v660_v37 = vpop.xlane.xlu1 %659  ;;  %1658 = vmatpush1.msra.mxu1 %v1315_v6  ;;  %v1484_v6 = vunpack.c.h.bf16 %v1252_v43 }
 0x1b9   :  { %3198 = vrsqrt.f32 %v758_v28  ;;  %v742_v53 = vadd.f32 1e-12, %v660_v37  ;;  %v1255_v28 = vld [vmem:[%s4705_s6 + $0x2d0] sm:$0xff]  ;;  %1659 = vmatprep.subr.mxu1 %v1310_v23 }
 0x1ba   :  { %v690_v47 = vpop.xlane.xlu0 %689  ;;  %1660 = vmatpush1.msra.mxu1 %v1309_v26  ;;  %v1489_v3 = vunpack.c.l.bf16 %v1255_v28 }
 0x1bb   :  { %3200 = vrsqrt.f32 %v742_v53  ;;  %v757_v63 = vadd.f32 1e-12, %v690_v47  ;;  %v1495_v53 = vunpack.c.l.bf16 %v1258_v29  ;;  %v1490_v47 = vunpack.c.h.bf16 %v1255_v28  ;;  %1661 = vmatprep.subr.mxu1 %v1496_v52 }
 0x1bc   :  { %v658_v51 = vpop.xlane.xlu1 %657 }
 0x1bd   :  { %3202 = vrsqrt.f32 %v757_v63  ;;  %v741_v57 = vadd.f32 1e-12, %v658_v51  ;;  %1662 = vmatpush2.msra.mxu1 %v1495_v53 }
 0x1be   :  { %v3191_v32 = vpop.eup %3190  ;;  %v688_v7 = vpop.xlane.xlu0 %687  ;;  %1663 = vmatprep.subr.mxu1 %v1490_v47 }
 0x1bf   :  { %3204 = vrsqrt.f32 %v741_v57  ;;  %v756_v55 = vadd.f32 1e-12, %v688_v7  ;;  %v856_v16 = vmul.f32 %v3191_v32, %v3591_v18  ;;  %v1483_v32 = vunpack.c.l.bf16 %v1252_v43  ;;  %1664 = vmatpush2.msra.mxu1 %v1489_v3 }
 0x1c0   :  { %v656_v4 = vpop.xlane.xlu1 %655  ;;  %v3193_v37 = vpop.eup %3192  ;;  %1665 = vmatprep.subr.mxu1 %v1484_v6 }
 0x1c1   :  { %3206 = vrsqrt.f32 %v756_v55  ;;  %v740_v5 = vadd.f32 1e-12, %v656_v4  ;;  %2938 = vmatprep.subr.mxu0 %v856_v16  ;;  %v855_v57 = vmul.f32 %v3193_v37, %v3597_v21  ;;  %v1477_v55 = vunpack.c.l.bf16 %v1249_v10  ;;  %v1243_v4 = vld [vmem:[%s4705_s6 + $0x270] sm:$0xff]  ;;  %1666 = vmatpush2.msra.mxu1 %v1483_v32 }
 0x1c2   :  { %v3195_v18 = vpop.eup %3194  ;;  %v686_v45 = vpop.xlane.xlu0 %685  ;;  %v1478_v16 = vunpack.c.h.bf16 %v1249_v10  ;;  %v1466_v47 = vunpack.c.h.bf16 %v1243_v4  ;;  %v1237_v10 = vld [vmem:[%s4705_s6 + $0x240] sm:$0xff] }
 0x1c3   :  { %3208 = vrsqrt.f32 %v740_v5  ;;  %v755_v49 = vadd.f32 1e-12, %v686_v45  ;;  %v840_v63 = vmul.f32 %v3195_v18, %v3594_v20  ;;  %v1246_v20 = vld [vmem:[%s4705_s6 + $0x288] sm:$0xff]  ;;  %v1465_v45 = vunpack.c.l.bf16 %v1243_v4 }
 0x1c4   :  { %v3197_v51 = vpop.eup %3196  ;;  %v654_v8 = vpop.xlane.xlu1 %653  ;;  %v1472_v5 = vunpack.c.h.bf16 %v1246_v20  ;;  %v1471_v43 = vunpack.c.l.bf16 %v1246_v20  ;;  %1667 = vmatprep.subr.mxu1 %v1478_v16  ;;  %v1453_v20 = vunpack.c.l.bf16 %v1237_v10 }
 0x1c5   :  { %3210 = vrsqrt.f32 %v755_v49  ;;  %v739_v29 = vadd.f32 1e-12, %v654_v8  ;;  %2939 = vmatpush3.xpose.msra.mxu0 %v840_v63  ;;  %v839_v21 = vmul.f32 %v3197_v51, %v3604_v24  ;;  %v1240_v24 = vld [vmem:[%s4705_s6 + $0x258] sm:$0xff]  ;;  %1668 = vmatpush2.msra.mxu1 %v1477_v55 }
 0x1c6   :  { %v3199_v7 = vpop.eup %3198  ;;  %v684_v23 = vpop.xlane.xlu0 %683  ;;  %2940 = vmatprep.subr.mxu0 %v855_v57  ;;  %1669 = vmatprep.subr.mxu1 %v1472_v5  ;;  %v1460_v57 = vunpack.c.h.bf16 %v1240_v24 }
 0x1c7   :  { %3212 = vrsqrt.f32 %v739_v29  ;;  %v754_v26 = vadd.f32 1e-12, %v684_v23  ;;  %v854_v28 = vmul.f32 %v3199_v7, %v3611_v27  ;;  %1670 = vmatpush2.msra.mxu1 %v1471_v43  ;;  %v1459_v29 = vunpack.c.l.bf16 %v1240_v24 }
 0x1c8   :  { %v3201_v52 = vpop.eup %3200  ;;  %v652_v37 = vpop.xlane.xlu1 %651  ;;  %1671 = vmatprep.subr.mxu1 %v1466_v47  ;;  %v1454_v7 = vunpack.c.h.bf16 %v1237_v10 }
 0x1c9   :  { %3214 = vrsqrt.f32 %v754_v26  ;;  %v738_v53 = vadd.f32 1e-12, %v652_v37  ;;  %2941 = vmatpush3.xpose.msra.mxu0 %v839_v21  ;;  %v838_v63 = vmul.f32 %v3201_v52, %v3618_v30  ;;  %v1234_v30 = vld [vmem:[%s4705_s6 + $0x228] sm:$0xff]  ;;  %1672 = vmatpush2.msra.mxu1 %v1465_v45  ;;  %v1231_v26 = vld [vmem:[%s4705_s6 + $0x210] sm:$0xff]  ;;  %v1225_v45 = vld [vmem:[%s4705_s6 + $0x1e0] sm:$0xff] }
 0x1ca   :  { %v3203_v18 = vpop.eup %3202  ;;  %v682_v27 = vpop.xlane.xlu0 %681  ;;  %2942 = vmatprep.subr.mxu0 %v854_v28  ;;  %1673 = vmatprep.subr.mxu1 %v1460_v57  ;;  %v1448_v4 = vunpack.c.h.bf16 %v1234_v30  ;;  %v1447_v37 = vunpack.c.l.bf16 %v1234_v30  ;;  %v1442_v43 = vunpack.c.h.bf16 %v1231_v26  ;;  %v1430_v57 = vunpack.c.h.bf16 %v1225_v45 }
 0x1cb   :  { %3216 = vrsqrt.f32 %v738_v53  ;;  %v753_v49 = vadd.f32 1e-12, %v682_v27  ;;  %v853_v3 = vmul.f32 %v3203_v18, %v3625_v33  ;;  %1674 = vmatpush2.msra.mxu1 %v1459_v29  ;;  %v1441_v53 = vunpack.c.l.bf16 %v1231_v26 }
 0x1cc   :  { %v3205_v51 = vpop.eup %3204  ;;  %v650_v8 = vpop.xlane.xlu1 %649  ;;  %1675 = vmatprep.subr.mxu1 %v1454_v7 }
 0x1cd   :  { %3218 = vrsqrt.f32 %v753_v49  ;;  %v737_v6 = vadd.f32 1e-12, %v650_v8  ;;  %2943 = vmatpush3.xpose.msra.mxu0 %v838_v63  ;;  %v837_v55 = vmul.f32 %v3205_v51, %v3632_v36  ;;  %v1228_v36 = vld [vmem:[%s4705_s6 + $0x1f8] sm:$0xff]  ;;  %1676 = vmatpush2.msra.mxu1 %v1453_v20  ;;  %v1429_v8 = vunpack.c.l.bf16 %v1225_v45 }
 0x1ce   :  { %v3207_v32 = vpop.eup %3206  ;;  %v680_v33 = vpop.xlane.xlu0 %679  ;;  %2944 = vmatprep.subr.mxu0 %v853_v3  ;;  %1677 = vmatprep.subr.mxu1 %v1448_v4  ;;  %v1436_v63 = vunpack.c.h.bf16 %v1228_v36  ;;  %v1435_v10 = vunpack.c.l.bf16 %v1228_v36 }
 0x1cf   :  { %3220 = vrsqrt.f32 %v737_v6  ;;  %v752_v23 = vadd.f32 1e-12, %v680_v33  ;;  %v852_v16 = vmul.f32 %v3207_v32, %v3639_v39  ;;  %1678 = vmatpush2.msra.mxu1 %v1447_v37  ;;  %v1219_v32 = vld [vmem:[%s4705_s6 + $0x1b0] sm:$0xff] }
 0x1d0   :  { %v3209_v21 = vpop.eup %3208  ;;  %v648_v28 = vpop.xlane.xlu1 %647  ;;  %1679 = vmatprep.subr.mxu1 %v1442_v43 }
 0x1d1   :  { %3222 = vrsqrt.f32 %v752_v23  ;;  %v736_v52 = vadd.f32 1e-12, %v648_v28  ;;  %2945 = vmatpush3.xpose.msra.mxu0 %v837_v55  ;;  %v836_v18 = vmul.f32 %v3209_v21, %v3644_v42  ;;  %v1222_v42 = vld [vmem:[%s4705_s6 + $0x1c8] sm:$0xff]  ;;  %1680 = vmatpush2.msra.mxu1 %v1441_v53 }
 0x1d2   :  { %v3211_v5 = vpop.eup %3210  ;;  %v678_v39 = vpop.xlane.xlu0 %677  ;;  %2946 = vmatprep.subr.mxu0 %v852_v16  ;;  %1681 = vmatprep.subr.mxu1 %v1436_v63  ;;  %v1424_v7 = vunpack.c.h.bf16 %v1222_v42  ;;  %v1423_v55 = vunpack.c.l.bf16 %v1222_v42 }
 0x1d3   :  { %3224 = vrsqrt.f32 %v736_v52  ;;  %v751_v24 = vadd.f32 1e-12, %v678_v39  ;;  %v851_v27 = vmul.f32 %v3211_v5, %v3649_v44  ;;  %1682 = vmatpush2.msra.mxu1 %v1435_v10 }
 0x1d4   :  { %v3213_v47 = vpop.eup %3212  ;;  %v646_v49 = vpop.xlane.xlu1 %645  ;;  %1683 = vmatprep.subr.mxu1 %v1430_v57 }
 0x1d5   :  { %3226 = vrsqrt.f32 %v751_v24  ;;  %v735_v3 = vadd.f32 1e-12, %v646_v49  ;;  %2947 = vmatpush3.xpose.msra.mxu0 %v836_v18  ;;  %v835_v29 = vmul.f32 %v3213_v47, %v3654_v46  ;;  %v1417_v46 = vunpack.c.l.bf16 %v1219_v32  ;;  %1684 = vmatpush2.msra.mxu1 %v1429_v8 }
 0x1d6   :  { %v3215_v51 = vpop.eup %3214  ;;  %v676_v44 = vpop.xlane.xlu0 %675  ;;  %2948 = vmatprep.subr.mxu0 %v851_v27  ;;  %1685 = vmatprep.subr.mxu1 %v1424_v7 }
 0x1d7   :  { %3228 = vrsqrt.f32 %v735_v3  ;;  %v750_v6 = vadd.f32 1e-12, %v676_v44  ;;  %v850_v30 = vmul.f32 %v3215_v51, %v3659_v48  ;;  %v1418_v48 = vunpack.c.h.bf16 %v1219_v32  ;;  %1686 = vmatpush2.msra.mxu1 %v1423_v55 }
 0x1d8   :  { %v3217_v33 = vpop.eup %3216  ;;  %v644_v20 = vpop.xlane.xlu1 %643 }
 0x1d9   :  { %3230 = vrsqrt.f32 %v750_v6  ;;  %v734_v23 = vadd.f32 1e-12, %v644_v20  ;;  %2949 = vmatpush3.xpose.msra.mxu0 %v835_v29  ;;  %v834_v28 = vmul.f32 %v3217_v33, %v3665_v60  ;;  %1687 = vmatprep.subr.mxu1 %v1418_v48 }
 0x1da   :  { %v3219_v16 = vpop.eup %3218  ;;  %v674_v26 = vpop.xlane.xlu0 %673  ;;  %2950 = vmatprep.subr.mxu0 %v850_v30  ;;  %1688 = vmatpush2.msra.mxu1 %v1417_v46 }
 0x1db   :  { %3232 = vrsqrt.f32 %v734_v23  ;;  %v749_v21 = vadd.f32 1e-12, %v674_v26  ;;  %v849_v4 = vmul.f32 %v3219_v16, %v3670_v62 }
 0x1dc   :  { %v3221_v52 = vpop.eup %3220  ;;  %v642_v37 = vpop.xlane.xlu1 %641 }
 0x1dd   :  { %3234 = vrsqrt.f32 %v749_v21  ;;  %v733_v36 = vadd.f32 1e-12, %v642_v37  ;;  %2951 = vmatpush3.xpose.msra.mxu0 %v834_v28  ;;  %v833_v43 = vmul.f32 %v3221_v52, %v3676_v0 }
 0x1de   :  { %v3223_v5 = vpop.eup %3222  ;;  %v672_v39 = vpop.xlane.xlu0 %671  ;;  %2952 = vmatprep.subr.mxu0 %v849_v4 }
 0x1df   :  { %3236 = vrsqrt.f32 %v733_v36  ;;  %v748_v53 = vadd.f32 1e-12, %v672_v39  ;;  %v848_v60 = vmul.f32 %v3223_v5, %v3681_v1 }
 0x1e0   :  { %v3225_v62 = vpop.eup %3224  ;;  %v640_v24 = vpop.xlane.xlu1 %639 }
 0x1e1   :  { %3238 = vrsqrt.f32 %v748_v53  ;;  %v732_v18 = vadd.f32 1e-12, %v640_v24  ;;  %2953 = vmatpush3.xpose.msra.mxu0 %v833_v43  ;;  %v832_v49 = vmul.f32 %v3225_v62, %v3687_v11 }
 0x1e2   :  { %v3227_v27 = vpop.eup %3226  ;;  %v670_v45 = vpop.xlane.xlu0 %669  ;;  %2954 = vmatprep.subr.mxu0 %v848_v60 }
 0x1e3   :  { %3240 = vrsqrt.f32 %v732_v18  ;;  %v747_v47 = vadd.f32 1e-12, %v670_v45  ;;  %v847_v63 = vmul.f32 %v3227_v27, %v3693_v12 }
 0x1e4   :  { %v3229_v3 = vpop.eup %3228  ;;  %v638_v10 = vpop.xlane.xlu1 %637 }
 0x1e5   :  { %3242 = vrsqrt.f32 %v747_v47  ;;  %v731_v0 = vadd.f32 1e-12, %v638_v10  ;;  %2955 = vmatpush3.xpose.msra.mxu0 %v832_v49  ;;  %v831_v44 = vmul.f32 %v3229_v3, %v3699_v13 }
 0x1e6   :  { %v3231_v1 = vpop.eup %3230  ;;  %v668_v42 = vpop.xlane.xlu0 %667  ;;  %2956 = vmatprep.subr.mxu0 %v847_v63  ;;  %v3276_v63 = vmov 0.0  }
 0x1e7   :  { %3244 = vrsqrt.f32 %v731_v0  ;;  %v746_v51 = vadd.f32 1e-12, %v668_v42  ;;  %v846_v8 = vmul.f32 %v3231_v1, %v3705_v14 }
 0x1e8   :  { %v3233_v57 = vpop.eup %3232  ;;  %v636_v6 = vpop.xlane.xlu1 %635 }
 0x1e9   :  { %3246 = vrsqrt.f32 %v746_v51  ;;  %v730_v11 = vadd.f32 1e-12, %v636_v6  ;;  %2957 = vmatpush3.xpose.msra.mxu0 %v831_v44  ;;  %v830_v32 = vmul.f32 %v3233_v57, %v3711_v15 }
 0x1ea   :  { %v3235_v12 = vpop.eup %3234  ;;  %v666_v29 = vpop.xlane.xlu0 %665  ;;  %2958 = vmatprep.subr.mxu0 %v846_v8 }
 0x1eb   :  { %3248 = vrsqrt.f32 %v730_v11  ;;  %v745_v30 = vadd.f32 1e-12, %v666_v29  ;;  %v845_v33 = vmul.f32 %v3235_v12, %v3717_v17  ;;  %v1216_v12 = vld [vmem:[%s4705_s6 + $0x198] sm:$0xff] }
 0x1ec   :  { %v3237_v20 = vpop.eup %3236  ;;  %v634_v7 = vpop.xlane.xlu1 %633 }
 0x1ed   :  { %3250 = vrsqrt.f32 %v745_v30  ;;  %v729_v13 = vadd.f32 1e-12, %v634_v7  ;;  %2959 = vmatpush3.xpose.msra.mxu0 %v830_v32  ;;  %v829_v16 = vmul.f32 %v3237_v20, %v3723_v19  ;;  %v1412_v30 = vunpack.c.h.bf16 %v1216_v12  ;;  %v233_v32 = vld [vmem:[%s4700_s3 + $0x170] sm:$0xff]  ;;  %v1213_v7 = vld [vmem:[%s4705_s6 + $0x180] sm:$0xff] }
 0x1ee   :  { %v3239_v14 = vpop.eup %3238  ;;  %2960 = vmatprep.subr.mxu0 %v845_v33  ;;  %v581_v23 = vpop.xlane.xlu0 %580  ;;  %v1411_v33 = vunpack.c.l.bf16 %v1216_v12  ;;  %3133 = vmatprep.mubr.f32.mxu1 %v233_v32  ;;  %v1208_v12 = vld [vmem:[%s4705_s6 + $0x158] sm:$0xff]  ;;  %v1205_v32 = vld [vmem:[%s4705_s6 + $0x140] sm:$0xff] }
 0x1ef   :  { %3252 = vrsqrt.f32 %v729_v13  ;;  %v582_v55 = vadd.f32 1e-12, %v581_v23  ;;  %v844_v26 = vmul.f32 %v3239_v14, %v3729_v22  ;;  %1689 = vmatprep.subr.mxu1 %v1412_v30  ;;  %v234_v13 = vld [vmem:[%s4700_s3 + $0x178] sm:$0xff]  ;;  %v1406_v23 = vunpack.c.h.bf16 %v1213_v7 }
 0x1f0   :  { %v3241_v46 = vpop.eup %3240  ;;  %v710_v48 = vpop.xlane.xlu1 %709  ;;  %3134 = vmatmul.mubr.f32.gmra.mxu1 %v234_v13  ;;  %v1390_v13 = vunpack.c.h.bf16 %v1205_v32 }
 0x1f1   :  { %3254 = vrsqrt.f32 %v582_v55  ;;  %v767_v15 = vadd.f32 1e-12, %v710_v48  ;;  %2961 = vmatpush3.xpose.msra.mxu0 %v829_v16  ;;  %v828_v4 = vmul.f32 %v3241_v46, %v3735_v25  ;;  %v1297_v55 = vld [vmem:[%s4705_s6 + $0x420] sm:$0xff]  ;;  %v1405_v16 = vunpack.c.l.bf16 %v1213_v7  ;;  %v4012_v46 = vld [vmem:[%s4705_s6 + $0x170] sm:$0xff]  ;;  %1690 = vmatpush2.msra.mxu1 %v1411_v33  ;;  %v1202_v7 = vld [vmem:[%s4705_s6 + $0x128] sm:$0xff] }
 0x1f2   :  { %v3243_v17 = vpop.eup %3242  ;;  %2962 = vmatprep.subr.mxu0 %v844_v26  ;;  %v708_v21 = vpop.xlane.xlu0 %707  ;;  %v1574_v26 = vunpack.c.h.bf16 %v1297_v55  ;;  %v1573_v48 = vunpack.c.l.bf16 %v1297_v55  ;;  %1691 = vmatprep.subr.mxu1 %v1406_v23  ;;  %v1396_v33 = vunpack.c.h.bf16 %v1208_v12  ;;  %v1199_v23 = vld [vmem:[%s4705_s6 + $0x110] sm:$0xff]  ;;  %v1384_v55 = vunpack.c.h.bf16 %v1202_v7 }
 0x1f3   :  { %3256 = vrsqrt.f32 %v767_v15  ;;  %v766_v28 = vadd.f32 1e-12, %v708_v21  ;;  %v843_v52 = vmul.f32 %v3243_v17, %v3741_v31  ;;  %v1402_v15 = vunpack.c.h.bf16 %v4012_v46  ;;  %v1294_v17 = vld [vmem:[%s4705_s6 + $0x408] sm:$0xff]  ;;  %1692 = vmatpush2.msra.mxu1 %v1405_v16 }
 0x1f4   :  { %v3245_v37 = vpop.eup %3244  ;;  %v706_v36 = vpop.xlane.xlu1 %705  ;;  %v1568_v21 = vunpack.c.h.bf16 %v1294_v17  ;;  %v1383_v16 = vunpack.c.l.bf16 %v1202_v7  ;;  %v1253_v7 = vld [vmem:[%s4705_s6 + $0x2c0] sm:$0xff] }
 0x1f5   :  { %2963 = vmatpush3.xpose.msra.mxu0 %v828_v4  ;;  %3258 = vrsqrt.f32 %v766_v28  ;;  %v765_v22 = vadd.f32 1e-12, %v706_v36  ;;  %v827_v5 = vmul.f32 %v3245_v37, %v3747_v34  ;;  %v1567_v28 = vunpack.c.l.bf16 %v1294_v17  ;;  %1771 = vmatprep.subr.mxu1 %v1402_v15  ;;  %v1291_v4 = vld [vmem:[%s4705_s6 + $0x3f0] sm:$0xff]  ;;  %v1288_v36 = vld [vmem:[%s4705_s6 + $0x3d8] sm:$0xff]  ;;  %v1193_v15 = vld [vmem:[%s4705_s6 + $0xe0] sm:$0xff] }
 0x1f6   :  { %v3247_v19 = vpop.eup %3246  ;;  %2964 = vmatprep.subr.mxu0 %v843_v52  ;;  %v704_v43 = vpop.xlane.xlu0 %703  ;;  %v1562_v52 = vunpack.c.h.bf16 %v1291_v4  ;;  %v1561_v37 = vunpack.c.l.bf16 %v1291_v4  ;;  %v1366_v4 = vunpack.c.h.bf16 %v1193_v15 }
 0x1f7   :  { %v842_v39 = vmul.f32 %v3247_v19, %v3753_v40  ;;  %3260 = vrsqrt.f32 %v765_v22  ;;  %v764_v25 = vadd.f32 1e-12, %v704_v43  ;;  %v1556_v19 = vunpack.c.h.bf16 %v1288_v36  ;;  %v1282_v43 = vld [vmem:[%s4705_s6 + $0x3a8] sm:$0xff] }
 0x1f8   :  { %v3249_v53 = vpop.eup %3248  ;;  %v702_v18 = vpop.xlane.xlu1 %701  ;;  %v1555_v22 = vunpack.c.l.bf16 %v1288_v36 }
 0x1f9   :  { %2965 = vmatpush3.xpose.msra.mxu0 %v827_v5  ;;  %v826_v31 = vmul.f32 %v3249_v53, %v3759_v41  ;;  %3262 = vrsqrt.f32 %v764_v25  ;;  %v763_v34 = vadd.f32 1e-12, %v702_v18  ;;  %v1285_v5 = vld [vmem:[%s4705_s6 + $0x3c0] sm:$0xff]  ;;  %v1543_v25 = vunpack.c.l.bf16 %v1282_v43  ;;  %v1276_v18 = vld [vmem:[%s4705_s6 + $0x378] sm:$0xff] }
 0x1fa   :  { %v3251_v60 = vpop.eup %3250  ;;  %2966 = vmatprep.subr.mxu0 %v842_v39  ;;  %v700_v49 = vpop.xlane.xlu0 %699  ;;  %v1550_v39 = vunpack.c.h.bf16 %v1285_v5  ;;  %v1549_v53 = vunpack.c.l.bf16 %v1285_v5 }
 0x1fb   :  { %v841_v62 = vmul.f32 %v3251_v60, %v3768_v2  ;;  %3264 = vrsqrt.f32 %v763_v34  ;;  %v762_v41 = vadd.f32 1e-12, %v700_v49  ;;  %v1544_v60 = vunpack.c.h.bf16 %v1282_v43  ;;  %v1270_v49 = vld [vmem:[%s4705_s6 + $0x348] sm:$0xff] }
 0x1fc   :  { %v3253_v24 = vpop.eup %3252  ;;  %v698_v10 = vpop.xlane.xlu1 %697  ;;  %v1531_v34 = vunpack.c.l.bf16 %v1276_v18 }
 0x1fd   :  { %2967 = vmatpush3.xpose.msra.mxu0 %v826_v31  ;;  %v825_v40 = vmul.f32 %v3253_v24, %v3774_v50  ;;  %3266 = vrsqrt.f32 %v762_v41  ;;  %v761_v50 = vadd.f32 1e-12, %v698_v10  ;;  %v1279_v31 = vld [vmem:[%s4705_s6 + $0x390] sm:$0xff]  ;;  %v1520_v41 = vunpack.c.h.bf16 %v1270_v49 }
 0x1fe   :  { %v3255_v27 = vpop.eup %3254  ;;  %2968 = vmatprep.subr.mxu0 %v841_v62  ;;  %v1538_v62 = vunpack.c.h.bf16 %v1279_v31  ;;  %v1537_v24 = vunpack.c.l.bf16 %v1279_v31 }
 0x1ff   :  { %v584_v45 = vmul.f32 %v3255_v27, %v3776_v61  ;;  %3268 = vrsqrt.f32 %v761_v50  ;;  %v1532_v27 = vunpack.c.h.bf16 %v1276_v18 }
 0x200   :  { %v3257_v47 = vpop.eup %3256 }
 0x201   :  { %2969 = vmatpush3.xpose.msra.mxu0 %v825_v40  ;;  %2970 = vmatprep.mubr.f32.mxu0 %v584_v45  ;;  %v863_v2 = vmul.f32 %v3257_v47, %v3783_v58  ;;  %v1273_v40 = vld [vmem:[%s4705_s6 + $0x360] sm:$0xff] }
 0x202   :  { %3136 = vmatprep.subr.mxu0 %v3276_v63  ;;  %v3259_v3 = vpop.eup %3258  ;;  %v1525_v47 = vunpack.c.l.bf16 %v1273_v40 }
 0x203   :  { %v862_v61 = vmul.f32 %v3259_v3, %v3791_v59  ;;  %v1267_v3 = vld [vmem:[%s4705_s6 + $0x330] sm:$0xff] }
 0x204   :  { %2971 = vmatmul.mubr.f32.vlgmr.msra.gmra.mxu0 %v584_v45  ;;  %v3261_v0 = vpop.eup %3260  ;;  %v1514_v10 = vunpack.c.h.bf16 %v1267_v3  ;;  %v1513_v50 = vunpack.c.l.bf16 %v1267_v3 }
 0x205   :  { %3137 = vmatpush3.xpose.msra.mxu0 %v863_v2  ;;  %3150 = vmatprep.mubr.msk.f32.mxu0 %vm3277_vm0, %v3276_v63  ;;  %v861_v58 = vmul.f32 %v3261_v0, %v3797_v56  ;;  %v1306_v56 = vld [vmem:[%s4705_s6 + $0x468] sm:$0xff]  ;;  %v1519_v2 = vunpack.c.l.bf16 %v1270_v49  ;;  %v1169_v49 = vld [vmem:[%s4705_s6 + $0x20] sm:$0xff] }
 0x206   :  { %3138 = vmatprep.subr.mxu0 %v3276_v63  ;;  %v3263_v1 = vpop.eup %3262  ;;  %v1591_v11 = vunpack.c.l.bf16 %v1306_v56 }
 0x207   :  { %v860_v42 = vmul.f32 %v3263_v1, %v3801_v9  ;;  %v1592_v9 = vunpack.c.h.bf16 %v1306_v56  ;;  %v1261_v1 = vld [vmem:[%s4705_s6 + $0x300] sm:$0xff] }
 0x208   :  { %v3265_v51 = vpop.eup %3264 }
 0x209   :  { %3139 = vmatpush3.xpose.msra.mxu0 %v862_v61  ;;  %v859_v44 = vmul.f32 %v3265_v51, %v3807_v35  ;;  %v1303_v35 = vld [vmem:[%s4705_s6 + $0x450] sm:$0xff]  ;;  %v1264_v61 = vld [vmem:[%s4705_s6 + $0x318] sm:$0xff]  ;;  %v1501_v51 = vunpack.c.l.bf16 %v1261_v1 }
 0x20a   :  { %3140 = vmatprep.subr.mxu0 %v3276_v63  ;;  %v3267_v59 = vpop.eup %3266  ;;  %v1585_v29 = vunpack.c.l.bf16 %v1303_v35  ;;  %v1508_v0 = vunpack.c.h.bf16 %v1264_v61 }
 0x20b   :  { %v858_v8 = vmul.f32 %v3267_v59, %v3813_v38  ;;  %v1586_v38 = vunpack.c.h.bf16 %v1303_v35 }
 0x20c   :  { %v3269_v57 = vpop.eup %3268 }
 0x20d   :  { %3141 = vmatpush3.xpose.msra.mxu0 %v861_v58  ;;  %v857_v6 = vmul.f32 %v3269_v57, %v3819_v54  ;;  %v1300_v54 = vld [vmem:[%s4705_s6 + $0x438] sm:$0xff]  ;;  %v1507_v58 = vunpack.c.l.bf16 %v1264_v61 }
 0x20e   :  { %3142 = vmatprep.subr.mxu0 %v3276_v63  ;;  %v1580_v20 = vunpack.c.h.bf16 %v1300_v54  ;;  %v1579_v14 = vunpack.c.l.bf16 %v1300_v54  ;;  %v1401_v54 = vunpack.c.l.bf16 %v4012_v46  ;;  %v1378_v46 = vunpack.c.h.bf16 %v1199_v23 }
 0x211   :  { %3143 = vmatpush3.xpose.msra.mxu0 %v860_v42  ;;  %v1502_v42 = vunpack.c.h.bf16 %v1261_v1 }
 0x212   :  { %3144 = vmatprep.subr.mxu0 %v3276_v63 }
 0x215   :  { %3145 = vmatpush3.xpose.msra.mxu0 %v859_v44  ;;  %v4054_v44 = vld [vmem:[%s4705_s6 + $0x470] sm:$0xff] }
 0x216   :  { %3146 = vmatprep.subr.mxu0 %v3276_v63  ;;  %v1594_v59 = vunpack.c.h.bf16 %v4054_v44 }
 0x219   :  { %3147 = vmatpush3.xpose.msra.mxu0 %v858_v8  ;;  %v3126_v8 = vpop.f32.mrf.mxu1 }
 0x21a   :  { %3148 = vmatprep.subr.mxu0 %v3276_v63 }
 0x21b   :  { %v540_v56 = vpop.f32.mrf.mxu1 }
 0x21c   :  { %v1259_v56 = vld [vmem:[%s4705_s6 + $0x2f0] sm:$0xff] }
 0x21d   :  { %3149 = vmatpush3.xpose.msra.mxu0 %v857_v6 }
 0x21e   :  { %1700 = vmatprep.subr.mxu0 %v1592_v9 }
 0x220   :  { %3151 = vmatmul.mubr.f32.vlgmr.msra.gmra.mxu0 %v584_v45  ;;  %v1526_v45 = vunpack.c.h.bf16 %v1273_v40 }
 0x221   :  { %1701 = vmatpush1.msra.mxu0 %v1591_v11  ;;  %1764 = vmatprep.mubr.f32.mxu0 %v3276_v63 }
 0x222   :  { %1702 = vmatprep.subr.mxu0 %v1586_v38 }
 0x223   :  { %1703 = vmatpush1.msra.mxu0 %v1585_v29 }
 0x224   :  { %1704 = vmatprep.subr.mxu0 %v1580_v20  ;;  %v1395_v20 = vunpack.c.l.bf16 %v1208_v12  ;;  %v1256_v12 = vld [vmem:[%s4705_s6 + $0x2d8] sm:$0xff] }
 0x225   :  { %1705 = vmatpush1.msra.mxu0 %v1579_v14  ;;  %v1389_v14 = vunpack.c.l.bf16 %v1205_v32  ;;  %v1292_v32 = vld [vmem:[%s4705_s6 + $0x3f8] sm:$0xff] }
 0x226   :  { %1706 = vmatprep.subr.mxu0 %v1574_v26  ;;  %v1196_v26 = vld [vmem:[%s4705_s6 + $0xf8] sm:$0xff] }
 0x227   :  { %1707 = vmatpush1.msra.mxu0 %v1573_v48  ;;  %v1377_v48 = vunpack.c.l.bf16 %v1199_v23  ;;  %v1372_v17 = vunpack.c.h.bf16 %v1196_v26  ;;  %v1289_v23 = vld [vmem:[%s4705_s6 + $0x3e0] sm:$0xff] }
 0x228   :  { %1708 = vmatprep.subr.mxu0 %v1568_v21  ;;  %v1371_v21 = vunpack.c.l.bf16 %v1196_v26  ;;  %v1250_v26 = vld [vmem:[%s4705_s6 + $0x2a8] sm:$0xff] }
 0x229   :  { %1709 = vmatpush1.msra.mxu0 %v1567_v28  ;;  %v1190_v28 = vld [vmem:[%s4705_s6 + $0xc8] sm:$0xff] }
 0x22a   :  { %1710 = vmatprep.subr.mxu0 %v1562_v52  ;;  %v1365_v52 = vunpack.c.l.bf16 %v1193_v15  ;;  %v1360_v36 = vunpack.c.h.bf16 %v1190_v28  ;;  %v1286_v15 = vld [vmem:[%s4705_s6 + $0x3c8] sm:$0xff] }
 0x22b   :  { %1711 = vmatpush1.msra.mxu0 %v1561_v37  ;;  %v1187_v37 = vld [vmem:[%s4705_s6 + $0xb0] sm:$0xff] }
 0x22c   :  { %1712 = vmatprep.subr.mxu0 %v1556_v19  ;;  %v1359_v19 = vunpack.c.l.bf16 %v1190_v28  ;;  %v1354_v5 = vunpack.c.h.bf16 %v1187_v37  ;;  %v1247_v28 = vld [vmem:[%s4705_s6 + $0x290] sm:$0xff] }
 0x22d   :  { %1713 = vmatpush1.msra.mxu0 %v1555_v22  ;;  %v1184_v22 = vld [vmem:[%s4705_s6 + $0x98] sm:$0xff] }
 0x22e   :  { %1714 = vmatprep.subr.mxu0 %v1550_v39  ;;  %v1353_v39 = vunpack.c.l.bf16 %v1187_v37  ;;  %v1348_v43 = vunpack.c.h.bf16 %v1184_v22  ;;  %v1283_v37 = vld [vmem:[%s4705_s6 + $0x3b0] sm:$0xff] }
 0x22f   :  { %1715 = vmatpush1.msra.mxu0 %v1549_v53  ;;  %v1181_v53 = vld [vmem:[%s4705_s6 + $0x80] sm:$0xff] }
 0x230   :  { %1716 = vmatprep.subr.mxu0 %v1544_v60  ;;  %v3129_v57 = vpop.f32.mrf.mxu1  ;;  %v1347_v60 = vunpack.c.l.bf16 %v1184_v22  ;;  %v1342_v31 = vunpack.c.h.bf16 %v1181_v53  ;;  %v1244_v22 = vld [vmem:[%s4705_s6 + $0x278] sm:$0xff] }
 0x231   :  { %1717 = vmatpush1.msra.mxu0 %v1543_v25  ;;  %v1178_v25 = vld [vmem:[%s4705_s6 + $0x68] sm:$0xff] }
 0x232   :  { %1718 = vmatprep.subr.mxu0 %v1538_v62  ;;  %v550_v9 = vpop.f32.mrf.mxu1  ;;  %v1341_v62 = vunpack.c.l.bf16 %v1181_v53  ;;  %v1336_v18 = vunpack.c.h.bf16 %v1178_v25  ;;  %v1280_v53 = vld [vmem:[%s4705_s6 + $0x398] sm:$0xff] }
 0x233   :  { %1719 = vmatpush1.msra.mxu0 %v1537_v24  ;;  %v1175_v24 = vld [vmem:[%s4705_s6 + $0x50] sm:$0xff] }
 0x234   :  { %1720 = vmatprep.subr.mxu0 %v1532_v27  ;;  %v3132_v6 = vpop.f32.mrf.mxu1  ;;  %v1335_v27 = vunpack.c.l.bf16 %v1178_v25  ;;  %v1330_v40 = vunpack.c.h.bf16 %v1175_v24  ;;  %v1241_v25 = vld [vmem:[%s4705_s6 + $0x260] sm:$0xff] }
 0x235   :  { %1721 = vmatpush1.msra.mxu0 %v1531_v34  ;;  %v1172_v34 = vld [vmem:[%s4705_s6 + $0x38] sm:$0xff]  ;;  %v1295_v6 = vld [vmem:[%s4705_s6 + $0x410] sm:$0xff] }
 0x236   :  { %1722 = vmatprep.subr.mxu0 %v1526_v45  ;;  %v560_v11 = vpop.f32.mrf.mxu1  ;;  %v1304_v45 = vld [vmem:[%s4705_s6 + $0x458] sm:$0xff]  ;;  %v1324_v3 = vunpack.c.h.bf16 %v1172_v34  ;;  %v1323_v61 = vunpack.c.l.bf16 %v1172_v34  ;;  %v1238_v34 = vld [vmem:[%s4705_s6 + $0x248] sm:$0xff] }
 0x237   :  { %1723 = vmatpush1.msra.mxu0 %v1525_v47  ;;  %v1329_v47 = vunpack.c.l.bf16 %v1175_v24  ;;  %v1277_v24 = vld [vmem:[%s4705_s6 + $0x380] sm:$0xff] }
 0x238   :  { %1724 = vmatprep.subr.mxu0 %v1520_v41 }
 0x239   :  { %1725 = vmatpush1.msra.mxu0 %v1519_v2  ;;  %v1593_v2 = vunpack.c.l.bf16 %v4054_v44  ;;  %v1298_v44 = vld [vmem:[%s4705_s6 + $0x428] sm:$0xff] }
 0x23a   :  { %1726 = vmatprep.subr.mxu0 %v1514_v10  ;;  %v1301_v10 = vld [vmem:[%s4705_s6 + $0x440] sm:$0xff] }
 0x23b   :  { %1727 = vmatpush1.msra.mxu0 %v1513_v50  ;;  %v1582_v8 = vunpack.c.h.bf16 %v1301_v10  ;;  %v1581_v57 = vunpack.c.l.bf16 %v1301_v10  ;;  %v1456_v10 = vunpack.c.h.bf16 %v1238_v34 }
 0x23c   :  { %1728 = vmatprep.subr.mxu0 %v1508_v0  ;;  %v1588_v0 = vunpack.c.h.bf16 %v1304_v45 }
 0x23d   :  { %1729 = vmatpush1.msra.mxu0 %v1507_v58  ;;  %v1166_v58 = vld [vmem:[%s4705_s6 + $0x8] sm:$0xff] }
 0x23e   :  { %1730 = vmatprep.subr.mxu0 %v1502_v42  ;;  %v1587_v42 = vunpack.c.l.bf16 %v1304_v45  ;;  %v1312_v9 = vunpack.c.h.bf16 %v1166_v58  ;;  %v1311_v11 = vunpack.c.l.bf16 %v1166_v58  ;;  %v1462_v45 = vunpack.c.h.bf16 %v1241_v25 }
 0x23f   :  { %1731 = vmatpush1.msra.mxu0 %v1501_v51  ;;  %v1318_v51 = vunpack.c.h.bf16 %v1169_v49 }
 0x240   :  { %1842 = vmatprep.subr.mxu0 %v1594_v59  ;;  %v1317_v59 = vunpack.c.l.bf16 %v1169_v49  ;;  %v1461_v49 = vunpack.c.l.bf16 %v1241_v25 }
 0x2c4   :  { %v1084_v35 = vpop.f32.mrf.mxu0 }
 0x2c5   :  { %v4057_v38 = vmul.f32 14.285714, %v1084_v35  ;;  %v1576_v35 = vunpack.c.h.bf16 %v1298_v44 }
 0x2c6   :  { %v1086_v29 = vpop.f32.mrf.mxu0 }
 0x2c7   :  { %1162 = vst [vmem:[%s4706_s12] sm:$0xff] %v4057_v38  ;;  %v4066_v30 = vmul.f32 14.285714, %v1086_v29  ;;  %v1575_v29 = vunpack.c.l.bf16 %v1298_v44  ;;  %v1268_v44 = vld [vmem:[%s4705_s6 + $0x338] sm:$0xff] }
 0x2c9   :  { %1163 = vst [vmem:[%s4706_s12 + $0x8] sm:$0xff] %v4066_v30  ;;  %1693 = vmatprep.mubr.f32.mxu1 %v4066_v30 }
 0x2ca   :  { %1694 = vmatmul.mubr.f32.vlgmr.msra.gmra.mxu1 %v4057_v38 }
 0x2cb   :  { %1772 = vmatpush1.msra.mxu1 %v1401_v54  ;;  %1835 = vmatprep.mubr.f32.mxu1 %v4066_v30  ;;  %v1498_v54 = vunpack.c.h.bf16 %v1259_v56 }
 0x2cc   :  { %1773 = vmatprep.subr.mxu1 %v1396_v33  ;;  %v1497_v33 = vunpack.c.l.bf16 %v1259_v56  ;;  %v1229_v56 = vld [vmem:[%s4705_s6 + $0x200] sm:$0xff] }
 0x2cd   :  { %1774 = vmatpush1.msra.mxu1 %v1395_v20  ;;  %v1570_v20 = vunpack.c.h.bf16 %v1295_v6 }
 0x2ce   :  { %1775 = vmatprep.subr.mxu1 %v1390_v13  ;;  %v1569_v13 = vunpack.c.l.bf16 %v1295_v6  ;;  %v1265_v6 = vld [vmem:[%s4705_s6 + $0x320] sm:$0xff] }
 0x2cf   :  { %1776 = vmatpush1.msra.mxu1 %v1389_v14  ;;  %v1492_v14 = vunpack.c.h.bf16 %v1256_v12 }
 0x2d0   :  { %1777 = vmatprep.subr.mxu1 %v1384_v55  ;;  %v1491_v55 = vunpack.c.l.bf16 %v1256_v12  ;;  %v1226_v12 = vld [vmem:[%s4705_s6 + $0x1e8] sm:$0xff] }
 0x2d1   :  { %1778 = vmatpush1.msra.mxu1 %v1383_v16  ;;  %v1564_v16 = vunpack.c.h.bf16 %v1292_v32 }
 0x2d2   :  { %1779 = vmatprep.subr.mxu1 %v1378_v46  ;;  %v1563_v46 = vunpack.c.l.bf16 %v1292_v32  ;;  %v1262_v32 = vld [vmem:[%s4705_s6 + $0x308] sm:$0xff] }
 0x2d3   :  { %1780 = vmatpush1.msra.mxu1 %v1377_v48  ;;  %v1486_v48 = vunpack.c.h.bf16 %v1253_v7 }
 0x2d4   :  { %1781 = vmatprep.subr.mxu1 %v1372_v17  ;;  %v1485_v17 = vunpack.c.l.bf16 %v1253_v7  ;;  %v1223_v7 = vld [vmem:[%s4705_s6 + $0x1d0] sm:$0xff] }
 0x2d5   :  { %1782 = vmatpush1.msra.mxu1 %v1371_v21  ;;  %v1558_v21 = vunpack.c.h.bf16 %v1289_v23 }
 0x2d6   :  { %1783 = vmatprep.subr.mxu1 %v1366_v4  ;;  %v1557_v4 = vunpack.c.l.bf16 %v1289_v23  ;;  %v1431_v23 = vunpack.c.l.bf16 %v1226_v12 }
 0x2d7   :  { %1784 = vmatpush1.msra.mxu1 %v1365_v52  ;;  %v1480_v52 = vunpack.c.h.bf16 %v1250_v26 }
 0x2d8   :  { %1785 = vmatprep.subr.mxu1 %v1360_v36  ;;  %v1479_v36 = vunpack.c.l.bf16 %v1250_v26  ;;  %v1503_v26 = vunpack.c.l.bf16 %v1262_v32 }
 0x2d9   :  { %1786 = vmatpush1.msra.mxu1 %v1359_v19  ;;  %v1552_v19 = vunpack.c.h.bf16 %v1286_v15 }
 0x2da   :  { %1787 = vmatprep.subr.mxu1 %v1354_v5  ;;  %v1551_v5 = vunpack.c.l.bf16 %v1286_v15  ;;  %v1425_v15 = vunpack.c.l.bf16 %v1223_v7 }
 0x2db   :  { %1788 = vmatpush1.msra.mxu1 %v1353_v39  ;;  %v1474_v39 = vunpack.c.h.bf16 %v1247_v28 }
 0x2dc   :  { %1789 = vmatprep.subr.mxu1 %v1348_v43  ;;  %v1473_v43 = vunpack.c.l.bf16 %v1247_v28  ;;  %v1217_v28 = vld [vmem:[%s4705_s6 + $0x1a0] sm:$0xff] }
 0x2dd   :  { %1790 = vmatpush1.msra.mxu1 %v1347_v60  ;;  %v1546_v60 = vunpack.c.h.bf16 %v1283_v37 }
 0x2de   :  { %1791 = vmatprep.subr.mxu1 %v1342_v31  ;;  %v1545_v31 = vunpack.c.l.bf16 %v1283_v37 }
 0x2df   :  { %1792 = vmatpush1.msra.mxu1 %v1341_v62  ;;  %v1468_v62 = vunpack.c.h.bf16 %v1244_v22 }
 0x2e0   :  { %1793 = vmatprep.subr.mxu1 %v1336_v18  ;;  %v1155_v41 = vpop.f32.mrf.mxu0  ;;  %v1467_v18 = vunpack.c.l.bf16 %v1244_v22 }
 0x2e1   :  { %v4122_v50 = vmul.f32 14.285714, %v1155_v41  ;;  %1794 = vmatpush1.msra.mxu1 %v1335_v27  ;;  %v1540_v27 = vunpack.c.h.bf16 %v1280_v53  ;;  %v1534_v41 = vunpack.c.h.bf16 %v1277_v24 }
 0x2e2   :  { %1795 = vmatprep.subr.mxu1 %v1330_v40  ;;  %v3152_v1 = vpop.f32.mrf.mxu0  ;;  %v1539_v40 = vunpack.c.l.bf16 %v1280_v53  ;;  %v1413_v53 = vunpack.c.l.bf16 %v1217_v28 }
 0x2e3   :  { %1164 = vst [vmem:[%s4706_s12 + $0x10] sm:$0xff] %v4122_v50  ;;  %1796 = vmatpush1.msra.mxu1 %v1329_v47  ;;  %1765 = vmatmul.mubr.f32.vlgmr.msra.gmra.mxu0 %v4122_v50  ;;  %v1274_v47 = vld [vmem:[%s4705_s6 + $0x368] sm:$0xff]  ;;  %v1232_v1 = vld [vmem:[%s4705_s6 + $0x218] sm:$0xff] }
 0x2e4   :  { %1797 = vmatprep.subr.mxu1 %v1324_v3  ;;  %1843 = vmatpush1.msra.mxu0 %v1593_v2  ;;  %v1235_v2 = vld [vmem:[%s4705_s6 + $0x230] sm:$0xff]  ;;  %v1533_v3 = vunpack.c.l.bf16 %v1277_v24  ;;  %v1528_v58 = vunpack.c.h.bf16 %v1274_v47 }
 0x2e5   :  { %1798 = vmatpush1.msra.mxu1 %v1323_v61  ;;  %1844 = vmatprep.subr.mxu0 %v1588_v0  ;;  %v1271_v61 = vld [vmem:[%s4705_s6 + $0x350] sm:$0xff]  ;;  %v1455_v0 = vunpack.c.l.bf16 %v1238_v34 }
 0x2e6   :  { %1799 = vmatprep.subr.mxu1 %v1318_v51  ;;  %1845 = vmatpush1.msra.mxu0 %v1587_v42  ;;  %v1527_v42 = vunpack.c.l.bf16 %v1274_v47  ;;  %v1450_v51 = vunpack.c.h.bf16 %v1235_v2 }
 0x2e7   :  { %1800 = vmatpush1.msra.mxu1 %v1317_v59  ;;  %1846 = vmatprep.subr.mxu0 %v1582_v8  ;;  %v1449_v59 = vunpack.c.l.bf16 %v1235_v2  ;;  %v1522_v8 = vunpack.c.h.bf16 %v1271_v61 }
 0x2e8   :  { %1801 = vmatprep.subr.mxu1 %v1312_v9  ;;  %1847 = vmatpush1.msra.mxu0 %v1581_v57  ;;  %v1521_v57 = vunpack.c.l.bf16 %v1271_v61  ;;  %v1444_v9 = vunpack.c.h.bf16 %v1232_v1 }
 0x2e9   :  { %1802 = vmatpush1.msra.mxu1 %v1311_v11  ;;  %1848 = vmatprep.subr.mxu0 %v1576_v35  ;;  %v1443_v11 = vunpack.c.l.bf16 %v1232_v1  ;;  %v1516_v35 = vunpack.c.h.bf16 %v1268_v44 }
 0x2ea   :  { %1803 = vmatprep.subr.mxu1 %v1498_v54  ;;  %1849 = vmatpush1.msra.mxu0 %v1575_v29  ;;  %v1515_v29 = vunpack.c.l.bf16 %v1268_v44  ;;  %v1438_v54 = vunpack.c.h.bf16 %v1229_v56 }
 0x2eb   :  { %1804 = vmatpush2.msra.mxu1 %v1497_v33  ;;  %1850 = vmatprep.subr.mxu0 %v1570_v20  ;;  %v1437_v33 = vunpack.c.l.bf16 %v1229_v56  ;;  %v1510_v20 = vunpack.c.h.bf16 %v1265_v6 }
 0x2ec   :  { %1805 = vmatprep.subr.mxu1 %v1492_v14  ;;  %1851 = vmatpush1.msra.mxu0 %v1569_v13  ;;  %v1509_v13 = vunpack.c.l.bf16 %v1265_v6  ;;  %v1432_v14 = vunpack.c.h.bf16 %v1226_v12 }
 0x2ed   :  { %1806 = vmatpush2.msra.mxu1 %v1491_v55  ;;  %1852 = vmatprep.subr.mxu0 %v1564_v16  ;;  %v1504_v55 = vunpack.c.h.bf16 %v1262_v32  ;;  %v1212_v16 = vld [vmem:[%s4705_s6 + $0x178] sm:$0xff] }
 0x2ee   :  { %1807 = vmatprep.subr.mxu1 %v1486_v48  ;;  %1853 = vmatpush1.msra.mxu0 %v1563_v46  ;;  %v1426_v46 = vunpack.c.h.bf16 %v1223_v7  ;;  %v1220_v48 = vld [vmem:[%s4705_s6 + $0x1b8] sm:$0xff] }
 0x2ef   :  { %1808 = vmatpush2.msra.mxu1 %v1485_v17  ;;  %1854 = vmatprep.subr.mxu0 %v1558_v21  ;;  %v1404_v17 = vunpack.c.h.bf16 %v1212_v16  ;;  %v1209_v21 = vld [vmem:[%s4705_s6 + $0x160] sm:$0xff]  ;;  %v1419_v37 = vunpack.c.l.bf16 %v1220_v48 }
 0x2f0   :  { %1809 = vmatprep.subr.mxu1 %v1480_v52  ;;  %1855 = vmatpush1.msra.mxu0 %v1557_v4  ;;  %v1403_v4 = vunpack.c.l.bf16 %v1212_v16  ;;  %v1420_v52 = vunpack.c.h.bf16 %v1220_v48  ;;  %v1398_v22 = vunpack.c.h.bf16 %v1209_v21 }
 0x2f1   :  { %1810 = vmatpush2.msra.mxu1 %v1479_v36  ;;  %1856 = vmatprep.subr.mxu0 %v1552_v19  ;;  %v1206_v36 = vld [vmem:[%s4705_s6 + $0x148] sm:$0xff] }
 0x2f2   :  { %1811 = vmatprep.subr.mxu1 %v1474_v39  ;;  %1857 = vmatpush1.msra.mxu0 %v1551_v5  ;;  %v1214_v19 = vld [vmem:[%s4705_s6 + $0x188] sm:$0xff]  ;;  %v1414_v5 = vunpack.c.h.bf16 %v1217_v28  ;;  %v1397_v39 = vunpack.c.l.bf16 %v1209_v21 }
 0x2f3   :  { %1812 = vmatpush2.msra.mxu1 %v1473_v43  ;;  %1858 = vmatprep.subr.mxu0 %v1546_v60  ;;  %v1203_v43 = vld [vmem:[%s4705_s6 + $0x130] sm:$0xff]  ;;  %v1392_v60 = vunpack.c.h.bf16 %v1206_v36  ;;  %v1408_v25 = vunpack.c.h.bf16 %v1214_v19  ;;  %v1407_v24 = vunpack.c.l.bf16 %v1214_v19 }
 0x2f4   :  { %1813 = vmatprep.subr.mxu1 %v1468_v62  ;;  %1859 = vmatpush1.msra.mxu0 %v1545_v31  ;;  %v1308_v31 = vld [vmem:[%s4705_s6 + $0x478] sm:$0xff]  ;;  %v1391_v62 = vunpack.c.l.bf16 %v1206_v36  ;;  %v1386_v34 = vunpack.c.h.bf16 %v1203_v43 }
 0x2f5   :  { %1814 = vmatpush2.msra.mxu1 %v1467_v18  ;;  %1860 = vmatprep.subr.mxu0 %v1540_v27  ;;  %v1200_v18 = vld [vmem:[%s4705_s6 + $0x118] sm:$0xff]  ;;  %v3135_v27 = vpop.f32.mrf.mxu1  ;;  %v1596_v47 = vunpack.c.h.bf16 %v1308_v31 }
 0x2f6   :  { %1815 = vmatprep.subr.mxu1 %v1462_v45  ;;  %1861 = vmatpush1.msra.mxu0 %v1539_v40  ;;  %v1305_v40 = vld [vmem:[%s4705_s6 + $0x460] sm:$0xff]  ;;  %v1385_v45 = vunpack.c.l.bf16 %v1203_v43  ;;  %v1380_v2 = vunpack.c.h.bf16 %v1200_v18  ;;  %v1176_v36 = vld [vmem:[%s4705_s6 + $0x58] sm:$0xff] }
 0x2f7   :  { %1816 = vmatpush2.msra.mxu1 %v1461_v49  ;;  %1862 = vmatprep.subr.mxu0 %v1534_v41  ;;  %v570_v49 = vpop.f32.mrf.mxu1  ;;  %v1595_v41 = vunpack.c.l.bf16 %v1308_v31  ;;  %v1590_v61 = vunpack.c.h.bf16 %v1305_v40  ;;  %v1173_v43 = vld [vmem:[%s4705_s6 + $0x40] sm:$0xff]  ;;  %v1278_v31 = vld [vmem:[%s4705_s6 + $0x388] sm:$0xff] }
 0x2f8   :  { %1817 = vmatprep.subr.mxu1 %v1456_v10  ;;  %1863 = vmatpush1.msra.mxu0 %v1533_v3  ;;  %v1302_v3 = vld [vmem:[%s4705_s6 + $0x448] sm:$0xff]  ;;  %v1379_v10 = vunpack.c.l.bf16 %v1200_v18  ;;  %v1535_v49 = vunpack.c.l.bf16 %v1278_v31 }
 0x2f9   :  { %1818 = vmatpush2.msra.mxu1 %v1455_v0  ;;  %1864 = vmatprep.subr.mxu0 %v1528_v58  ;;  %v1194_v0 = vld [vmem:[%s4705_s6 + $0xe8] sm:$0xff]  ;;  %v1589_v58 = vunpack.c.l.bf16 %v1305_v40  ;;  %v1584_v44 = vunpack.c.h.bf16 %v1302_v3  ;;  %v1275_v40 = vld [vmem:[%s4705_s6 + $0x370] sm:$0xff] }
 0x2fa   :  { %1819 = vmatprep.subr.mxu1 %v1450_v51  ;;  %1865 = vmatpush1.msra.mxu0 %v1527_v42  ;;  %v1299_v42 = vld [vmem:[%s4705_s6 + $0x430] sm:$0xff]  ;;  %v1368_v56 = vunpack.c.h.bf16 %v1194_v0  ;;  %v1170_v18 = vld [vmem:[%s4705_s6 + $0x28] sm:$0xff] }
 0x2fb   :  { %1820 = vmatpush2.msra.mxu1 %v1449_v59  ;;  %1866 = vmatprep.subr.mxu0 %v1522_v8  ;;  %v1191_v59 = vld [vmem:[%s4705_s6 + $0xd0] sm:$0xff]  ;;  %v1583_v8 = vunpack.c.l.bf16 %v1302_v3  ;;  %v1578_v6 = vunpack.c.h.bf16 %v1299_v42  ;;  %v1319_v3 = vunpack.c.l.bf16 %v1170_v18 }
 0x2fc   :  { %1821 = vmatprep.subr.mxu1 %v1444_v9  ;;  %1867 = vmatpush1.msra.mxu0 %v1521_v57  ;;  %v1296_v57 = vld [vmem:[%s4705_s6 + $0x418] sm:$0xff]  ;;  %v1367_v9 = vunpack.c.l.bf16 %v1194_v0  ;;  %v1362_v12 = vunpack.c.h.bf16 %v1191_v59  ;;  %v1529_v0 = vunpack.c.l.bf16 %v1275_v40 }
 0x2fd   :  { %1822 = vmatpush2.msra.mxu1 %v1443_v11  ;;  %1868 = vmatprep.subr.mxu0 %v1516_v35  ;;  %v1188_v11 = vld [vmem:[%s4705_s6 + $0xb8] sm:$0xff]  ;;  %v1577_v35 = vunpack.c.l.bf16 %v1299_v42  ;;  %v1572_v32 = vunpack.c.h.bf16 %v1296_v57 }
 0x2fe   :  { %1823 = vmatprep.subr.mxu1 %v1438_v54  ;;  %1869 = vmatpush1.msra.mxu0 %v1515_v29  ;;  %v1293_v29 = vld [vmem:[%s4705_s6 + $0x400] sm:$0xff]  ;;  %v1361_v54 = vunpack.c.l.bf16 %v1191_v59  ;;  %v1356_v7 = vunpack.c.h.bf16 %v1188_v11 }
 0x2ff   :  { %1824 = vmatpush2.msra.mxu1 %v1437_v33  ;;  %1870 = vmatprep.subr.mxu0 %v1510_v20  ;;  %v1185_v33 = vld [vmem:[%s4705_s6 + $0xa0] sm:$0xff]  ;;  %v1571_v20 = vunpack.c.l.bf16 %v1296_v57  ;;  %v1565_v16 = vunpack.c.l.bf16 %v1293_v29 }
 0x300   :  { %1825 = vmatprep.subr.mxu1 %v1432_v14  ;;  %1871 = vmatpush1.msra.mxu0 %v1509_v13  ;;  %v1290_v13 = vld [vmem:[%s4705_s6 + $0x3e8] sm:$0xff]  ;;  %v1355_v14 = vunpack.c.l.bf16 %v1188_v11  ;;  %v1349_v48 = vunpack.c.l.bf16 %v1185_v33 }
 0x301   :  { %1826 = vmatpush2.msra.mxu1 %v1431_v23  ;;  %1872 = vmatprep.subr.mxu0 %v1504_v55  ;;  %v1566_v23 = vunpack.c.h.bf16 %v1293_v29  ;;  %v1182_v55 = vld [vmem:[%s4705_s6 + $0x88] sm:$0xff]  ;;  %v1559_v21 = vunpack.c.l.bf16 %v1290_v13 }
 0x302   :  { %1827 = vmatprep.subr.mxu1 %v1426_v46  ;;  %1873 = vmatpush1.msra.mxu0 %v1503_v26  ;;  %v1350_v26 = vunpack.c.h.bf16 %v1185_v33  ;;  %v1287_v46 = vld [vmem:[%s4705_s6 + $0x3d0] sm:$0xff]  ;;  %v1344_v28 = vunpack.c.h.bf16 %v1182_v55 }
 0x303   :  { %1906 = vmatprep.mubr.f32.mxu0 %v3276_v63  ;;  %1828 = vmatpush2.msra.mxu1 %v1425_v15  ;;  %v1560_v15 = vunpack.c.h.bf16 %v1290_v13  ;;  %v1553_v19 = vunpack.c.l.bf16 %v1287_v46 }
 0x304   :  { %1907 = vmatmul.mubr.f32.vlgmr.msra.gmra.mxu0 %v4122_v50  ;;  %1913 = vmatprep.subr.mxu0 %v1404_v17  ;;  %v1179_v17 = vld [vmem:[%s4705_s6 + $0x70] sm:$0xff] }
 0x305   :  { %1829 = vmatprep.subr.mxu1 %v1420_v52  ;;  %1914 = vmatpush1.msra.mxu0 %v1403_v4  ;;  %v1284_v4 = vld [vmem:[%s4705_s6 + $0x3b8] sm:$0xff]  ;;  %v1343_v52 = vunpack.c.l.bf16 %v1182_v55 }
 0x306   :  { %1977 = vmatprep.mubr.f32.mxu0 %v4066_v30  ;;  %1830 = vmatpush2.msra.mxu1 %v1419_v37  ;;  %v1197_v30 = vld [vmem:[%s4705_s6 + $0x100] sm:$0xff]  ;;  %v1554_v37 = vunpack.c.h.bf16 %v1287_v46 }
 0x307   :  { %1915 = vmatprep.subr.mxu0 %v1398_v22  ;;  %1831 = vmatprep.subr.mxu1 %v1414_v5  ;;  %v1374_v1 = vunpack.c.h.bf16 %v1197_v30  ;;  %v1373_v51 = vunpack.c.l.bf16 %v1197_v30  ;;  %v1338_v22 = vunpack.c.h.bf16 %v1179_v17  ;;  %v1281_v5 = vld [vmem:[%s4705_s6 + $0x3a0] sm:$0xff]  ;;  %v1167_v30 = vld [vmem:[%s4705_s6 + $0x10] sm:$0xff] }
 0x308   :  { %1916 = vmatpush1.msra.mxu0 %v1397_v39  ;;  %1832 = vmatpush2.msra.mxu1 %v1413_v53  ;;  %v1337_v39 = vunpack.c.l.bf16 %v1179_v17  ;;  %v1548_v53 = vunpack.c.h.bf16 %v1284_v4  ;;  %v1541_v27 = vunpack.c.l.bf16 %v1281_v5  ;;  %v1313_v42 = vunpack.c.l.bf16 %v1167_v30 }
 0x309   :  { %1917 = vmatprep.subr.mxu0 %v1392_v60  ;;  %1833 = vmatprep.subr.mxu1 %v1408_v25  ;;  %v1547_v60 = vunpack.c.l.bf16 %v1284_v4  ;;  %v1332_v25 = vunpack.c.h.bf16 %v1176_v36 }
 0x30a   :  { %1918 = vmatpush1.msra.mxu0 %v1391_v62  ;;  %1834 = vmatpush2.msra.mxu1 %v1407_v24  ;;  %v1331_v62 = vunpack.c.l.bf16 %v1176_v36  ;;  %v1542_v24 = vunpack.c.h.bf16 %v1281_v5 }
 0x30b   :  { %1919 = vmatprep.subr.mxu0 %v1386_v34  ;;  %1836 = vmatmul.mubr.f32.vlgmr.msra.gmra.mxu1 %v4057_v38  ;;  %v1326_v34 = vunpack.c.h.bf16 %v1173_v43 }
 0x30c   :  { %1920 = vmatpush1.msra.mxu0 %v1385_v45  ;;  %1984 = vmatprep.subr.mxu1 %v1596_v47  ;;  %v1325_v45 = vunpack.c.l.bf16 %v1173_v43  ;;  %v1536_v47 = vunpack.c.h.bf16 %v1278_v31 }
 0x30d   :  { %1921 = vmatprep.subr.mxu0 %v1380_v2  ;;  %1985 = vmatpush1.msra.mxu1 %v1595_v41  ;;  %v1320_v41 = vunpack.c.h.bf16 %v1170_v18  ;;  %v1272_v2 = vld [vmem:[%s4705_s6 + $0x358] sm:$0xff] }
 0x30e   :  { %1922 = vmatpush1.msra.mxu0 %v1379_v10  ;;  %1986 = vmatprep.subr.mxu1 %v1590_v61  ;;  %v1530_v10 = vunpack.c.h.bf16 %v1275_v40  ;;  %v1260_v61 = vld [vmem:[%s4705_s6 + $0x2f8] sm:$0xff]  ;;  %v1523_v59 = vunpack.c.l.bf16 %v1272_v2 }
 0x30f   :  { %1923 = vmatprep.subr.mxu0 %v1374_v1  ;;  %1987 = vmatpush1.msra.mxu1 %v1589_v58  ;;  %v1314_v58 = vunpack.c.h.bf16 %v1167_v30  ;;  %v1269_v1 = vld [vmem:[%s4705_s6 + $0x340] sm:$0xff]  ;;  %v1499_v57 = vunpack.c.l.bf16 %v1260_v61 }
 0x310   :  { %1924 = vmatpush1.msra.mxu0 %v1373_v51  ;;  %1988 = vmatprep.subr.mxu1 %v1584_v44  ;;  %v1524_v51 = vunpack.c.h.bf16 %v1272_v2  ;;  %v1257_v44 = vld [vmem:[%s4705_s6 + $0x2e0] sm:$0xff]  ;;  %v1517_v11 = vunpack.c.l.bf16 %v1269_v1 }
 0x311   :  { %1925 = vmatprep.subr.mxu0 %v1368_v56  ;;  %1989 = vmatpush1.msra.mxu1 %v1583_v8  ;;  %v1500_v8 = vunpack.c.h.bf16 %v1260_v61  ;;  %v1266_v56 = vld [vmem:[%s4705_s6 + $0x328] sm:$0xff]  ;;  %v1493_v29 = vunpack.c.l.bf16 %v1257_v44  ;;  %v2195_v61 = vld [vmem:[%s4707_s10 + $0xb4] sm:$0xff] }
 0x312   :  { %1926 = vmatpush1.msra.mxu0 %v1367_v9  ;;  %1990 = vmatprep.subr.mxu1 %v1578_v6  ;;  %v1518_v9 = vunpack.c.h.bf16 %v1269_v1  ;;  %v1254_v6 = vld [vmem:[%s4705_s6 + $0x2c8] sm:$0xff]  ;;  %v1511_v33 = vunpack.c.l.bf16 %v1266_v56 }
 0x313   :  { %1927 = vmatprep.subr.mxu0 %v1362_v12  ;;  %1991 = vmatpush1.msra.mxu1 %v1577_v35  ;;  %v1494_v35 = vunpack.c.h.bf16 %v1257_v44  ;;  %v1263_v12 = vld [vmem:[%s4705_s6 + $0x310] sm:$0xff]  ;;  %v2193_v1 = vld [vmem:[%s4707_s10 + $0xa8] sm:$0xff] }
 0x314   :  { %1928 = vmatpush1.msra.mxu0 %v1361_v54  ;;  %1992 = vmatprep.subr.mxu1 %v1572_v32  ;;  %v1512_v54 = vunpack.c.h.bf16 %v1266_v56  ;;  %v1251_v32 = vld [vmem:[%s4705_s6 + $0x2b0] sm:$0xff]  ;;  %v1506_v13 = vunpack.c.h.bf16 %v1263_v12 }
 0x315   :  { %1929 = vmatprep.subr.mxu0 %v1356_v7  ;;  %1993 = vmatpush1.msra.mxu1 %v1571_v20  ;;  %v1488_v20 = vunpack.c.h.bf16 %v1254_v6  ;;  %v1487_v7 = vunpack.c.l.bf16 %v1254_v6  ;;  %v1482_v55 = vunpack.c.h.bf16 %v1251_v32 }
 0x316   :  { %1930 = vmatpush1.msra.mxu0 %v1355_v14  ;;  %1994 = vmatprep.subr.mxu1 %v1566_v23  ;;  %v1248_v14 = vld [vmem:[%s4705_s6 + $0x298] sm:$0xff]  ;;  %v1505_v23 = vunpack.c.l.bf16 %v1263_v12 }
 0x317   :  { %1931 = vmatprep.subr.mxu0 %v1350_v26  ;;  %1995 = vmatpush1.msra.mxu1 %v1565_v16  ;;  %v1481_v16 = vunpack.c.l.bf16 %v1251_v32  ;;  %v1245_v26 = vld [vmem:[%s4705_s6 + $0x280] sm:$0xff]  ;;  %v1476_v46 = vunpack.c.h.bf16 %v1248_v14 }
 0x318   :  { %1932 = vmatpush1.msra.mxu0 %v1349_v48  ;;  %1996 = vmatprep.subr.mxu1 %v1560_v15  ;;  %v1475_v48 = vunpack.c.l.bf16 %v1248_v14  ;;  %v1242_v15 = vld [vmem:[%s4705_s6 + $0x268] sm:$0xff]  ;;  %v1470_v17 = vunpack.c.h.bf16 %v1245_v26 }
 0x319   :  { %1933 = vmatprep.subr.mxu0 %v1344_v28  ;;  %1997 = vmatpush1.msra.mxu1 %v1559_v21  ;;  %v1469_v21 = vunpack.c.l.bf16 %v1245_v26  ;;  %v1239_v28 = vld [vmem:[%s4705_s6 + $0x250] sm:$0xff]  ;;  %v1464_v4 = vunpack.c.h.bf16 %v1242_v15  ;;  %v2177_v26 = vld [vmem:[%s4707_s10 + $0x48] sm:$0xff] }
 0x31a   :  { %1934 = vmatpush1.msra.mxu0 %v1343_v52  ;;  %1998 = vmatprep.subr.mxu1 %v1554_v37  ;;  %v1463_v52 = vunpack.c.l.bf16 %v1242_v15  ;;  %v1236_v37 = vld [vmem:[%s4705_s6 + $0x238] sm:$0xff]  ;;  %v1458_v36 = vunpack.c.h.bf16 %v1239_v28  ;;  %v2279_v15 = vunpack.c.l.bf16 %v2177_v26 }
 0x31b   :  { %1935 = vmatprep.subr.mxu0 %v1338_v22  ;;  %1999 = vmatpush1.msra.mxu1 %v1553_v19  ;;  %v1457_v19 = vunpack.c.l.bf16 %v1239_v28  ;;  %v1233_v22 = vld [vmem:[%s4705_s6 + $0x220] sm:$0xff]  ;;  %v1452_v5 = vunpack.c.h.bf16 %v1236_v37 }
 0x31c   :  { %1936 = vmatpush1.msra.mxu0 %v1337_v39  ;;  %2000 = vmatprep.subr.mxu1 %v1548_v53  ;;  %v1230_v39 = vld [vmem:[%s4705_s6 + $0x208] sm:$0xff]  ;;  %v1446_v53 = vunpack.c.h.bf16 %v1233_v22  ;;  %v1445_v43 = vunpack.c.l.bf16 %v1233_v22  ;;  %v4418_v22 = vld [vmem:[%s4708_s7] sm:$0x3f] }
 0x31d   :  { %1937 = vmatprep.subr.mxu0 %v1332_v25  ;;  %2001 = vmatpush1.msra.mxu1 %v1547_v60  ;;  %v1227_v60 = vld [vmem:[%s4705_s6 + $0x1f0] sm:$0xff]  ;;  %v1440_v25 = vunpack.c.h.bf16 %v1230_v39  ;;  %v1439_v31 = vunpack.c.l.bf16 %v1230_v39 }
 0x31e   :  { %1938 = vmatpush1.msra.mxu0 %v1331_v62  ;;  %2002 = vmatprep.subr.mxu1 %v1542_v24  ;;  %v1224_v62 = vld [vmem:[%s4705_s6 + $0x1d8] sm:$0xff]  ;;  %v1434_v24 = vunpack.c.h.bf16 %v1227_v60  ;;  %v1433_v18 = vunpack.c.l.bf16 %v1227_v60 }
 0x31f   :  { %1939 = vmatprep.subr.mxu0 %v1326_v34  ;;  %2003 = vmatpush1.msra.mxu1 %v1541_v27  ;;  %v1221_v27 = vld [vmem:[%s4705_s6 + $0x1c0] sm:$0xff]  ;;  %v1428_v34 = vunpack.c.h.bf16 %v1224_v62  ;;  %v1427_v40 = vunpack.c.l.bf16 %v1224_v62  ;;  %v2167_v62 = vld [vmem:[%s4707_s10 + $0xc] sm:$0xff] }
 0x320   :  { %1940 = vmatpush1.msra.mxu0 %v1325_v45  ;;  %2004 = vmatprep.subr.mxu1 %v1536_v47  ;;  %v1218_v45 = vld [vmem:[%s4705_s6 + $0x1a8] sm:$0xff]  ;;  %v1422_v47 = vunpack.c.h.bf16 %v1221_v27  ;;  %v1421_v30 = vunpack.c.l.bf16 %v1221_v27  ;;  %v2264_v27 = vunpack.c.l.bf16 %v2167_v62 }
 0x321   :  { %1941 = vmatprep.subr.mxu0 %v1320_v41  ;;  %2005 = vmatpush1.msra.mxu1 %v1535_v49  ;;  %v1215_v49 = vld [vmem:[%s4705_s6 + $0x190] sm:$0xff]  ;;  %v1416_v41 = vunpack.c.h.bf16 %v1218_v45  ;;  %v1415_v2 = vunpack.c.l.bf16 %v1218_v45 }
 0x322   :  { %1942 = vmatpush1.msra.mxu0 %v1319_v3  ;;  %2006 = vmatprep.subr.mxu1 %v1530_v10  ;;  %v1410_v3 = vunpack.c.h.bf16 %v1215_v49  ;;  %v1409_v10 = vunpack.c.l.bf16 %v1215_v49  ;;  %v2227_v49 = vld [vmem:[%s4707_s10 + $0x174] sm:$0xff] }
 0x323   :  { %1943 = vmatprep.subr.mxu0 %v1314_v58  ;;  %2007 = vmatpush1.msra.mxu1 %v1529_v0  ;;  %v2307_v0 = vunpack.c.h.bf16 %v2195_v61  ;;  %v2306_v58 = vunpack.c.l.bf16 %v2195_v61 }
 0x324   :  { %1944 = vmatpush1.msra.mxu0 %v1313_v42  ;;  %2008 = vmatprep.subr.mxu1 %v1524_v51  ;;  %v2304_v42 = vunpack.c.h.bf16 %v2193_v1  ;;  %v2303_v51 = vunpack.c.l.bf16 %v2193_v1  ;;  %v2225_v1 = vld [vmem:[%s4707_s10 + $0x168] sm:$0xff] }
 0x325   :  { %1945 = vmatprep.subr.mxu0 %v1500_v8  ;;  %2009 = vmatpush1.msra.mxu1 %v1523_v59  ;;  %v2189_v8 = vld [vmem:[%s4707_s10 + $0x90] sm:$0xff] }
 0x326   :  { %1946 = vmatpush2.msra.mxu0 %v1499_v57  ;;  %2010 = vmatprep.subr.mxu1 %v1518_v9  ;;  %v2298_v56 = vunpack.c.h.bf16 %v2189_v8  ;;  %v2297_v57 = vunpack.c.l.bf16 %v2189_v8  ;;  %v2187_v9 = vld [vmem:[%s4707_s10 + $0x84] sm:$0xff]  ;;  %v2351_v8 = vunpack.c.l.bf16 %v2225_v1 }
 0x327   :  { %1947 = vmatprep.subr.mxu0 %v1494_v35  ;;  %2011 = vmatpush1.msra.mxu1 %v1517_v11  ;;  %v2295_v6 = vunpack.c.h.bf16 %v2187_v9  ;;  %v2294_v11 = vunpack.c.l.bf16 %v2187_v9  ;;  %v2185_v35 = vld [vmem:[%s4707_s10 + $0x78] sm:$0xff] }
 0x328   :  { %1948 = vmatpush2.msra.mxu0 %v1493_v29  ;;  %2012 = vmatprep.subr.mxu1 %v1512_v54  ;;  %v2292_v12 = vunpack.c.h.bf16 %v2185_v35  ;;  %v2291_v29 = vunpack.c.l.bf16 %v2185_v35  ;;  %v2183_v54 = vld [vmem:[%s4707_s10 + $0x6c] sm:$0xff] }
 0x329   :  { %1949 = vmatprep.subr.mxu0 %v1488_v20  ;;  %2013 = vmatpush1.msra.mxu1 %v1511_v33  ;;  %v2289_v32 = vunpack.c.h.bf16 %v2183_v54  ;;  %v2288_v33 = vunpack.c.l.bf16 %v2183_v54  ;;  %v2181_v20 = vld [vmem:[%s4707_s10 + $0x60] sm:$0xff] }
 0x32a   :  { %1950 = vmatpush2.msra.mxu0 %v1487_v7  ;;  %2014 = vmatprep.subr.mxu1 %v1506_v13  ;;  %v2286_v7 = vunpack.c.h.bf16 %v2181_v20  ;;  %v873_v13 = vlaneseq  ;;  %v2285_v14 = vunpack.c.l.bf16 %v2181_v20 }
 0x32b   :  { %1951 = vmatprep.subr.mxu0 %v1482_v55  ;;  %2015 = vmatpush1.msra.mxu1 %v1505_v23  ;;  %v2179_v23 = vld [vmem:[%s4707_s10 + $0x54] sm:$0xff] }
 0x32c   :  { %2048 = vmatprep.mubr.f32.mxu1 %v3276_v63  ;;  %1952 = vmatpush2.msra.mxu0 %v1481_v16  ;;  %v2283_v55 = vunpack.c.h.bf16 %v2179_v23  ;;  %v2282_v16 = vunpack.c.l.bf16 %v2179_v23 }
 0x32d   :  { %2049 = vmatmul.mubr.f32.vlgmr.msra.gmra.mxu1 %v4122_v50  ;;  %1953 = vmatprep.subr.mxu0 %v1476_v46  ;;  %v1451_v50 = vunpack.c.l.bf16 %v1236_v37  ;;  %v2280_v46 = vunpack.c.h.bf16 %v2177_v26 }
 0x32e   :  { %1954 = vmatpush2.msra.mxu0 %v1475_v48  ;;  %2422 = vmatprep.subr.mxu1 %v2307_v0  ;;  %v4401_v48 = vshrl.u32 %v873_v13, 7  ;;  %v2354_v0 = vunpack.c.l.bf16 %v2227_v49  ;;  %v2219_v13 = vld [vmem:[%s4707_s10 + $0x144] sm:$0xff] }
 0x32f   :  { %1955 = vmatprep.subr.mxu0 %v1470_v17  ;;  %2423 = vmatpush1.msra.mxu1 %v2306_v58  ;;  %v2175_v17 = vld [vmem:[%s4707_s10 + $0x3c] sm:$0xff]  ;;  %v2343_v23 = vunpack.c.h.bf16 %v2219_v13 }
 0x330   :  { %1956 = vmatpush2.msra.mxu0 %v1469_v21  ;;  %2424 = vmatprep.subr.mxu1 %v2304_v42  ;;  %v2277_v21 = vunpack.c.h.bf16 %v2175_v17  ;;  %v2276_v28 = vunpack.c.l.bf16 %v2175_v17  ;;  %v4410_v37 = vsub.s32 0, %v4401_v48  ;;  %vm2061_vm1 = vcmp.lt.s32.totalorder %v4401_v48, 2 }
 0x331   :  { %1957 = vmatprep.subr.mxu0 %v1464_v4  ;;  %2425 = vmatpush1.msra.mxu1 %v2303_v51  ;;  %v2173_v4 = vld [vmem:[%s4707_s10 + $0x30] sm:$0xff] }
 0x332   :  { %1958 = vmatpush2.msra.mxu0 %v1463_v52  ;;  %v2274_v52 = vunpack.c.h.bf16 %v2173_v4 }
 0x333   :  { %1959 = vmatprep.subr.mxu0 %v1458_v36  ;;  %v2273_v36 = vunpack.c.l.bf16 %v2173_v4 }
 0x334   :  { %1960 = vmatpush2.msra.mxu0 %v1457_v19  ;;  %v2171_v19 = vld [vmem:[%s4707_s10 + $0x24] sm:$0xff] }
 0x335   :  { %1961 = vmatprep.subr.mxu0 %v1452_v5  ;;  %v2271_v5 = vunpack.c.h.bf16 %v2171_v19  ;;  %v2270_v39 = vunpack.c.l.bf16 %v2171_v19 }
 0x336   :  { %1962 = vmatpush2.msra.mxu0 %v1451_v50  ;;  %v4421_v50 = vsub.s32 1, %v4401_v48 }
 0x337   :  { %1963 = vmatprep.subr.mxu0 %v1446_v53  ;;  %v2169_v53 = vld [vmem:[%s4707_s10 + $0x18] sm:$0xff] }
 0x338   :  { %1964 = vmatpush2.msra.mxu0 %v1445_v43  ;;  %v2268_v60 = vunpack.c.h.bf16 %v2169_v53 }
 0x339   :  { %1965 = vmatprep.subr.mxu0 %v1440_v25  ;;  %v1602_v25 = vrot.slane %v4418_v22, %v4410_v37 }
 0x33a   :  { %1966 = vmatpush2.msra.mxu0 %v1439_v31  ;;  %v2267_v31 = vunpack.c.l.bf16 %v2169_v53 }
 0x33b   :  { %1967 = vmatprep.subr.mxu0 %v1434_v24  ;;  %v2265_v24 = vunpack.c.h.bf16 %v2167_v62 }
 0x33c   :  { %1968 = vmatpush2.msra.mxu0 %v1433_v18  ;;  %v1606_v18 = vrot.slane %v4418_v22, %v4421_v50 }
 0x33d   :  { %1969 = vmatprep.subr.mxu0 %v1428_v34  ;;  %v2165_v34 = vld [vmem:[%s4707_s10] sm:$0xff] }
 0x33e   :  { %1970 = vmatpush2.msra.mxu0 %v1427_v40  ;;  %v2262_v45 = vunpack.c.h.bf16 %v2165_v34 }
 0x33f   :  { %1971 = vmatprep.subr.mxu0 %v1422_v47 }
 0x340   :  { %1972 = vmatpush2.msra.mxu0 %v1421_v30  ;;  %v2261_v30 = vunpack.c.l.bf16 %v2165_v34 }
 0x341   :  { %1973 = vmatprep.subr.mxu0 %v1416_v41 }
 0x342   :  { %1974 = vmatpush2.msra.mxu0 %v1415_v2  ;;  %v2355_v2 = vunpack.c.h.bf16 %v2227_v49 }
 0x343   :  { %1975 = vmatprep.subr.mxu0 %v1410_v3  ;;  %v2259_v3 = vld [vmem:[%s4707_s10 + $0x234] sm:$0xff] }
 0x344   :  { %1976 = vmatpush2.msra.mxu0 %v1409_v10  ;;  %v2403_v58 = vunpack.c.h.bf16 %v2259_v3  ;;  %v2402_v51 = vunpack.c.l.bf16 %v2259_v3 }
 0x345   :  { %1978 = vmatmul.mubr.f32.vlgmr.msra.gmra.mxu0 %v4057_v38  ;;  %v2191_v38 = vld [vmem:[%s4707_s10 + $0x9c] sm:$0xff] }
 0x346   :  { %2557 = vmatprep.mubr.f32.mxu0 %v3276_v63  ;;  %v2301_v44 = vunpack.c.h.bf16 %v2191_v38  ;;  %v2300_v59 = vunpack.c.l.bf16 %v2191_v38  ;;  %v2352_v38 = vunpack.c.h.bf16 %v2225_v1  ;;  %2493 = vmatprep.subr.mxu0 %v2403_v58  ;;  %v2239_v1 = vld [vmem:[%s4707_s10 + $0x1bc] sm:$0xff] }
 0x347   :  { %2494 = vmatpush1.msra.mxu0 %v2402_v51  ;;  %v2373_v51 = vunpack.c.h.bf16 %v2239_v1 }
 0x348   :  { %2426 = vmatprep.subr.mxu1 %v2301_v44  ;;  %v2257_v44 = vld [vmem:[%s4707_s10 + $0x228] sm:$0xff] }
 0x349   :  { %2427 = vmatpush1.msra.mxu1 %v2300_v59  ;;  %v2399_v9 = vunpack.c.l.bf16 %v2257_v44 }
 0x34a   :  { %2428 = vmatprep.subr.mxu1 %v2298_v56  ;;  %v2400_v56 = vunpack.c.h.bf16 %v2257_v44  ;;  %v2372_v44 = vunpack.c.l.bf16 %v2239_v1  ;;  %v1621_v1 = vsub.s32 5, %v4401_v48 }
 0x34b   :  { %2429 = vmatpush1.msra.mxu1 %v2297_v57  ;;  %v2223_v57 = vld [vmem:[%s4707_s10 + $0x15c] sm:$0xff] }
 0x34c   :  { %2430 = vmatprep.subr.mxu1 %v2295_v6  ;;  %v2349_v6 = vunpack.c.h.bf16 %v2223_v57  ;;  %2495 = vmatprep.subr.mxu0 %v2400_v56  ;;  %v2348_v35 = vunpack.c.l.bf16 %v2223_v57 }
 0x34d   :  { %2431 = vmatpush1.msra.mxu1 %v2294_v11  ;;  %v2255_v11 = vld [vmem:[%s4707_s10 + $0x21c] sm:$0xff]  ;;  %2496 = vmatpush1.msra.mxu0 %v2399_v9  ;;  %v2203_v9 = vld [vmem:[%s4707_s10 + $0xe4] sm:$0xff] }
 0x34e   :  { %2432 = vmatprep.subr.mxu1 %v2292_v12  ;;  %v2397_v12 = vunpack.c.h.bf16 %v2255_v11  ;;  %v2396_v54 = vunpack.c.l.bf16 %v2255_v11  ;;  %v2319_v11 = vunpack.c.h.bf16 %v2203_v9 }
 0x34f   :  { %2433 = vmatpush1.msra.mxu1 %v2291_v29  ;;  %v2221_v29 = vld [vmem:[%s4707_s10 + $0x150] sm:$0xff] }
 0x350   :  { %2434 = vmatprep.subr.mxu1 %v2289_v32  ;;  %v2346_v32 = vunpack.c.h.bf16 %v2221_v29  ;;  %2497 = vmatprep.subr.mxu0 %v2397_v12  ;;  %v2345_v20 = vunpack.c.l.bf16 %v2221_v29  ;;  %v2318_v12 = vunpack.c.l.bf16 %v2203_v9 }
 0x351   :  { %2435 = vmatpush1.msra.mxu1 %v2288_v33  ;;  %v2253_v33 = vld [vmem:[%s4707_s10 + $0x210] sm:$0xff]  ;;  %2498 = vmatpush1.msra.mxu0 %v2396_v54  ;;  %v2201_v54 = vld [vmem:[%s4707_s10 + $0xd8] sm:$0xff] }
 0x352   :  { %2436 = vmatprep.subr.mxu1 %v2286_v7  ;;  %v2394_v7 = vunpack.c.h.bf16 %v2253_v33 }
 0x353   :  { %2437 = vmatpush1.msra.mxu1 %v2285_v14  ;;  %v2393_v14 = vunpack.c.l.bf16 %v2253_v33  ;;  %v2316_v33 = vunpack.c.h.bf16 %v2201_v54 }
 0x354   :  { %2438 = vmatprep.subr.mxu1 %v2283_v55  ;;  %v2251_v55 = vld [vmem:[%s4707_s10 + $0x204] sm:$0xff]  ;;  %2499 = vmatprep.subr.mxu0 %v2394_v7  ;;  %v2315_v7 = vunpack.c.l.bf16 %v2201_v54 }
 0x355   :  { %2439 = vmatpush1.msra.mxu1 %v2282_v16  ;;  %v2342_v16 = vunpack.c.l.bf16 %v2219_v13  ;;  %v2391_v26 = vunpack.c.h.bf16 %v2251_v55  ;;  %2500 = vmatpush1.msra.mxu0 %v2393_v14  ;;  %v2199_v14 = vld [vmem:[%s4707_s10 + $0xcc] sm:$0xff] }
 0x356   :  { %2440 = vmatprep.subr.mxu1 %v2280_v46  ;;  %v2217_v46 = vld [vmem:[%s4707_s10 + $0x138] sm:$0xff] }
 0x357   :  { %2441 = vmatpush1.msra.mxu1 %v2279_v15  ;;  %v2390_v15 = vunpack.c.l.bf16 %v2251_v55  ;;  %v2340_v17 = vunpack.c.h.bf16 %v2217_v46  ;;  %2501 = vmatprep.subr.mxu0 %v2391_v26  ;;  %v2313_v55 = vunpack.c.h.bf16 %v2199_v14  ;;  %v2312_v26 = vunpack.c.l.bf16 %v2199_v14 }
 0x358   :  { %2442 = vmatprep.subr.mxu1 %v2277_v21  ;;  %v2249_v21 = vld [vmem:[%s4707_s10 + $0x1f8] sm:$0xff] }
 0x359   :  { %2443 = vmatpush1.msra.mxu1 %v2276_v28  ;;  %v2339_v28 = vunpack.c.l.bf16 %v2217_v46  ;;  %v2388_v4 = vunpack.c.h.bf16 %v2249_v21  ;;  %2502 = vmatpush1.msra.mxu0 %v2390_v15  ;;  %v2197_v15 = vld [vmem:[%s4707_s10 + $0xc0] sm:$0xff] }
 0x35a   :  { %2444 = vmatprep.subr.mxu1 %v2274_v52  ;;  %v2215_v52 = vld [vmem:[%s4707_s10 + $0x12c] sm:$0xff] }
 0x35b   :  { %2445 = vmatpush1.msra.mxu1 %v2273_v36  ;;  %v2387_v36 = vunpack.c.l.bf16 %v2249_v21  ;;  %v2337_v19 = vunpack.c.h.bf16 %v2215_v52  ;;  %2503 = vmatprep.subr.mxu0 %v2388_v4  ;;  %v2310_v21 = vunpack.c.h.bf16 %v2197_v15  ;;  %v2309_v4 = vunpack.c.l.bf16 %v2197_v15 }
 0x35c   :  { %2446 = vmatprep.subr.mxu1 %v2271_v5  ;;  %v2247_v5 = vld [vmem:[%s4707_s10 + $0x1ec] sm:$0xff] }
 0x35d   :  { %2447 = vmatpush1.msra.mxu1 %v2270_v39  ;;  %v2336_v39 = vunpack.c.l.bf16 %v2215_v52  ;;  %v2385_v53 = vunpack.c.h.bf16 %v2247_v5  ;;  %2504 = vmatpush1.msra.mxu0 %v2387_v36 }
 0x35e   :  { %2448 = vmatprep.subr.mxu1 %v2268_v60  ;;  %v2384_v60 = vunpack.c.l.bf16 %v2247_v5  ;;  %v4544_v5 = vsub.s32 2, %v4401_v48 }
 0x35f   :  { %2449 = vmatpush1.msra.mxu1 %v2267_v31  ;;  %v2245_v31 = vld [vmem:[%s4707_s10 + $0x1e0] sm:$0xff]  ;;  %2505 = vmatprep.subr.mxu0 %v2385_v53 }
 0x360   :  { %2450 = vmatprep.subr.mxu1 %v2265_v24  ;;  %v2382_v24 = vunpack.c.h.bf16 %v2245_v31  ;;  %2506 = vmatpush1.msra.mxu0 %v2384_v60  ;;  %v1610_v53 = vrot.slane %v4418_v22, %v4544_v5 }
 0x361   :  { %2451 = vmatpush1.msra.mxu1 %v2264_v27  ;;  %v2381_v27 = vunpack.c.l.bf16 %v2245_v31  ;;  %v1613_v31 = vsub.s32 3, %v4401_v48 }
 0x362   :  { %2452 = vmatprep.subr.mxu1 %v2262_v45  ;;  %2507 = vmatprep.subr.mxu0 %v2382_v24 }
 0x363   :  { %2453 = vmatpush1.msra.mxu1 %v2261_v30  ;;  %v2209_v30 = vld [vmem:[%s4707_s10 + $0x108] sm:$0xff]  ;;  %2508 = vmatpush1.msra.mxu0 %v2381_v27  ;;  %v1614_v24 = vrot.slane %v4418_v22, %v1613_v31 }
 0x364   :  { %2454 = vmatprep.subr.mxu1 %v2355_v2  ;;  %v2241_v2 = vld [vmem:[%s4707_s10 + $0x1c8] sm:$0xff]  ;;  %v2327_v3 = vunpack.c.l.bf16 %v2209_v30 }
 0x365   :  { %2455 = vmatpush2.msra.mxu1 %v2354_v0  ;;  %v2375_v0 = vunpack.c.l.bf16 %v2241_v2 }
 0x366   :  { %2456 = vmatprep.subr.mxu1 %v2352_v38  ;;  %v2205_v38 = vld [vmem:[%s4707_s10 + $0xf0] sm:$0xff] }
 0x367   :  { %2457 = vmatpush2.msra.mxu1 %v2351_v8  ;;  %v2237_v8 = vld [vmem:[%s4707_s10 + $0x1b0] sm:$0xff]  ;;  %v2321_v56 = vunpack.c.l.bf16 %v2205_v38 }
 0x368   :  { %2458 = vmatprep.subr.mxu1 %v2349_v6  ;;  %v2370_v57 = vunpack.c.h.bf16 %v2237_v8  ;;  %v2369_v6 = vunpack.c.l.bf16 %v2237_v8 }
 0x369   :  { %2459 = vmatpush2.msra.mxu1 %v2348_v35  ;;  %v2235_v35 = vld [vmem:[%s4707_s10 + $0x1a4] sm:$0xff] }
 0x36a   :  { %2460 = vmatprep.subr.mxu1 %v2346_v32  ;;  %v2367_v29 = vunpack.c.h.bf16 %v2235_v35  ;;  %v2366_v32 = vunpack.c.l.bf16 %v2235_v35 }
 0x36b   :  { %2461 = vmatpush2.msra.mxu1 %v2345_v20  ;;  %v2233_v20 = vld [vmem:[%s4707_s10 + $0x198] sm:$0xff] }
 0x36c   :  { %2462 = vmatprep.subr.mxu1 %v2343_v23  ;;  %v2364_v13 = vunpack.c.h.bf16 %v2233_v20  ;;  %v2363_v23 = vunpack.c.l.bf16 %v2233_v20 }
 0x36d   :  { %2463 = vmatpush2.msra.mxu1 %v2342_v16  ;;  %v2231_v16 = vld [vmem:[%s4707_s10 + $0x18c] sm:$0xff] }
 0x36e   :  { %2464 = vmatprep.subr.mxu1 %v2340_v17  ;;  %v2361_v46 = vunpack.c.h.bf16 %v2231_v16  ;;  %v2360_v17 = vunpack.c.l.bf16 %v2231_v16 }
 0x36f   :  { %2465 = vmatpush2.msra.mxu1 %v2339_v28  ;;  %v2229_v28 = vld [vmem:[%s4707_s10 + $0x180] sm:$0xff] }
 0x370   :  { %2466 = vmatprep.subr.mxu1 %v2337_v19  ;;  %v2357_v52 = vunpack.c.l.bf16 %v2229_v28  ;;  %v2358_v36 = vunpack.c.h.bf16 %v2229_v28  ;;  %v4541_v19 = vld [vmem:[%s4707_s10 + $0x170] ss:$12 sps:$4 sm:$0xff]  }
 0x371   :  { %2467 = vmatpush2.msra.mxu1 %v2336_v39  ;;  %v2356_v39 = vunpack.c.h.bf16 %v4541_v19 }
 0x38a   :  { %v1695_v43 = vpop.f32.mrf.mxu1 }
 0x38b   :  { %v1696_v47 = vadd.f32 %v1695_v43, %v1602_v25  ;;  %v2213_v43 = vld [vmem:[%s4707_s10 + $0x120] sm:$0xff] }
 0x38c   :  { %v1697_v40 = vpop.f32.mrf.mxu1  ;;  %v2334_v25 = vunpack.c.h.bf16 %v2213_v43  ;;  %v2333_v62 = vunpack.c.l.bf16 %v2213_v43 }
 0x38d   :  { %v1698_v10 = vadd.f32 %v1697_v40, %v1606_v18  ;;  %v2211_v18 = vld [vmem:[%s4707_s10 + $0x114] sm:$0xff] }
 0x38e   :  { %2468 = vmatprep.subr.mxu1 %v2334_v25  ;;  %v2331_v34 = vunpack.c.h.bf16 %v2211_v18  ;;  %v2243_v40 = vld [vmem:[%s4707_s10 + $0x1d4] sm:$0xff]  ;;  %v2330_v45 = vunpack.c.l.bf16 %v2211_v18 }
 0x38f   :  { %2469 = vmatpush2.msra.mxu1 %v2333_v62  ;;  %v2378_v49 = vunpack.c.l.bf16 %v2243_v40 }
 0x390   :  { %2470 = vmatprep.subr.mxu1 %v2331_v34 }
 0x391   :  { %2471 = vmatpush2.msra.mxu1 %v2330_v45 }
 0x3a3   :  { %v1766_v41 = vpop.f32.mrf.mxu0 }
 0x3a4   :  { %v1767_v61 = vadd.f32 %v1766_v41, %v1696_v47  ;;  %v2379_v47 = vunpack.c.h.bf16 %v2243_v40  ;;  %v2328_v41 = vunpack.c.h.bf16 %v2209_v30 }
 0x3a5   :  { %v1768_v42 = vpop.f32.mrf.mxu0 }
 0x3a6   :  { %2055 = vst [vmem:[%s4709_s13] sm:$0xff] %v1767_v61  ;;  %v1769_v59 = vadd.f32 %v1768_v42, %v1698_v10  ;;  %2509 = vmatprep.subr.mxu0 %v2379_v47  ;;  %v2376_v10 = vunpack.c.h.bf16 %v2241_v2  ;;  %v2207_v61 = vld [vmem:[%s4707_s10 + $0xfc] sm:$0xff]  ;;  %2472 = vmatprep.subr.mxu1 %v2328_v41 }
 0x3a7   :  { %2510 = vmatpush1.msra.mxu0 %v2378_v49  ;;  %v2325_v58 = vunpack.c.h.bf16 %v2207_v61  ;;  %2473 = vmatpush2.msra.mxu1 %v2327_v3  ;;  %v2324_v42 = vunpack.c.l.bf16 %v2207_v61 }
 0x3a8   :  { %2056 = vst [vmem:[%s4709_s13 + $0x8] sm:$0xff] %v1769_v59  ;;  %2511 = vmatprep.subr.mxu0 %v2376_v10  ;;  %v2322_v59 = vunpack.c.h.bf16 %v2205_v38  ;;  %v1622_v38 = vrot.slane %v4418_v22, %v1621_v1 }
 0x3a9   :  { %2474 = vmatprep.subr.mxu1 %v2325_v58  ;;  %2512 = vmatpush1.msra.mxu0 %v2375_v0  ;;  %v1617_v0 = vsub.s32 4, %v4401_v48 }
 0x3aa   :  { %2475 = vmatpush2.msra.mxu1 %v2324_v42  ;;  %2513 = vmatprep.subr.mxu0 %v2373_v51 }
 0x3ab   :  { %2476 = vmatprep.subr.mxu1 %v2322_v59  ;;  %2514 = vmatpush1.msra.mxu0 %v2372_v44  ;;  %v1618_v42 = vrot.slane %v4418_v22, %v1617_v0 }
 0x3ac   :  { %2477 = vmatpush2.msra.mxu1 %v2321_v56  ;;  %2515 = vmatprep.subr.mxu0 %v2370_v57 }
 0x3ad   :  { %2478 = vmatprep.subr.mxu1 %v2319_v11  ;;  %2516 = vmatpush1.msra.mxu0 %v2369_v6 }
 0x3ae   :  { %2479 = vmatpush2.msra.mxu1 %v2318_v12  ;;  %2517 = vmatprep.subr.mxu0 %v2367_v29 }
 0x3af   :  { %2480 = vmatprep.subr.mxu1 %v2316_v33  ;;  %2518 = vmatpush1.msra.mxu0 %v2366_v32 }
 0x3b0   :  { %2481 = vmatpush2.msra.mxu1 %v2315_v7  ;;  %2519 = vmatprep.subr.mxu0 %v2364_v13 }
 0x3b1   :  { %2482 = vmatprep.subr.mxu1 %v2313_v55  ;;  %2520 = vmatpush1.msra.mxu0 %v2363_v23 }
 0x3b2   :  { %2483 = vmatpush2.msra.mxu1 %v2312_v26  ;;  %2521 = vmatprep.subr.mxu0 %v2361_v46 }
 0x3b3   :  { %2484 = vmatprep.subr.mxu1 %v2310_v21  ;;  %2522 = vmatpush1.msra.mxu0 %v2360_v17 }
 0x3b4   :  { %2485 = vmatpush2.msra.mxu1 %v2309_v4  ;;  %2523 = vmatprep.subr.mxu0 %v2358_v36 }
 0x3b5   :  { %2524 = vmatpush1.msra.mxu0 %v2357_v52  ;;  %3153 = vmatprep.subr.mxu1 %v3276_v63 }
 0x3b6   :  { %2980 = vmatprep.subr.mxu0 %v2356_v39 }
 0x3c4   :  { %v1908_v25 = vpop.f32.mrf.mxu0 }
 0x3c6   :  { %v1910_v34 = vpop.f32.mrf.mxu0 }
 0x3cb   :  { %v1837_v43 = vpop.f32.mrf.mxu1 }
 0x3cc   :  { %v1838_v60 = vadd.f32 %v1837_v43, %v1610_v53 }
 0x3cd   :  { %v1839_v18 = vpop.f32.mrf.mxu1 }
 0x3ce   :  { %v1909_v62 = vadd.f32 %v1908_v25, %v1838_v60  ;;  %v1840_v27 = vadd.f32 %v1839_v18, %v1614_v24 }
 0x3d0   :  { %2057 = vst [vmem:[%s4709_s13 + $0x10] sm:$0xff] %v1909_v62  ;;  %v1911_v40 = vadd.f32 %v1910_v34, %v1840_v27 }
 0x3d2   :  { %v2058_v45 = vmax.f32 %v1911_v40, 0.0 }
 0x3d4   :  { %v2062_v47 = vsel %vm2061_vm1, %v2058_v45, 0.0 }
 0x3d5   :  { %v2065_v30 = vrot.slane %v2062_v47, 4 }
 0x3d7   :  { %v2066_v49 = vadd.f32 %v2065_v30, %v2062_v47 }
 0x3d9   :  { %v2067_v41 = vrot.slane %v2066_v49, 2 }
 0x3db   :  { %v2068_v2 = vadd.f32 %v2067_v41, %v2066_v49 }
 0x3dd   :  { %v2069_v3 = vrot.slane %v2068_v2, 1 }
 0x3df   :  { %v2070_v10 = vadd.f32 %v2069_v3, %v2068_v2 }
 0x3e1   :  { %v2083_v61 = vmul.f32 0.5, %v2070_v10 }
 0x3e3   :  { %v4559_v58 = vsub.f32 %v2058_v45, %v2083_v61 }
 0x3e5   :  { %v2089_v51 = vmul.f32 %v4559_v58, %v4559_v58 }
 0x3e7   :  { %v2092_v57 = vsel %vm2061_vm1, %v2089_v51, 0.0 }
 0x3e8   :  { %v2095_v29 = vrot.slane %v2092_v57, 4 }
 0x3ea   :  { %v2096_v20 = vadd.f32 %v2095_v29, %v2092_v57  ;;  %v2145_v57 = vld [vmem:[%s4711_s9] sm:$0x7] }
 0x3ec   :  { %v2097_v55 = vrot.slane %v2096_v20, 2 }
 0x3ed   :  { %v2050_v44 = vpop.f32.mrf.mxu1 }
 0x3ee   :  { %v2098_v17 = vadd.f32 %v2097_v55, %v2096_v20  ;;  %v2196_v20 = vld [vmem:[%s4707_s10 + $0xb0] ss:$12 sps:$4 sm:$0xff]  }
 0x3ef   :  { %v2052_v11 = vpop.f32.mrf.mxu1  ;;  %v2308_v55 = vunpack.c.h.bf16 %v2196_v20 }
 0x3f0   :  { %v2099_v36 = vrot.slane %v2098_v17, 1 }
 0x3f2   :  { %v2100_v25 = vadd.f32 %v2099_v36, %v2098_v17  ;;  %v2192_v17 = vld [vmem:[%s4707_s10 + $0x98] ss:$12 sps:$4 sm:$0xff]   ;;  %v2220_v36 = vld [vmem:[%s4707_s10 + $0x140] ss:$12 sps:$4 sm:$0xff]  }
 0x3f4   :  { %v2113_v40 = vmul.f32 0.5, %v2100_v25  ;;  %v2299_v25 = vunpack.c.l.bf16 %v2192_v17 }
 0x3f6   :  { %v2116_v41 = vadd.f32 1e-05, %v2113_v40  ;;  %v2184_v40 = vld [vmem:[%s4707_s10 + $0x68] ss:$12 sps:$4 sm:$0xff]  }
 0x3f8   :  { %3270 = vrsqrt.f32 %v2116_v41  ;;  %v2290_v41 = vunpack.c.h.bf16 %v2184_v40 }
 0x405   :  { %v1979_v59 = vpop.f32.mrf.mxu0 }
 0x406   :  { %v1980_v8 = vadd.f32 %v1979_v59, %v1618_v42 }
 0x407   :  { %v1981_v56 = vpop.f32.mrf.mxu0 }
 0x408   :  { %v2051_v9 = vadd.f32 %v2050_v44, %v1980_v8  ;;  %v1982_v6 = vadd.f32 %v1981_v56, %v1622_v38  ;;  %v3271_v38 = vpop.eup %3270  ;;  %v2125_v44 = vld [vmem:[%s4710_s8] sm:$0x7] }
 0x409   :  { %v2122_v59 = vmul.f32 %v3271_v38, %v4559_v58  ;;  %v2130_v8 = vrot.slane %v2125_v44, %v4410_v37  ;;  %v2134_v56 = vrot.slane %v2125_v44, %v4421_v50  ;;  %v2260_v58 = vld [vmem:[%s4707_s10 + $0x230] ss:$12 sps:$4 sm:$0xff]   ;;  %v2208_v38 = vld [vmem:[%s4707_s10 + $0xf8] ss:$12 sps:$4 sm:$0xff]  }
 0x40a   :  { %v2059_v35 = vmax.f32 %v2051_v9, 0.0  ;;  %v2053_v12 = vadd.f32 %v2052_v11, %v1982_v6  ;;  %v2138_v11 = vrot.slane %v2125_v44, %v4544_v5 }
 0x40b   :  { %v2142_v29 = vmul.f32 %v2130_v8, %v2122_v59  ;;  %v2240_v59 = vld [vmem:[%s4707_s10 + $0x1b8] ss:$12 sps:$4 sm:$0xff]  }
 0x40c   :  { %v2063_v54 = vsel %vm2061_vm1, %v2059_v35, 0.0  ;;  %v2060_v32 = vmax.f32 %v2053_v12, 0.0  ;;  %v2176_v8 = vld [vmem:[%s4707_s10 + $0x38] ss:$12 sps:$4 sm:$0xff]  }
 0x40d   :  { %v2071_v33 = vrot.slane %v2063_v54, 4 }
 0x40e   :  { %v2064_v22 = vsel %vm2061_vm1, %v2060_v32, 0.0 }
 0x40f   :  { %v2072_v7 = vadd.f32 %v2071_v33, %v2063_v54  ;;  %v2077_v13 = vrot.slane %v2064_v22, 4  ;;  %v2150_v54 = vrot.slane %v2145_v57, %v4410_v37 }
 0x411   :  { %v2073_v14 = vrot.slane %v2072_v7, 2  ;;  %v2078_v23 = vadd.f32 %v2077_v13, %v2064_v22  ;;  %v2158_v22 = vrot.slane %v2145_v57, %v4544_v5 }
 0x413   :  { %v2074_v16 = vadd.f32 %v2073_v14, %v2072_v7  ;;  %v2079_v26 = vrot.slane %v2078_v23, 2  ;;  %v2404_v14 = vunpack.c.h.bf16 %v2260_v58 }
 0x415   :  { %v2075_v46 = vrot.slane %v2074_v16, 1  ;;  %v2080_v15 = vadd.f32 %v2079_v26, %v2078_v23  ;;  %v4595_v23 = vadd.f32 %v2150_v54, %v2142_v29  ;;  %v2236_v29 = vld [vmem:[%s4707_s10 + $0x1a0] ss:$12 sps:$4 sm:$0xff]  }
 0x416   :  { %v2172_v54 = vld [vmem:[%s4707_s10 + $0x20] ss:$12 sps:$4 sm:$0xff]  }
 0x417   :  { %v2076_v21 = vadd.f32 %v2075_v46, %v2074_v16  ;;  %v2081_v28 = vrot.slane %v2080_v15, 1  ;;  %v2224_v16 = vld [vmem:[%s4707_s10 + $0x158] ss:$12 sps:$4 sm:$0xff]   ;;  %v2353_v46 = vunpack.c.l.bf16 %v4541_v19 }
 0x419   :  { %v2084_v4 = vmul.f32 0.5, %v2076_v21  ;;  %v2082_v52 = vadd.f32 %v2081_v28, %v2080_v15  ;;  %v2256_v15 = vld [vmem:[%s4707_s10 + $0x218] ss:$12 sps:$4 sm:$0xff]   ;;  %v2401_v21 = vunpack.c.l.bf16 %v2260_v58  ;;  %v2305_v28 = vunpack.c.l.bf16 %v2196_v20 }
 0x41a   :  { %v2398_v19 = vunpack.c.h.bf16 %v2256_v15  ;;  %v2371_v58 = vunpack.c.l.bf16 %v2240_v59  ;;  %v2272_v20 = vunpack.c.h.bf16 %v2172_v54 }
 0x41b   :  { %v2087_v39 = vsub.f32 %v2059_v35, %v2084_v4  ;;  %v2085_v53 = vmul.f32 0.5, %v2082_v52  ;;  %v2154_v35 = vrot.slane %v2145_v57, %v4421_v50  ;;  %v2350_v4 = vunpack.c.h.bf16 %v2224_v16 }
 0x41c   :  { %v2302_v52 = vunpack.c.h.bf16 %v2192_v17 }
 0x41d   :  { %v2090_v43 = vmul.f32 %v2087_v39, %v2087_v39  ;;  %v2088_v60 = vsub.f32 %v2060_v32, %v2085_v53  ;;  %v2252_v53 = vld [vmem:[%s4707_s10 + $0x200] ss:$12 sps:$4 sm:$0xff]  }
 0x41f   :  { %v2093_v31 = vsel %vm2061_vm1, %v2090_v43, 0.0  ;;  %v2091_v62 = vmul.f32 %v2088_v60, %v2088_v60  ;;  %v2188_v43 = vld [vmem:[%s4707_s10 + $0x80] ss:$12 sps:$4 sm:$0xff]  }
 0x420   :  { %v2101_v24 = vrot.slane %v2093_v31, 4 }
 0x421   :  { %v2094_v18 = vsel %vm2061_vm1, %v2091_v62, 0.0  ;;  %v2392_v62 = vunpack.c.h.bf16 %v2252_v53 }
 0x422   :  { %v2102_v27 = vadd.f32 %v2101_v24, %v2093_v31  ;;  %v2107_v34 = vrot.slane %v2094_v18, 4  ;;  %v2344_v31 = vunpack.c.h.bf16 %v2220_v36  ;;  %v2296_v24 = vunpack.c.h.bf16 %v2188_v43 }
 0x424   :  { %v2103_v45 = vrot.slane %v2102_v27, 2  ;;  %v2108_v47 = vadd.f32 %v2107_v34, %v2094_v18  ;;  %v2216_v18 = vld [vmem:[%s4707_s10 + $0x128] ss:$12 sps:$4 sm:$0xff]  }
 0x425   :  { %v2248_v34 = vld [vmem:[%s4707_s10 + $0x1e8] ss:$12 sps:$4 sm:$0xff]  }
 0x426   :  { %v2104_v30 = vadd.f32 %v2103_v45, %v2102_v27  ;;  %v2109_v49 = vrot.slane %v2108_v47, 2  ;;  %v2341_v27 = vunpack.c.l.bf16 %v2220_v36  ;;  %v2389_v45 = vunpack.c.l.bf16 %v2252_v53 }
 0x428   :  { %v2105_v2 = vrot.slane %v2104_v30, 1  ;;  %v2110_v3 = vadd.f32 %v2109_v49, %v2108_v47  ;;  %v2293_v47 = vunpack.c.l.bf16 %v2188_v43  ;;  %v2386_v49 = vunpack.c.h.bf16 %v2248_v34 }
 0x42a   :  { %v2106_v10 = vadd.f32 %v2105_v2, %v2104_v30  ;;  %v2111_v61 = vrot.slane %v2110_v3, 1  ;;  %v2338_v30 = vunpack.c.h.bf16 %v2216_v18  ;;  %v2212_v2 = vld [vmem:[%s4707_s10 + $0x110] ss:$12 sps:$4 sm:$0xff]  }
 0x42b   :  { %v2329_v44 = vunpack.c.l.bf16 %v2212_v2 }
 0x42c   :  { %v2114_v0 = vmul.f32 0.5, %v2106_v10  ;;  %v2112_v1 = vadd.f32 %v2111_v61, %v2110_v3  ;;  %v2335_v3 = vunpack.c.l.bf16 %v2216_v18  ;;  %v2244_v10 = vld [vmem:[%s4707_s10 + $0x1d0] ss:$12 sps:$4 sm:$0xff]  }
 0x42d   :  { %v2180_v61 = vld [vmem:[%s4707_s10 + $0x50] ss:$12 sps:$4 sm:$0xff]  }
 0x42e   :  { %v2117_v42 = vadd.f32 1e-05, %v2114_v0  ;;  %v2115_v51 = vmul.f32 0.5, %v2112_v1  ;;  %v2383_v0 = vunpack.c.l.bf16 %v2248_v34  ;;  %v2287_v1 = vunpack.c.l.bf16 %v2184_v40 }
 0x42f   :  { %v2281_v57 = vunpack.c.l.bf16 %v2180_v61 }
 0x430   :  { %3272 = vrsqrt.f32 %v2117_v42  ;;  %v2118_v48 = vadd.f32 1e-05, %v2115_v51  ;;  %v2332_v42 = vunpack.c.h.bf16 %v2212_v2  ;;  %v2380_v51 = vunpack.c.h.bf16 %v2244_v10 }
 0x432   :  { %3274 = vrsqrt.f32 %v2118_v48  ;;  %v2284_v48 = vunpack.c.h.bf16 %v2180_v61 }
 0x43d   :  { %v3273_v9 = vpop.eup %3272 }
 0x43e   :  { %v2123_v6 = vmul.f32 %v3273_v9, %v2087_v39  ;;  %v2347_v39 = vunpack.c.l.bf16 %v2224_v16  ;;  %v2326_v9 = vunpack.c.h.bf16 %v2208_v38  ;;  %v2365_v16 = vunpack.c.l.bf16 %v2236_v29 }
 0x43f   :  { %v3275_v12 = vpop.eup %3274 }
 0x440   :  { %v2124_v32 = vmul.f32 %v3275_v12, %v2088_v60  ;;  %v2143_v33 = vmul.f32 %v2134_v56, %v2123_v6  ;;  %v2395_v60 = vunpack.c.l.bf16 %v2256_v15  ;;  %v2377_v56 = vunpack.c.l.bf16 %v2244_v10 }
 0x441   :  { %v2374_v6 = vunpack.c.h.bf16 %v2240_v59  ;;  %v2323_v12 = vunpack.c.l.bf16 %v2208_v38 }
 0x442   :  { %v2144_v7 = vmul.f32 %v2138_v11, %v2124_v32  ;;  %v2163_v13 = vadd.f32 %v2154_v35, %v2143_v33  ;;  %v2278_v11 = vunpack.c.h.bf16 %v2176_v8  ;;  %v2204_v35 = vld [vmem:[%s4707_s10 + $0xe0] ss:$12 sps:$4 sm:$0xff]   ;;  %v2275_v32 = vunpack.c.l.bf16 %v2176_v8 }
 0x443   :  { %v2320_v33 = vunpack.c.h.bf16 %v2204_v35 }
 0x444   :  { %2486 = vmatprep.mubr.f32.mxu1 %v2163_v13  ;;  %v4600_v26 = vadd.f32 %v2158_v22, %v2144_v7  ;;  %v2368_v22 = vunpack.c.h.bf16 %v2236_v29  ;;  %v2200_v7 = vld [vmem:[%s4707_s10 + $0xc8] ss:$12 sps:$4 sm:$0xff]  }
 0x445   :  { %2487 = vmatmul.mubr.f32.vlgmr.msra.gmra.mxu1 %v4595_v23  ;;  %v2314_v15 = vunpack.c.h.bf16 %v2200_v7 }
 0x446   :  { %3154 = vmatpush3.msra.mxu1 %v2404_v14  ;;  %2558 = vmatmul.mubr.f32.vlgmr.msra.gmra.mxu0 %v4600_v26  ;;  %v2232_v14 = vld [vmem:[%s4707_s10 + $0x188] ss:$12 sps:$4 sm:$0xff]  }
 0x447   :  { %2981 = vmatpush3.msra.mxu0 %v2308_v55  ;;  %3155 = vmatprep.subr.mxu1 %v3276_v63  ;;  %v2168_v55 = vld [vmem:[%s4707_s10 + $0x8] ss:$12 sps:$4 sm:$0xff]   ;;  %v2362_v17 = vunpack.c.h.bf16 %v2232_v14 }
 0x448   :  { %2982 = vmatprep.subr.mxu0 %v2353_v46  ;;  %2628 = vmatprep.mubr.f32.mxu0 %v2163_v13  ;;  %v2317_v13 = vunpack.c.l.bf16 %v2204_v35  ;;  %v2269_v46 = vunpack.c.l.bf16 %v2172_v54 }
 0x449   :  { %3156 = vmatpush3.msra.mxu1 %v2401_v21  ;;  %2983 = vmatpush3.msra.mxu0 %v2305_v28  ;;  %v2266_v21 = vunpack.c.h.bf16 %v2168_v55  ;;  %v2311_v28 = vunpack.c.l.bf16 %v2200_v7 }
 0x44a   :  { %3157 = vmatprep.subr.mxu1 %v3276_v63  ;;  %2984 = vmatprep.subr.mxu0 %v2350_v4  ;;  %v2359_v4 = vunpack.c.l.bf16 %v2232_v14 }
 0x44b   :  { %3158 = vmatpush3.msra.mxu1 %v2398_v19  ;;  %2985 = vmatpush3.msra.mxu0 %v2302_v52  ;;  %v2263_v19 = vunpack.c.l.bf16 %v2168_v55  ;;  %v2405_v52 = vld [vmem:[%s4712_s11] sm:$0x7] }
 0x44c   :  { %3159 = vmatprep.subr.mxu1 %v3276_v63  ;;  %2986 = vmatprep.subr.mxu0 %v2347_v39  ;;  %v2410_v36 = vrot.slane %v2405_v52, %v4410_v37  ;;  %v2414_v39 = vrot.slane %v2405_v52, %v4421_v50  ;;  %v2418_v50 = vrot.slane %v2405_v52, %v4544_v5 }
 0x44d   :  { %3160 = vmatpush3.msra.mxu1 %v2395_v60  ;;  %2987 = vmatpush3.msra.mxu0 %v2299_v25 }
 0x44e   :  { %3161 = vmatprep.subr.mxu1 %v3276_v63  ;;  %2988 = vmatprep.subr.mxu0 %v2344_v31 }
 0x44f   :  { %3162 = vmatpush3.msra.mxu1 %v2392_v62  ;;  %2989 = vmatpush3.msra.mxu0 %v2296_v24 }
 0x450   :  { %3163 = vmatprep.subr.mxu1 %v3276_v63  ;;  %2990 = vmatprep.subr.mxu0 %v2341_v27 }
 0x451   :  { %3164 = vmatpush3.msra.mxu1 %v2389_v45  ;;  %2991 = vmatpush3.msra.mxu0 %v2293_v47 }
 0x452   :  { %3165 = vmatprep.subr.mxu1 %v3276_v63  ;;  %2992 = vmatprep.subr.mxu0 %v2338_v30 }
 0x453   :  { %3166 = vmatpush3.msra.mxu1 %v2386_v49  ;;  %2993 = vmatpush3.msra.mxu0 %v2290_v41 }
 0x454   :  { %3167 = vmatprep.subr.mxu1 %v3276_v63  ;;  %2994 = vmatprep.subr.mxu0 %v2335_v3 }
 0x455   :  { %3168 = vmatpush3.msra.mxu1 %v2383_v0  ;;  %2995 = vmatpush3.msra.mxu0 %v2287_v1 }
 0x456   :  { %3169 = vmatprep.subr.mxu1 %v3276_v63  ;;  %2996 = vmatprep.subr.mxu0 %v2332_v42 }
 0x457   :  { %3170 = vmatpush3.msra.mxu1 %v2380_v51  ;;  %2997 = vmatpush3.msra.mxu0 %v2284_v48 }
 0x458   :  { %3171 = vmatprep.subr.mxu1 %v3276_v63  ;;  %2998 = vmatprep.subr.mxu0 %v2329_v44 }
 0x459   :  { %3172 = vmatpush3.msra.mxu1 %v2377_v56  ;;  %2999 = vmatpush3.msra.mxu0 %v2281_v57 }
 0x45a   :  { %3173 = vmatprep.subr.mxu1 %v3276_v63  ;;  %3000 = vmatprep.subr.mxu0 %v2326_v9 }
 0x45b   :  { %3174 = vmatpush3.msra.mxu1 %v2374_v6  ;;  %3001 = vmatpush3.msra.mxu0 %v2278_v11 }
 0x45c   :  { %3175 = vmatprep.subr.mxu1 %v3276_v63  ;;  %3002 = vmatprep.subr.mxu0 %v2323_v12 }
 0x45d   :  { %3176 = vmatpush3.msra.mxu1 %v2371_v58  ;;  %3003 = vmatpush3.msra.mxu0 %v2275_v32 }
 0x45e   :  { %3177 = vmatprep.subr.mxu1 %v3276_v63  ;;  %3004 = vmatprep.subr.mxu0 %v2320_v33 }
 0x45f   :  { %3178 = vmatpush3.msra.mxu1 %v2368_v22  ;;  %3005 = vmatpush3.msra.mxu0 %v2272_v20 }
 0x460   :  { %3179 = vmatprep.subr.mxu1 %v3276_v63  ;;  %3006 = vmatprep.subr.mxu0 %v2317_v13 }
 0x461   :  { %3180 = vmatpush3.msra.mxu1 %v2365_v16  ;;  %3007 = vmatpush3.msra.mxu0 %v2269_v46 }
 0x462   :  { %3181 = vmatprep.subr.mxu1 %v3276_v63  ;;  %3008 = vmatprep.subr.mxu0 %v2314_v15 }
 0x463   :  { %3182 = vmatpush3.msra.mxu1 %v2362_v17  ;;  %3009 = vmatpush3.msra.mxu0 %v2266_v21 }
 0x464   :  { %3183 = vmatprep.subr.mxu1 %v3276_v63  ;;  %3010 = vmatprep.subr.mxu0 %v2311_v28 }
 0x465   :  { %3184 = vmatpush3.msra.mxu1 %v2359_v4  ;;  %3185 = vmatprep.mubr.msk.f32.mxu1 %vm3277_vm0, %v3276_v63 }
 0x466   :  { %3011 = vmatpush3.msra.mxu0 %v2263_v19  ;;  %3186 = vmatmul.mubr.f32.vlgmr.msra.gmra.mxu1 %v4600_v26 }
 0x467   :  { %2629 = vmatmul.mubr.f32.vlgmr.msra.gmra.mxu0 %v4595_v23 }
 0x505   :  { %v2488_v53 = vpop.f32.mrf.mxu1 }
 0x506   :  { %v2489_v43 = vadd.f32 %v2488_v53, %v2410_v36  ;;  %v2559_v60 = vpop.f32.mrf.mxu0 }
 0x507   :  { %v2490_v25 = vpop.f32.mrf.mxu1 }
 0x508   :  { %v2560_v31 = vadd.f32 %v2559_v60, %v2489_v43  ;;  %v2491_v62 = vadd.f32 %v2490_v25, %v2414_v39  ;;  %v2561_v63 = vpop.f32.mrf.mxu0 }
 0x50a   :  { %2704 = vst [vmem:[%s4713_s14] sm:$0xff] %v2560_v31  ;;  %v2562_v23 = vadd.f32 %v2561_v63, %v2491_v62 }
 0x50c   :  { %2705 = vst [vmem:[%s4713_s14 + $0x8] sm:$0xff] %v2562_v23 }
 0x526   :  { %v2700_v26 = vpop.f32.mrf.mxu1 }
 0x527   :  { %v3012_v37 = vpop.f32.mrf.mxu0 }
 0x528   :  { %v3187_v24 = vpop.f32.mrf.mxu1 }
 0x529   :  { %v3013_v18 = vpop.f32.mrf.mxu0 }
 0x52a   :  { %v3014_v27 = vadd.f32 %v3013_v18, %v3012_v37 }
 0x52c   :  { %v2631_v34 = vadd.f32 %v3014_v27, %v2418_v50 }
 0x52e   :  { %v2701_v40 = vadd.f32 %v2700_v26, %v2631_v34 }
 0x530   :  { %2706 = vst [vmem:[%s4713_s14 + $0x10] sm:$0xff] %v2701_v40 }

</bundles_post_ra>
